<compile_context>
chip_gen: v7x
topology: tpu7x:2x2x1
jax: 0.10.0
libtpu: 0.0.40
codegen_flags: <defaults>
</compile_context>

<pallas_src>
import functools

import jax
import jax.numpy as jnp
from jax import lax
from jax.experimental import pallas as pl
from jax.experimental.pallas import tpu as pltpu


# ---------------------------------------------------------------------------
# Kernel 1: serial LSTMCell recurrence + dot attention (emits attn_out).
# ---------------------------------------------------------------------------
def _lstm_attn_kernel(has_context, tt, *refs):
    if has_context:
        (gx_ref, h0_ref, c0_ref, w_hh_ref, ctx_ref, w_attn_ref,
         attn_ref, h_out_ref, c_out_ref, h_sc, c_sc) = refs
    else:
        (gx_ref, h0_ref, c0_ref, w_hh_ref,
         attn_ref, h_out_ref, c_out_ref, h_sc, c_sc) = refs

    t_blk = pl.program_id(1)            # time-chunk axis (innermost, sequential)
    H = h0_ref.shape[1]

    # Load the initial recurrent state for this batch block on its first chunk.
    @pl.when(t_blk == 0)
    def _():
        h_sc[...] = h0_ref[...]
        c_sc[...] = c0_ref[...]

    # Per-chunk constants (hoisted out of the unrolled time loop).
    w_hh = w_hh_ref[...]                                  # (H, 4H) bf16
    if has_context:
        ctx = ctx_ref[...].astype(jnp.float32)            # (bb, S, H)
        w_attn = w_attn_ref[...]                          # (2H, H) bf16

    def step(tl, carry):
        h_prev, c_prev = carry                            # f32 vreg carries

        # ---- LSTMCell (PyTorch gate order i, f, g, o) ----
        # One fused (bb,H)@(H,4H) bf16 matmul; gate slices below are
        # 128-lane-aligned static views of the (bb,4H) result.
        gh = jnp.dot(h_prev.astype(jnp.bfloat16), w_hh,
                     preferred_element_type=jnp.float32)  # (bb, 4H) f32
        gates = gx_ref[tl].astype(jnp.float32) + gh
        i_g = jax.nn.sigmoid(gates[:, 0 * H:1 * H])
        f_g = jax.nn.sigmoid(gates[:, 1 * H:2 * H])
        g_g = jnp.tanh(gates[:, 2 * H:3 * H])
        o_g = jax.nn.sigmoid(gates[:, 3 * H:4 * H])
        c_new = f_g * c_prev + i_g * g_g
        h_new = o_g * jnp.tanh(c_new)

        # ---- Dot global attention (Luong) ----
        if has_context:
            # Small S: scores / weighted sum on VPU + XLU (no q=1 MXU bmms).
            scores = jnp.sum(h_new[:, None, :] * ctx, axis=-1)        # (bb, S)
            scores = scores - jnp.max(scores, axis=-1, keepdims=True)
            p = jnp.exp(scores)
            attn_w = p / jnp.sum(p, axis=-1, keepdims=True)           # exact
            weighted = jnp.sum(attn_w[:, :, None] * ctx, axis=1)      # (bb, H)
            # concat([h, weighted]) @ W_attn as one K=2H bf16 MXU matmul.
            hw = jnp.concatenate([h_new, weighted], axis=-1).astype(jnp.bfloat16)
            a = jnp.tanh(jnp.dot(hw, w_attn,
                                 preferred_element_type=jnp.float32))
        else:
            a = h_new

        attn_ref[tl] = a.astype(attn_ref.dtype)           # bf16 HBM write
        return h_new, c_new

    h_fin, c_fin = lax.fori_loop(0, tt, step, (h_sc[...], c_sc[...]),
                                 unroll=True if tt <= 8 else 4)

    # One scratch write per chunk (persists the state to the next time chunk).
    h_sc[...] = h_fin
    c_sc[...] = c_fin

    # Emit the final recurrent state once, on the last time chunk.
    @pl.when(t_blk == pl.num_programs(1) - 1)
    def _():
        h_out_ref[...] = h_fin
        c_out_ref[...] = c_fin


# ---------------------------------------------------------------------------
# Kernel 2: vocab-tiled projection + online logsumexp (logits + lse outputs).
# ---------------------------------------------------------------------------
def _proj_lse_kernel(a_ref, w_ref, b_ref, logit_ref, lse_ref, m_sc, l_sc):
    j = pl.program_id(1)                 # vocab-tile axis (innermost)

    @pl.when(j == 0)
    def _():
        m_sc[...] = jnp.full_like(m_sc, -jnp.inf)
        l_sc[...] = jnp.zeros_like(l_sc)

    logits = jnp.dot(a_ref[...], w_ref[...],
                     preferred_element_type=jnp.float32) + b_ref[...]
    logit_ref[...] = logits

    m_prev = m_sc[...]
    m_new = jnp.maximum(m_prev, jnp.max(logits, axis=1, keepdims=True))
    l_sc[...] = (l_sc[...] * jnp.exp(m_prev - m_new)
                 + jnp.sum(jnp.exp(logits - m_new), axis=1, keepdims=True))
    m_sc[...] = m_new

    @pl.when(j == pl.num_programs(1) - 1)
    def _():
        lse_ref[...] = m_sc[...] + jnp.log(l_sc[...])


# ---------------------------------------------------------------------------
# Kernel 3: logp = logits - lse (elementwise, fully tiled).
# ---------------------------------------------------------------------------
def _sub_lse_kernel(logit_ref, lse_ref, out_ref):
    out_ref[...] = logit_ref[...] - lse_ref[...]


# ---------------------------------------------------------------------------
# Helpers.
# ---------------------------------------------------------------------------
def _largest_divisor_at_most(n, cap):
    for d in range(min(n, cap), 0, -1):
        if n % d == 0:
            return d
    return 1


def _round_up(n, m):
    return ((n + m - 1) // m) * m


def _lane_tile(n, cap):
    """Largest multiple of 128 that divides n and is <= cap; else full dim."""
    d = (min(n, cap) // 128) * 128
    while d >= 128:
        if n % d == 0:
            return d
        d -= 128
    return n


# ---------------------------------------------------------------------------
# Wrapper.
# ---------------------------------------------------------------------------
def decoder_forward(params, x_seq, h, c, context=None, *,
                    time_block=None, batch_block=None,
                    row_block=None, vocab_block=None):
    T, B = x_seq.shape
    H = h.shape[1]
    V, E = params["embedding"].shape
    has_context = context is not None
    S = context.shape[1] if has_context else 0

    assert H % 128 == 0, "d_hidden must be a multiple of 128 (lane width)"

    # ---- Time-independent glue in plain XLA (gather + one large matmul) ----
    e_seq = jnp.take(params["embedding"], x_seq, axis=0)              # (T,B,E)
    gx = (e_seq.reshape(T * B, E) @ params["w_ih"] + params["b_gates"])
    gx = gx.reshape(T, B, 4 * H).astype(jnp.bfloat16)                 # bf16 DMA

    w_hh = params["w_hh"].astype(jnp.bfloat16)                        # (H, 4H)

    # Chunk / block sizes.  bb defaults to B (single TC); only pass a smaller
    # batch_block (a multiple of 8, large enough to be throughput-bound) when
    # sharding across v7x's two TensorCores actually pays off.
    tt = time_block or _largest_divisor_at_most(T, 8)
    bb = batch_block or B
    assert T % tt == 0 and B % bb == 0
    assert bb == B or bb % 8 == 0, "batch_block must be a multiple of 8"

    in_specs = [
        pl.BlockSpec((tt, bb, 4 * H), lambda b, t: (t, b, 0)),        # gx
        pl.BlockSpec((bb, H), lambda b, t: (b, 0)),                   # h0
        pl.BlockSpec((bb, H), lambda b, t: (b, 0)),                   # c0
        pl.BlockSpec((H, 4 * H), lambda b, t: (0, 0)),                # W_hh fused
    ]
    args = [gx, h, c, w_hh]
    if has_context:
        in_specs += [
            pl.BlockSpec((bb, S, H), lambda b, t: (b, 0, 0)),         # context
            pl.BlockSpec((2 * H, H), lambda b, t: (0, 0)),            # W_attn
        ]
        args += [context.astype(jnp.bfloat16),
                 params["w_attn"].astype(jnp.bfloat16)]

    kernel = functools.partial(_lstm_attn_kernel, has_context, tt)
    attn_out, h_out, c_out = pl.pallas_call(
        kernel,
        out_shape=(jax.ShapeDtypeStruct((T, B, H), jnp.bfloat16),
                   jax.ShapeDtypeStruct((B, H), jnp.float32),
                   jax.ShapeDtypeStruct((B, H), jnp.float32)),
        grid_spec=pltpu.PrefetchScalarGridSpec(
            num_scalar_prefetch=0,
            # Time MUST stay the innermost (sequential) axis: the recurrent
            # state is carried across time chunks in VMEM scratch.
            grid=(B // bb, T // tt),
            in_specs=in_specs,
            out_specs=[
                pl.BlockSpec((tt, bb, H), lambda b, t: (t, b, 0)),    # attn_out
                pl.BlockSpec((bb, H), lambda b, t: (b, 0)),           # final h
                pl.BlockSpec((bb, H), lambda b, t: (b, 0)),           # final c
            ],
            scratch_shapes=[pltpu.VMEM((bb, H), jnp.float32),         # carried h
                            pltpu.VMEM((bb, H), jnp.float32)]),       # carried c
        compiler_params=pltpu.CompilerParams(
            dimension_semantics=("parallel", "arbitrary"),
            vmem_limit_bytes=48 * 1024 * 1024),
    )(*args)

    # ---- Projection + log-softmax over all T*B rows, vocab tiled ----
    M = T * B
    tm = row_block or min(256, _round_up(M, 8))
    assert tm % 8 == 0, "row_block must be a multiple of 8"
    M_pad = _round_up(M, tm)
    a_flat = attn_out.reshape(M, H)
    if M_pad != M:
        a_flat = jnp.pad(a_flat, ((0, M_pad - M), (0, 0)))            # masked tail
    tv = vocab_block or _lane_tile(V, 1024)
    assert V % tv == 0

    w_out = params["w_out"].astype(jnp.bfloat16)
    b_out = params["b_out"].astype(jnp.float32)

    logits, lse = pl.pallas_call(
        _proj_lse_kernel,
        out_shape=(jax.ShapeDtypeStruct((M_pad, V), jnp.float32),
                   jax.ShapeDtypeStruct((M_pad, 1), jnp.float32)),
        grid_spec=pltpu.PrefetchScalarGridSpec(
            num_scalar_prefetch=0,
            grid=(M_pad // tm, V // tv),
            in_specs=[pl.BlockSpec((tm, H), lambda i, j: (i, 0)),
                      pl.BlockSpec((H, tv), lambda i, j: (0, j)),
                      pl.BlockSpec((1, tv), lambda i, j: (0, j))],
            out_specs=[pl.BlockSpec((tm, tv), lambda i, j: (i, j)),
                       pl.BlockSpec((tm, 1), lambda i, j: (i, 0))],
            scratch_shapes=[pltpu.VMEM((tm, 1), jnp.float32),         # running max
                            pltpu.VMEM((tm, 1), jnp.float32)]),       # running sum
        compiler_params=pltpu.CompilerParams(
            dimension_semantics=("parallel", "arbitrary"),
            vmem_limit_bytes=48 * 1024 * 1024),
    )(a_flat, w_out, b_out)

    logp_flat = pl.pallas_call(
        _sub_lse_kernel,
        out_shape=jax.ShapeDtypeStruct((M_pad, V), jnp.float32),
        grid_spec=pltpu.PrefetchScalarGridSpec(
            num_scalar_prefetch=0,
            grid=(M_pad // tm, V // tv),
            in_specs=[pl.BlockSpec((tm, tv), lambda i, j: (i, j)),
                      pl.BlockSpec((tm, 1), lambda i, j: (i, 0))],
            out_specs=pl.BlockSpec((tm, tv), lambda i, j: (i, j))),
        compiler_params=pltpu.CompilerParams(
            dimension_semantics=("parallel", "parallel")),
    )(logits, lse)

    return logp_flat[:M].reshape(T, B, V), h_out, c_out


def init_params(key, vocab_size, d_embed, d_hidden):
    ks = jax.random.split(key, 7)
    s = 0.1
    return {
        "embedding": s * jax.random.normal(ks[0], (vocab_size, d_embed), jnp.float32),
        "w_ih":      s * jax.random.normal(ks[1], (d_embed, 4 * d_hidden), jnp.float32),
        "w_hh":      s * jax.random.normal(ks[2], (d_hidden, 4 * d_hidden), jnp.float32),
        "b_gates":   s * jax.random.normal(ks[3], (1, 4 * d_hidden), jnp.float32),
        "w_attn":    s * jax.random.normal(ks[4], (2 * d_hidden, d_hidden), jnp.float32),
        "w_out":     s * jax.random.normal(ks[5], (d_hidden, vocab_size), jnp.float32),
        "b_out":     s * jax.random.normal(ks[6], (1, vocab_size), jnp.float32),
    }


def decoder_reference(params, x_seq, h, c, context):
    """Pure-JAX (f32) mirror of the PyTorch Decoder.forward."""
    T, B = x_seq.shape
    H = h.shape[1]
    e_seq = jnp.take(params["embedding"], x_seq, axis=0)
    outs = []
    for t in range(T):
        e = e_seq[t]
        gates = e @ params["w_ih"] + h @ params["w_hh"] + params["b_gates"]
        i_g = jax.nn.sigmoid(gates[:, 0 * H:1 * H])
        f_g = jax.nn.sigmoid(gates[:, 1 * H:2 * H])
        g_g = jnp.tanh(gates[:, 2 * H:3 * H])
        o_g = jax.nn.sigmoid(gates[:, 3 * H:4 * H])
        c = f_g * c + i_g * g_g
        h = o_g * jnp.tanh(c)
        if context is not None:
            scores = jnp.einsum("bsd,bd->bs", context, h)
            attn = jax.nn.softmax(scores, axis=1)
            weighted = jnp.einsum("bs,bsd->bd", attn, context)
            a = jnp.tanh(jnp.concatenate([h, weighted], axis=1) @ params["w_attn"])
        else:
            a = h
        outs.append(a)
    o = jnp.stack(outs, 0).reshape(-1, H)
    logits = o @ params["w_out"] + params["b_out"]
    logp = jnp.log(jax.nn.softmax(logits, axis=1)).reshape(T, B, -1)
    return logp, h, c


if __name__ == "__main__":
    # Lane/sublane-friendly small shapes: B multiple of 8, H and V multiples of
    # 128 so gate tiles and the log-prob output are lane-dense.
    vocab_size, d_embed, d_hidden = 128, 32, 128
    T, B, S = 8, 8, 8

    key = jax.random.PRNGKey(0)
    k_param, k_x, k_h, k_c, k_ctx = jax.random.split(key, 5)

    params = init_params(k_param, vocab_size, d_embed, d_hidden)
    x_seq = jax.random.randint(k_x, (T, B), 0, vocab_size, dtype=jnp.int32)
    h0 = 0.1 * jax.random.normal(k_h, (B, d_hidden), jnp.float32)
    c0 = 0.1 * jax.random.normal(k_c, (B, d_hidden), jnp.float32)
    context = 0.1 * jax.random.normal(k_ctx, (B, S, d_hidden), jnp.float32)

    # The kernel uses bf16 MXU operands / bf16 intermediates (per the perf
    # review), so compare against the pure-f32 reference at bf16 tolerances.
    tol = dict(atol=2e-2, rtol=2e-2)

    # With attention context.
    logp, h_out, c_out = decoder_forward(params, x_seq, h0, c0, context)
    jax.block_until_ready((logp, h_out, c_out))
    ref_logp, ref_h, ref_c = decoder_reference(params, x_seq, h0, c0, context)
    assert logp.shape == (T, B, vocab_size)
    assert jnp.allclose(logp, ref_logp, **tol)
    assert jnp.allclose(h_out, ref_h, **tol)
    assert jnp.allclose(c_out, ref_c, **tol)

    # Without context (attention is the identity in the PyTorch module).
    logp_nc, h_nc, c_nc = decoder_forward(params, x_seq, h0, c0, None)
    jax.block_until_ready((logp_nc, h_nc, c_nc))
    ref_logp_nc, ref_h_nc, ref_c_nc = decoder_reference(params, x_seq, h0, c0, None)
    assert jnp.allclose(logp_nc, ref_logp_nc, **tol)
    assert jnp.allclose(h_nc, ref_h_nc, **tol)
    assert jnp.allclose(c_nc, ref_c_nc, **tol)

    print("KERNEL_OK")
</pallas_src>

<mosaic_0001>
module attributes {stable_mosaic.version = 11 : i64} {
  func.func @_lstm_attn_kernel(%arg0: i32, %arg1: i32, %arg2: memref<8x8x512xbf16, #tpu.memory_space<vmem>>, %arg3: memref<8x128xf32, #tpu.memory_space<vmem>>, %arg4: memref<8x128xf32, #tpu.memory_space<vmem>>, %arg5: memref<128x512xbf16, #tpu.memory_space<vmem>>, %arg6: memref<8x8x128xbf16, #tpu.memory_space<vmem>>, %arg7: memref<256x128xbf16, #tpu.memory_space<vmem>>, %arg8: memref<8x8x128xbf16, #tpu.memory_space<vmem>>, %arg9: memref<8x128xf32, #tpu.memory_space<vmem>>, %arg10: memref<8x128xf32, #tpu.memory_space<vmem>>, %arg11: memref<8x128xf32, #tpu.memory_space<vmem>>, %arg12: memref<8x128xf32, #tpu.memory_space<vmem>>) attributes {dimension_semantics = [#tpu.dimension_semantics<parallel>, #tpu.dimension_semantics<arbitrary>], iteration_bounds = array<i64: 1, 1>, scalar_prefetch = 0 : i64, scratch_operands = 2 : i64, tpu.core_type = #tpu.core_type<tc>, window_params = [{transform_indices = @transform_0, window_bounds = array<i64: 8, 8, 512>}, {transform_indices = @transform_1, window_bounds = array<i64: 8, 128>}, {transform_indices = @transform_2, window_bounds = array<i64: 8, 128>}, {pipeline_mode = #tpu.pipeline_mode<synchronous>, transform_indices = @transform_3, window_bounds = array<i64: 128, 512>}, {transform_indices = @transform_4, window_bounds = array<i64: 8, 8, 128>}, {pipeline_mode = #tpu.pipeline_mode<synchronous>, transform_indices = @transform_5, window_bounds = array<i64: 256, 128>}, {transform_indices = @transform_6, window_bounds = array<i64: 8, 8, 128>}, {transform_indices = @transform_7, window_bounds = array<i64: 8, 128>}, {transform_indices = @transform_8, window_bounds = array<i64: 8, 128>}]} {
    %c0_i32 = arith.constant 0 : i32
    %0 = arith.cmpi eq, %arg1, %c0_i32 : i32
    %1 = arith.extui %0 : i1 to i32
    %c0_i32_0 = arith.constant 0 : i32
    %2 = arith.cmpi ne, %1, %c0_i32_0 : i32
    scf.if %2 {
      %c0_121 = arith.constant 0 : index
      %c0_122 = arith.constant 0 : index
      %478 = vector.load %arg3[%c0_121, %c0_122] : memref<8x128xf32, #tpu.memory_space<vmem>>, vector<8x128xf32>
      %c0_123 = arith.constant 0 : index
      %c0_124 = arith.constant 0 : index
      %479 = vector.load %arg11[%c0_123, %c0_124] : memref<8x128xf32, #tpu.memory_space<vmem>>, vector<8x128xf32>
      tpu.vector_store %arg11[%c0_123, %c0_124], %478 {strides = array<i32>} : memref<8x128xf32, #tpu.memory_space<vmem>>, vector<8x128xf32>,
      %c0_125 = arith.constant 0 : index
      %c0_126 = arith.constant 0 : index
      %480 = vector.load %arg4[%c0_125, %c0_126] : memref<8x128xf32, #tpu.memory_space<vmem>>, vector<8x128xf32>
      %c0_127 = arith.constant 0 : index
      %c0_128 = arith.constant 0 : index
      %481 = vector.load %arg12[%c0_127, %c0_128] : memref<8x128xf32, #tpu.memory_space<vmem>>, vector<8x128xf32>
      tpu.vector_store %arg12[%c0_127, %c0_128], %480 {strides = array<i32>} : memref<8x128xf32, #tpu.memory_space<vmem>>, vector<8x128xf32>,
    } else {
    }
    %c0 = arith.constant 0 : index
    %c0_1 = arith.constant 0 : index
    %3 = vector.load %arg5[%c0, %c0_1] : memref<128x512xbf16, #tpu.memory_space<vmem>>, vector<128x512xbf16>
    %c0_2 = arith.constant 0 : index
    %c0_3 = arith.constant 0 : index
    %c0_4 = arith.constant 0 : index
    %4 = vector.load %arg6[%c0_2, %c0_3, %c0_4] : memref<8x8x128xbf16, #tpu.memory_space<vmem>>, vector<8x8x128xbf16>
    %5 = arith.extf %4 : vector<8x8x128xbf16> to vector<8x8x128xf32>
    %c0_5 = arith.constant 0 : index
    %c0_6 = arith.constant 0 : index
    %6 = vector.load %arg7[%c0_5, %c0_6] : memref<256x128xbf16, #tpu.memory_space<vmem>>, vector<256x128xbf16>
    %c0_7 = arith.constant 0 : index
    %c0_8 = arith.constant 0 : index
    %7 = vector.load %arg11[%c0_7, %c0_8] : memref<8x128xf32, #tpu.memory_space<vmem>>, vector<8x128xf32>
    %c0_9 = arith.constant 0 : index
    %c0_10 = arith.constant 0 : index
    %8 = vector.load %arg12[%c0_9, %c0_10] : memref<8x128xf32, #tpu.memory_space<vmem>>, vector<8x128xf32>
    %c0_i32_11 = arith.constant 0 : i32
    %9 = arith.truncf %7 : vector<8x128xf32> to vector<8x128xbf16>
    %cst = arith.constant dense<0.000000e+00> : vector<8x512xf32>
    %10 = tpu.matmul %9, %3, %cst {dimension_numbers = #tpu.dot_dimension_numbers<[1], [0], [0], [1], [0, 0, 1, 1], [], []>} : vector<8x128xbf16>, vector<128x512xbf16>, vector<8x512xf32> -> vector<8x512xf32>
    %11 = arith.index_cast %c0_i32_11 : i32 to index
    %c0_12 = arith.constant 0 : index
    %c0_13 = arith.constant 0 : index
    %12 = vector.load %arg2[%11, %c0_12, %c0_13] : memref<8x8x512xbf16, #tpu.memory_space<vmem>>, vector<1x8x512xbf16>
    %13 = vector.shape_cast %12 : vector<1x8x512xbf16> to vector<8x512xbf16>
    %14 = arith.extf %13 : vector<8x512xbf16> to vector<8x512xf32>
    %15 = arith.addf %14, %10 : vector<8x512xf32>
    %16 = vector.extract_strided_slice %15 {offsets = [0, 0], sizes = [8, 128], strides = [1, 1]} : vector<8x512xf32> to vector<8x128xf32>
    %17 = arith.negf %16 : vector<8x128xf32>
    %18 = math.exp %17 : vector<8x128xf32>
    %cst_14 = arith.constant 1.000000e+00 : f32
    %19 = vector.broadcast %cst_14 : f32 to vector<8x128xf32>
    %20 = arith.addf %19, %18 : vector<8x128xf32>
    %21 = arith.divf %19, %20 : vector<8x128xf32>
    %22 = vector.extract_strided_slice %15 {offsets = [0, 128], sizes = [8, 128], strides = [1, 1]} : vector<8x512xf32> to vector<8x128xf32>
    %23 = arith.negf %22 : vector<8x128xf32>
    %24 = math.exp %23 : vector<8x128xf32>
    %cst_15 = arith.constant 1.000000e+00 : f32
    %25 = vector.broadcast %cst_15 : f32 to vector<8x128xf32>
    %26 = arith.addf %25, %24 : vector<8x128xf32>
    %27 = arith.divf %25, %26 : vector<8x128xf32>
    %28 = vector.extract_strided_slice %15 {offsets = [0, 256], sizes = [8, 128], strides = [1, 1]} : vector<8x512xf32> to vector<8x128xf32>
    %29 = math.tanh %28 : vector<8x128xf32>
    %30 = vector.extract_strided_slice %15 {offsets = [0, 384], sizes = [8, 128], strides = [1, 1]} : vector<8x512xf32> to vector<8x128xf32>
    %31 = arith.negf %30 : vector<8x128xf32>
    %32 = math.exp %31 : vector<8x128xf32>
    %cst_16 = arith.constant 1.000000e+00 : f32
    %33 = vector.broadcast %cst_16 : f32 to vector<8x128xf32>
    %34 = arith.addf %33, %32 : vector<8x128xf32>
    %35 = arith.divf %33, %34 : vector<8x128xf32>
    %36 = arith.mulf %27, %8 : vector<8x128xf32>
    %37 = arith.mulf %21, %29 : vector<8x128xf32>
    %38 = arith.addf %36, %37 : vector<8x128xf32>
    %39 = math.tanh %38 : vector<8x128xf32>
    %40 = arith.mulf %35, %39 : vector<8x128xf32>
    %41 = vector.shape_cast %40 : vector<8x128xf32> to vector<8x1x128xf32>
    %42 = vector.broadcast %41 : vector<8x1x128xf32> to vector<8x8x128xf32>
    %43 = arith.mulf %42, %5 : vector<8x8x128xf32>
    %cst_17 = arith.constant dense<0.000000e+00> : vector<8x8xf32>
    %44 = vector.multi_reduction <add>, %43, %cst_17 [2] : vector<8x8x128xf32> to vector<8x8xf32>
    %cst_18 = arith.constant dense<0xFF800000> : vector<8xf32>
    %45 = vector.multi_reduction <maximumf>, %44, %cst_18 [1] : vector<8x8xf32> to vector<8xf32>
    %46 = vector.shape_cast %45 : vector<8xf32> to vector<8x1xf32>
    %47 = vector.broadcast %46 : vector<8x1xf32> to vector<8x8xf32>
    %48 = arith.subf %44, %47 : vector<8x8xf32>
    %49 = math.exp %48 : vector<8x8xf32>
    %cst_19 = arith.constant dense<0.000000e+00> : vector<8xf32>
    %50 = vector.multi_reduction <add>, %49, %cst_19 [1] : vector<8x8xf32> to vector<8xf32>
    %51 = vector.shape_cast %50 : vector<8xf32> to vector<8x1xf32>
    %52 = vector.broadcast %51 : vector<8x1xf32> to vector<8x8xf32>
    %53 = arith.divf %49, %52 : vector<8x8xf32>
    %54 = vector.shape_cast %53 : vector<8x8xf32> to vector<8x8x1xf32>
    %55 = vector.broadcast %54 : vector<8x8x1xf32> to vector<8x8x128xf32>
    %56 = arith.mulf %55, %5 : vector<8x8x128xf32>
    %cst_20 = arith.constant dense<0.000000e+00> : vector<8x128xf32>
    %57 = vector.multi_reduction <add>, %56, %cst_20 [1] : vector<8x8x128xf32> to vector<8x128xf32>
    %58 = tpu.concatenate %40, %57 in 1 : vector<8x128xf32>, vector<8x128xf32> -> vector<8x256xf32>
    %59 = arith.truncf %58 : vector<8x256xf32> to vector<8x256xbf16>
    %cst_21 = arith.constant dense<0.000000e+00> : vector<8x128xf32>
    %60 = tpu.matmul %59, %6, %cst_21 {dimension_numbers = #tpu.dot_dimension_numbers<[1], [0], [0], [1], [0, 0, 1, 1], [], []>} : vector<8x256xbf16>, vector<256x128xbf16>, vector<8x128xf32> -> vector<8x128xf32>
    %61 = math.tanh %60 : vector<8x128xf32>
    %62 = arith.truncf %61 : vector<8x128xf32> to vector<8x128xbf16>
    %63 = arith.index_cast %c0_i32_11 : i32 to index
    %c0_22 = arith.constant 0 : index
    %c0_23 = arith.constant 0 : index
    %64 = vector.load %arg8[%63, %c0_22, %c0_23] : memref<8x8x128xbf16, #tpu.memory_space<vmem>>, vector<1x8x128xbf16>
    %65 = vector.shape_cast %64 : vector<1x8x128xbf16> to vector<8x128xbf16>
    %66 = vector.shape_cast %62 : vector<8x128xbf16> to vector<1x8x128xbf16>
    tpu.vector_store %arg8[%63, %c0_22, %c0_23], %66 {strides = array<i32>} : memref<8x8x128xbf16, #tpu.memory_space<vmem>>, vector<1x8x128xbf16>,
    %c1_i32 = arith.constant 1 : i32
    %67 = arith.truncf %40 : vector<8x128xf32> to vector<8x128xbf16>
    %cst_24 = arith.constant dense<0.000000e+00> : vector<8x512xf32>
    %68 = tpu.matmul %67, %3, %cst_24 {dimension_numbers = #tpu.dot_dimension_numbers<[1], [0], [0], [1], [0, 0, 1, 1], [], []>} : vector<8x128xbf16>, vector<128x512xbf16>, vector<8x512xf32> -> vector<8x512xf32>
    %69 = arith.index_cast %c1_i32 : i32 to index
    %c0_25 = arith.constant 0 : index
    %c0_26 = arith.constant 0 : index
    %70 = vector.load %arg2[%69, %c0_25, %c0_26] : memref<8x8x512xbf16, #tpu.memory_space<vmem>>, vector<1x8x512xbf16>
    %71 = vector.shape_cast %70 : vector<1x8x512xbf16> to vector<8x512xbf16>
    %72 = arith.extf %71 : vector<8x512xbf16> to vector<8x512xf32>
    %73 = arith.addf %72, %68 : vector<8x512xf32>
    %74 = vector.extract_strided_slice %73 {offsets = [0, 0], sizes = [8, 128], strides = [1, 1]} : vector<8x512xf32> to vector<8x128xf32>
    %75 = arith.negf %74 : vector<8x128xf32>
    %76 = math.exp %75 : vector<8x128xf32>
    %cst_27 = arith.constant 1.000000e+00 : f32
    %77 = vector.broadcast %cst_27 : f32 to vector<8x128xf32>
    %78 = arith.addf %77, %76 : vector<8x128xf32>
    %79 = arith.divf %77, %78 : vector<8x128xf32>
    %80 = vector.extract_strided_slice %73 {offsets = [0, 128], sizes = [8, 128], strides = [1, 1]} : vector<8x512xf32> to vector<8x128xf32>
    %81 = arith.negf %80 : vector<8x128xf32>
    %82 = math.exp %81 : vector<8x128xf32>
    %cst_28 = arith.constant 1.000000e+00 : f32
    %83 = vector.broadcast %cst_28 : f32 to vector<8x128xf32>
    %84 = arith.addf %83, %82 : vector<8x128xf32>
    %85 = arith.divf %83, %84 : vector<8x128xf32>
    %86 = vector.extract_strided_slice %73 {offsets = [0, 256], sizes = [8, 128], strides = [1, 1]} : vector<8x512xf32> to vector<8x128xf32>
    %87 = math.tanh %86 : vector<8x128xf32>
    %88 = vector.extract_strided_slice %73 {offsets = [0, 384], sizes = [8, 128], strides = [1, 1]} : vector<8x512xf32> to vector<8x128xf32>
    %89 = arith.negf %88 : vector<8x128xf32>
    %90 = math.exp %89 : vector<8x128xf32>
    %cst_29 = arith.constant 1.000000e+00 : f32
    %91 = vector.broadcast %cst_29 : f32 to vector<8x128xf32>
    %92 = arith.addf %91, %90 : vector<8x128xf32>
    %93 = arith.divf %91, %92 : vector<8x128xf32>
    %94 = arith.mulf %85, %38 : vector<8x128xf32>
    %95 = arith.mulf %79, %87 : vector<8x128xf32>
    %96 = arith.addf %94, %95 : vector<8x128xf32>
    %97 = math.tanh %96 : vector<8x128xf32>
    %98 = arith.mulf %93, %97 : vector<8x128xf32>
    %99 = vector.shape_cast %98 : vector<8x128xf32> to vector<8x1x128xf32>
    %100 = vector.broadcast %99 : vector<8x1x128xf32> to vector<8x8x128xf32>
    %101 = arith.mulf %100, %5 : vector<8x8x128xf32>
    %cst_30 = arith.constant dense<0.000000e+00> : vector<8x8xf32>
    %102 = vector.multi_reduction <add>, %101, %cst_30 [2] : vector<8x8x128xf32> to vector<8x8xf32>
    %cst_31 = arith.constant dense<0xFF800000> : vector<8xf32>
    %103 = vector.multi_reduction <maximumf>, %102, %cst_31 [1] : vector<8x8xf32> to vector<8xf32>
    %104 = vector.shape_cast %103 : vector<8xf32> to vector<8x1xf32>
    %105 = vector.broadcast %104 : vector<8x1xf32> to vector<8x8xf32>
    %106 = arith.subf %102, %105 : vector<8x8xf32>
    %107 = math.exp %106 : vector<8x8xf32>
    %cst_32 = arith.constant dense<0.000000e+00> : vector<8xf32>
    %108 = vector.multi_reduction <add>, %107, %cst_32 [1] : vector<8x8xf32> to vector<8xf32>
    %109 = vector.shape_cast %108 : vector<8xf32> to vector<8x1xf32>
    %110 = vector.broadcast %109 : vector<8x1xf32> to vector<8x8xf32>
    %111 = arith.divf %107, %110 : vector<8x8xf32>
    %112 = vector.shape_cast %111 : vector<8x8xf32> to vector<8x8x1xf32>
    %113 = vector.broadcast %112 : vector<8x8x1xf32> to vector<8x8x128xf32>
    %114 = arith.mulf %113, %5 : vector<8x8x128xf32>
    %cst_33 = arith.constant dense<0.000000e+00> : vector<8x128xf32>
    %115 = vector.multi_reduction <add>, %114, %cst_33 [1] : vector<8x8x128xf32> to vector<8x128xf32>
    %116 = tpu.concatenate %98, %115 in 1 : vector<8x128xf32>, vector<8x128xf32> -> vector<8x256xf32>
    %117 = arith.truncf %116 : vector<8x256xf32> to vector<8x256xbf16>
    %cst_34 = arith.constant dense<0.000000e+00> : vector<8x128xf32>
    %118 = tpu.matmul %117, %6, %cst_34 {dimension_numbers = #tpu.dot_dimension_numbers<[1], [0], [0], [1], [0, 0, 1, 1], [], []>} : vector<8x256xbf16>, vector<256x128xbf16>, vector<8x128xf32> -> vector<8x128xf32>
    %119 = math.tanh %118 : vector<8x128xf32>
    %120 = arith.truncf %119 : vector<8x128xf32> to vector<8x128xbf16>
    %121 = arith.index_cast %c1_i32 : i32 to index
    %c0_35 = arith.constant 0 : index
    %c0_36 = arith.constant 0 : index
    %122 = vector.load %arg8[%121, %c0_35, %c0_36] : memref<8x8x128xbf16, #tpu.memory_space<vmem>>, vector<1x8x128xbf16>
    %123 = vector.shape_cast %122 : vector<1x8x128xbf16> to vector<8x128xbf16>
    %124 = vector.shape_cast %120 : vector<8x128xbf16> to vector<1x8x128xbf16>
    tpu.vector_store %arg8[%121, %c0_35, %c0_36], %124 {strides = array<i32>} : memref<8x8x128xbf16, #tpu.memory_space<vmem>>, vector<1x8x128xbf16>,
    %c2_i32 = arith.constant 2 : i32
    %125 = arith.truncf %98 : vector<8x128xf32> to vector<8x128xbf16>
    %cst_37 = arith.constant dense<0.000000e+00> : vector<8x512xf32>
    %126 = tpu.matmul %125, %3, %cst_37 {dimension_numbers = #tpu.dot_dimension_numbers<[1], [0], [0], [1], [0, 0, 1, 1], [], []>} : vector<8x128xbf16>, vector<128x512xbf16>, vector<8x512xf32> -> vector<8x512xf32>
    %127 = arith.index_cast %c2_i32 : i32 to index
    %c0_38 = arith.constant 0 : index
    %c0_39 = arith.constant 0 : index
    %128 = vector.load %arg2[%127, %c0_38, %c0_39] : memref<8x8x512xbf16, #tpu.memory_space<vmem>>, vector<1x8x512xbf16>
    %129 = vector.shape_cast %128 : vector<1x8x512xbf16> to vector<8x512xbf16>
    %130 = arith.extf %129 : vector<8x512xbf16> to vector<8x512xf32>
    %131 = arith.addf %130, %126 : vector<8x512xf32>
    %132 = vector.extract_strided_slice %131 {offsets = [0, 0], sizes = [8, 128], strides = [1, 1]} : vector<8x512xf32> to vector<8x128xf32>
    %133 = arith.negf %132 : vector<8x128xf32>
    %134 = math.exp %133 : vector<8x128xf32>
    %cst_40 = arith.constant 1.000000e+00 : f32
    %135 = vector.broadcast %cst_40 : f32 to vector<8x128xf32>
    %136 = arith.addf %135, %134 : vector<8x128xf32>
    %137 = arith.divf %135, %136 : vector<8x128xf32>
    %138 = vector.extract_strided_slice %131 {offsets = [0, 128], sizes = [8, 128], strides = [1, 1]} : vector<8x512xf32> to vector<8x128xf32>
    %139 = arith.negf %138 : vector<8x128xf32>
    %140 = math.exp %139 : vector<8x128xf32>
    %cst_41 = arith.constant 1.000000e+00 : f32
    %141 = vector.broadcast %cst_41 : f32 to vector<8x128xf32>
    %142 = arith.addf %141, %140 : vector<8x128xf32>
    %143 = arith.divf %141, %142 : vector<8x128xf32>
    %144 = vector.extract_strided_slice %131 {offsets = [0, 256], sizes = [8, 128], strides = [1, 1]} : vector<8x512xf32> to vector<8x128xf32>
    %145 = math.tanh %144 : vector<8x128xf32>
    %146 = vector.extract_strided_slice %131 {offsets = [0, 384], sizes = [8, 128], strides = [1, 1]} : vector<8x512xf32> to vector<8x128xf32>
    %147 = arith.negf %146 : vector<8x128xf32>
    %148 = math.exp %147 : vector<8x128xf32>
    %cst_42 = arith.constant 1.000000e+00 : f32
    %149 = vector.broadcast %cst_42 : f32 to vector<8x128xf32>
    %150 = arith.addf %149, %148 : vector<8x128xf32>
    %151 = arith.divf %149, %150 : vector<8x128xf32>
    %152 = arith.mulf %143, %96 : vector<8x128xf32>
    %153 = arith.mulf %137, %145 : vector<8x128xf32>
    %154 = arith.addf %152, %153 : vector<8x128xf32>
    %155 = math.tanh %154 : vector<8x128xf32>
    %156 = arith.mulf %151, %155 : vector<8x128xf32>
    %157 = vector.shape_cast %156 : vector<8x128xf32> to vector<8x1x128xf32>
    %158 = vector.broadcast %157 : vector<8x1x128xf32> to vector<8x8x128xf32>
    %159 = arith.mulf %158, %5 : vector<8x8x128xf32>
    %cst_43 = arith.constant dense<0.000000e+00> : vector<8x8xf32>
    %160 = vector.multi_reduction <add>, %159, %cst_43 [2] : vector<8x8x128xf32> to vector<8x8xf32>
    %cst_44 = arith.constant dense<0xFF800000> : vector<8xf32>
    %161 = vector.multi_reduction <maximumf>, %160, %cst_44 [1] : vector<8x8xf32> to vector<8xf32>
    %162 = vector.shape_cast %161 : vector<8xf32> to vector<8x1xf32>
    %163 = vector.broadcast %162 : vector<8x1xf32> to vector<8x8xf32>
    %164 = arith.subf %160, %163 : vector<8x8xf32>
    %165 = math.exp %164 : vector<8x8xf32>
    %cst_45 = arith.constant dense<0.000000e+00> : vector<8xf32>
    %166 = vector.multi_reduction <add>, %165, %cst_45 [1] : vector<8x8xf32> to vector<8xf32>
    %167 = vector.shape_cast %166 : vector<8xf32> to vector<8x1xf32>
    %168 = vector.broadcast %167 : vector<8x1xf32> to vector<8x8xf32>
    %169 = arith.divf %165, %168 : vector<8x8xf32>
    %170 = vector.shape_cast %169 : vector<8x8xf32> to vector<8x8x1xf32>
    %171 = vector.broadcast %170 : vector<8x8x1xf32> to vector<8x8x128xf32>
    %172 = arith.mulf %171, %5 : vector<8x8x128xf32>
    %cst_46 = arith.constant dense<0.000000e+00> : vector<8x128xf32>
    %173 = vector.multi_reduction <add>, %172, %cst_46 [1] : vector<8x8x128xf32> to vector<8x128xf32>
    %174 = tpu.concatenate %156, %173 in 1 : vector<8x128xf32>, vector<8x128xf32> -> vector<8x256xf32>
    %175 = arith.truncf %174 : vector<8x256xf32> to vector<8x256xbf16>
    %cst_47 = arith.constant dense<0.000000e+00> : vector<8x128xf32>
    %176 = tpu.matmul %175, %6, %cst_47 {dimension_numbers = #tpu.dot_dimension_numbers<[1], [0], [0], [1], [0, 0, 1, 1], [], []>} : vector<8x256xbf16>, vector<256x128xbf16>, vector<8x128xf32> -> vector<8x128xf32>
    %177 = math.tanh %176 : vector<8x128xf32>
    %178 = arith.truncf %177 : vector<8x128xf32> to vector<8x128xbf16>
    %179 = arith.index_cast %c2_i32 : i32 to index
    %c0_48 = arith.constant 0 : index
    %c0_49 = arith.constant 0 : index
    %180 = vector.load %arg8[%179, %c0_48, %c0_49] : memref<8x8x128xbf16, #tpu.memory_space<vmem>>, vector<1x8x128xbf16>
    %181 = vector.shape_cast %180 : vector<1x8x128xbf16> to vector<8x128xbf16>
    %182 = vector.shape_cast %178 : vector<8x128xbf16> to vector<1x8x128xbf16>
    tpu.vector_store %arg8[%179, %c0_48, %c0_49], %182 {strides = array<i32>} : memref<8x8x128xbf16, #tpu.memory_space<vmem>>, vector<1x8x128xbf16>,
    %c3_i32 = arith.constant 3 : i32
    %183 = arith.truncf %156 : vector<8x128xf32> to vector<8x128xbf16>
    %cst_50 = arith.constant dense<0.000000e+00> : vector<8x512xf32>
    %184 = tpu.matmul %183, %3, %cst_50 {dimension_numbers = #tpu.dot_dimension_numbers<[1], [0], [0], [1], [0, 0, 1, 1], [], []>} : vector<8x128xbf16>, vector<128x512xbf16>, vector<8x512xf32> -> vector<8x512xf32>
    %185 = arith.index_cast %c3_i32 : i32 to index
    %c0_51 = arith.constant 0 : index
    %c0_52 = arith.constant 0 : index
    %186 = vector.load %arg2[%185, %c0_51, %c0_52] : memref<8x8x512xbf16, #tpu.memory_space<vmem>>, vector<1x8x512xbf16>
    %187 = vector.shape_cast %186 : vector<1x8x512xbf16> to vector<8x512xbf16>
    %188 = arith.extf %187 : vector<8x512xbf16> to vector<8x512xf32>
    %189 = arith.addf %188, %184 : vector<8x512xf32>
    %190 = vector.extract_strided_slice %189 {offsets = [0, 0], sizes = [8, 128], strides = [1, 1]} : vector<8x512xf32> to vector<8x128xf32>
    %191 = arith.negf %190 : vector<8x128xf32>
    %192 = math.exp %191 : vector<8x128xf32>
    %cst_53 = arith.constant 1.000000e+00 : f32
    %193 = vector.broadcast %cst_53 : f32 to vector<8x128xf32>
    %194 = arith.addf %193, %192 : vector<8x128xf32>
    %195 = arith.divf %193, %194 : vector<8x128xf32>
    %196 = vector.extract_strided_slice %189 {offsets = [0, 128], sizes = [8, 128], strides = [1, 1]} : vector<8x512xf32> to vector<8x128xf32>
    %197 = arith.negf %196 : vector<8x128xf32>
    %198 = math.exp %197 : vector<8x128xf32>
    %cst_54 = arith.constant 1.000000e+00 : f32
    %199 = vector.broadcast %cst_54 : f32 to vector<8x128xf32>
    %200 = arith.addf %199, %198 : vector<8x128xf32>
    %201 = arith.divf %199, %200 : vector<8x128xf32>
    %202 = vector.extract_strided_slice %189 {offsets = [0, 256], sizes = [8, 128], strides = [1, 1]} : vector<8x512xf32> to vector<8x128xf32>
    %203 = math.tanh %202 : vector<8x128xf32>
    %204 = vector.extract_strided_slice %189 {offsets = [0, 384], sizes = [8, 128], strides = [1, 1]} : vector<8x512xf32> to vector<8x128xf32>
    %205 = arith.negf %204 : vector<8x128xf32>
    %206 = math.exp %205 : vector<8x128xf32>
    %cst_55 = arith.constant 1.000000e+00 : f32
    %207 = vector.broadcast %cst_55 : f32 to vector<8x128xf32>
    %208 = arith.addf %207, %206 : vector<8x128xf32>
    %209 = arith.divf %207, %208 : vector<8x128xf32>
    %210 = arith.mulf %201, %154 : vector<8x128xf32>
    %211 = arith.mulf %195, %203 : vector<8x128xf32>
    %212 = arith.addf %210, %211 : vector<8x128xf32>
    %213 = math.tanh %212 : vector<8x128xf32>
    %214 = arith.mulf %209, %213 : vector<8x128xf32>
    %215 = vector.shape_cast %214 : vector<8x128xf32> to vector<8x1x128xf32>
    %216 = vector.broadcast %215 : vector<8x1x128xf32> to vector<8x8x128xf32>
    %217 = arith.mulf %216, %5 : vector<8x8x128xf32>
    %cst_56 = arith.constant dense<0.000000e+00> : vector<8x8xf32>
    %218 = vector.multi_reduction <add>, %217, %cst_56 [2] : vector<8x8x128xf32> to vector<8x8xf32>
    %cst_57 = arith.constant dense<0xFF800000> : vector<8xf32>
    %219 = vector.multi_reduction <maximumf>, %218, %cst_57 [1] : vector<8x8xf32> to vector<8xf32>
    %220 = vector.shape_cast %219 : vector<8xf32> to vector<8x1xf32>
    %221 = vector.broadcast %220 : vector<8x1xf32> to vector<8x8xf32>
    %222 = arith.subf %218, %221 : vector<8x8xf32>
    %223 = math.exp %222 : vector<8x8xf32>
    %cst_58 = arith.constant dense<0.000000e+00> : vector<8xf32>
    %224 = vector.multi_reduction <add>, %223, %cst_58 [1] : vector<8x8xf32> to vector<8xf32>
    %225 = vector.shape_cast %224 : vector<8xf32> to vector<8x1xf32>
    %226 = vector.broadcast %225 : vector<8x1xf32> to vector<8x8xf32>
    %227 = arith.divf %223, %226 : vector<8x8xf32>
    %228 = vector.shape_cast %227 : vector<8x8xf32> to vector<8x8x1xf32>
    %229 = vector.broadcast %228 : vector<8x8x1xf32> to vector<8x8x128xf32>
    %230 = arith.mulf %229, %5 : vector<8x8x128xf32>
    %cst_59 = arith.constant dense<0.000000e+00> : vector<8x128xf32>
    %231 = vector.multi_reduction <add>, %230, %cst_59 [1] : vector<8x8x128xf32> to vector<8x128xf32>
    %232 = tpu.concatenate %214, %231 in 1 : vector<8x128xf32>, vector<8x128xf32> -> vector<8x256xf32>
    %233 = arith.truncf %232 : vector<8x256xf32> to vector<8x256xbf16>
    %cst_60 = arith.constant dense<0.000000e+00> : vector<8x128xf32>
    %234 = tpu.matmul %233, %6, %cst_60 {dimension_numbers = #tpu.dot_dimension_numbers<[1], [0], [0], [1], [0, 0, 1, 1], [], []>} : vector<8x256xbf16>, vector<256x128xbf16>, vector<8x128xf32> -> vector<8x128xf32>
    %235 = math.tanh %234 : vector<8x128xf32>
    %236 = arith.truncf %235 : vector<8x128xf32> to vector<8x128xbf16>
    %237 = arith.index_cast %c3_i32 : i32 to index
    %c0_61 = arith.constant 0 : index
    %c0_62 = arith.constant 0 : index
    %238 = vector.load %arg8[%237, %c0_61, %c0_62] : memref<8x8x128xbf16, #tpu.memory_space<vmem>>, vector<1x8x128xbf16>
    %239 = vector.shape_cast %238 : vector<1x8x128xbf16> to vector<8x128xbf16>
    %240 = vector.shape_cast %236 : vector<8x128xbf16> to vector<1x8x128xbf16>
    tpu.vector_store %arg8[%237, %c0_61, %c0_62], %240 {strides = array<i32>} : memref<8x8x128xbf16, #tpu.memory_space<vmem>>, vector<1x8x128xbf16>,
    %c4_i32 = arith.constant 4 : i32
    %241 = arith.truncf %214 : vector<8x128xf32> to vector<8x128xbf16>
    %cst_63 = arith.constant dense<0.000000e+00> : vector<8x512xf32>
    %242 = tpu.matmul %241, %3, %cst_63 {dimension_numbers = #tpu.dot_dimension_numbers<[1], [0], [0], [1], [0, 0, 1, 1], [], []>} : vector<8x128xbf16>, vector<128x512xbf16>, vector<8x512xf32> -> vector<8x512xf32>
    %243 = arith.index_cast %c4_i32 : i32 to index
    %c0_64 = arith.constant 0 : index
    %c0_65 = arith.constant 0 : index
    %244 = vector.load %arg2[%243, %c0_64, %c0_65] : memref<8x8x512xbf16, #tpu.memory_space<vmem>>, vector<1x8x512xbf16>
    %245 = vector.shape_cast %244 : vector<1x8x512xbf16> to vector<8x512xbf16>
    %246 = arith.extf %245 : vector<8x512xbf16> to vector<8x512xf32>
    %247 = arith.addf %246, %242 : vector<8x512xf32>
    %248 = vector.extract_strided_slice %247 {offsets = [0, 0], sizes = [8, 128], strides = [1, 1]} : vector<8x512xf32> to vector<8x128xf32>
    %249 = arith.negf %248 : vector<8x128xf32>
    %250 = math.exp %249 : vector<8x128xf32>
    %cst_66 = arith.constant 1.000000e+00 : f32
    %251 = vector.broadcast %cst_66 : f32 to vector<8x128xf32>
    %252 = arith.addf %251, %250 : vector<8x128xf32>
    %253 = arith.divf %251, %252 : vector<8x128xf32>
    %254 = vector.extract_strided_slice %247 {offsets = [0, 128], sizes = [8, 128], strides = [1, 1]} : vector<8x512xf32> to vector<8x128xf32>
    %255 = arith.negf %254 : vector<8x128xf32>
    %256 = math.exp %255 : vector<8x128xf32>
    %cst_67 = arith.constant 1.000000e+00 : f32
    %257 = vector.broadcast %cst_67 : f32 to vector<8x128xf32>
    %258 = arith.addf %257, %256 : vector<8x128xf32>
    %259 = arith.divf %257, %258 : vector<8x128xf32>
    %260 = vector.extract_strided_slice %247 {offsets = [0, 256], sizes = [8, 128], strides = [1, 1]} : vector<8x512xf32> to vector<8x128xf32>
    %261 = math.tanh %260 : vector<8x128xf32>
    %262 = vector.extract_strided_slice %247 {offsets = [0, 384], sizes = [8, 128], strides = [1, 1]} : vector<8x512xf32> to vector<8x128xf32>
    %263 = arith.negf %262 : vector<8x128xf32>
    %264 = math.exp %263 : vector<8x128xf32>
    %cst_68 = arith.constant 1.000000e+00 : f32
    %265 = vector.broadcast %cst_68 : f32 to vector<8x128xf32>
    %266 = arith.addf %265, %264 : vector<8x128xf32>
    %267 = arith.divf %265, %266 : vector<8x128xf32>
    %268 = arith.mulf %259, %212 : vector<8x128xf32>
    %269 = arith.mulf %253, %261 : vector<8x128xf32>
    %270 = arith.addf %268, %269 : vector<8x128xf32>
    %271 = math.tanh %270 : vector<8x128xf32>
    %272 = arith.mulf %267, %271 : vector<8x128xf32>
    %273 = vector.shape_cast %272 : vector<8x128xf32> to vector<8x1x128xf32>
    %274 = vector.broadcast %273 : vector<8x1x128xf32> to vector<8x8x128xf32>
    %275 = arith.mulf %274, %5 : vector<8x8x128xf32>
    %cst_69 = arith.constant dense<0.000000e+00> : vector<8x8xf32>
    %276 = vector.multi_reduction <add>, %275, %cst_69 [2] : vector<8x8x128xf32> to vector<8x8xf32>
    %cst_70 = arith.constant dense<0xFF800000> : vector<8xf32>
    %277 = vector.multi_reduction <maximumf>, %276, %cst_70 [1] : vector<8x8xf32> to vector<8xf32>
    %278 = vector.shape_cast %277 : vector<8xf32> to vector<8x1xf32>
    %279 = vector.broadcast %278 : vector<8x1xf32> to vector<8x8xf32>
    %280 = arith.subf %276, %279 : vector<8x8xf32>
    %281 = math.exp %280 : vector<8x8xf32>
    %cst_71 = arith.constant dense<0.000000e+00> : vector<8xf32>
    %282 = vector.multi_reduction <add>, %281, %cst_71 [1] : vector<8x8xf32> to vector<8xf32>
    %283 = vector.shape_cast %282 : vector<8xf32> to vector<8x1xf32>
    %284 = vector.broadcast %283 : vector<8x1xf32> to vector<8x8xf32>
    %285 = arith.divf %281, %284 : vector<8x8xf32>
    %286 = vector.shape_cast %285 : vector<8x8xf32> to vector<8x8x1xf32>
    %287 = vector.broadcast %286 : vector<8x8x1xf32> to vector<8x8x128xf32>
    %288 = arith.mulf %287, %5 : vector<8x8x128xf32>
    %cst_72 = arith.constant dense<0.000000e+00> : vector<8x128xf32>
    %289 = vector.multi_reduction <add>, %288, %cst_72 [1] : vector<8x8x128xf32> to vector<8x128xf32>
    %290 = tpu.concatenate %272, %289 in 1 : vector<8x128xf32>, vector<8x128xf32> -> vector<8x256xf32>
    %291 = arith.truncf %290 : vector<8x256xf32> to vector<8x256xbf16>
    %cst_73 = arith.constant dense<0.000000e+00> : vector<8x128xf32>
    %292 = tpu.matmul %291, %6, %cst_73 {dimension_numbers = #tpu.dot_dimension_numbers<[1], [0], [0], [1], [0, 0, 1, 1], [], []>} : vector<8x256xbf16>, vector<256x128xbf16>, vector<8x128xf32> -> vector<8x128xf32>
    %293 = math.tanh %292 : vector<8x128xf32>
    %294 = arith.truncf %293 : vector<8x128xf32> to vector<8x128xbf16>
    %295 = arith.index_cast %c4_i32 : i32 to index
    %c0_74 = arith.constant 0 : index
    %c0_75 = arith.constant 0 : index
    %296 = vector.load %arg8[%295, %c0_74, %c0_75] : memref<8x8x128xbf16, #tpu.memory_space<vmem>>, vector<1x8x128xbf16>
    %297 = vector.shape_cast %296 : vector<1x8x128xbf16> to vector<8x128xbf16>
    %298 = vector.shape_cast %294 : vector<8x128xbf16> to vector<1x8x128xbf16>
    tpu.vector_store %arg8[%295, %c0_74, %c0_75], %298 {strides = array<i32>} : memref<8x8x128xbf16, #tpu.memory_space<vmem>>, vector<1x8x128xbf16>,
    %c5_i32 = arith.constant 5 : i32
    %299 = arith.truncf %272 : vector<8x128xf32> to vector<8x128xbf16>
    %cst_76 = arith.constant dense<0.000000e+00> : vector<8x512xf32>
    %300 = tpu.matmul %299, %3, %cst_76 {dimension_numbers = #tpu.dot_dimension_numbers<[1], [0], [0], [1], [0, 0, 1, 1], [], []>} : vector<8x128xbf16>, vector<128x512xbf16>, vector<8x512xf32> -> vector<8x512xf32>
    %301 = arith.index_cast %c5_i32 : i32 to index
    %c0_77 = arith.constant 0 : index
    %c0_78 = arith.constant 0 : index
    %302 = vector.load %arg2[%301, %c0_77, %c0_78] : memref<8x8x512xbf16, #tpu.memory_space<vmem>>, vector<1x8x512xbf16>
    %303 = vector.shape_cast %302 : vector<1x8x512xbf16> to vector<8x512xbf16>
    %304 = arith.extf %303 : vector<8x512xbf16> to vector<8x512xf32>
    %305 = arith.addf %304, %300 : vector<8x512xf32>
    %306 = vector.extract_strided_slice %305 {offsets = [0, 0], sizes = [8, 128], strides = [1, 1]} : vector<8x512xf32> to vector<8x128xf32>
    %307 = arith.negf %306 : vector<8x128xf32>
    %308 = math.exp %307 : vector<8x128xf32>
    %cst_79 = arith.constant 1.000000e+00 : f32
    %309 = vector.broadcast %cst_79 : f32 to vector<8x128xf32>
    %310 = arith.addf %309, %308 : vector<8x128xf32>
    %311 = arith.divf %309, %310 : vector<8x128xf32>
    %312 = vector.extract_strided_slice %305 {offsets = [0, 128], sizes = [8, 128], strides = [1, 1]} : vector<8x512xf32> to vector<8x128xf32>
    %313 = arith.negf %312 : vector<8x128xf32>
    %314 = math.exp %313 : vector<8x128xf32>
    %cst_80 = arith.constant 1.000000e+00 : f32
    %315 = vector.broadcast %cst_80 : f32 to vector<8x128xf32>
    %316 = arith.addf %315, %314 : vector<8x128xf32>
    %317 = arith.divf %315, %316 : vector<8x128xf32>
    %318 = vector.extract_strided_slice %305 {offsets = [0, 256], sizes = [8, 128], strides = [1, 1]} : vector<8x512xf32> to vector<8x128xf32>
    %319 = math.tanh %318 : vector<8x128xf32>
    %320 = vector.extract_strided_slice %305 {offsets = [0, 384], sizes = [8, 128], strides = [1, 1]} : vector<8x512xf32> to vector<8x128xf32>
    %321 = arith.negf %320 : vector<8x128xf32>
    %322 = math.exp %321 : vector<8x128xf32>
    %cst_81 = arith.constant 1.000000e+00 : f32
    %323 = vector.broadcast %cst_81 : f32 to vector<8x128xf32>
    %324 = arith.addf %323, %322 : vector<8x128xf32>
    %325 = arith.divf %323, %324 : vector<8x128xf32>
    %326 = arith.mulf %317, %270 : vector<8x128xf32>
    %327 = arith.mulf %311, %319 : vector<8x128xf32>
    %328 = arith.addf %326, %327 : vector<8x128xf32>
    %329 = math.tanh %328 : vector<8x128xf32>
    %330 = arith.mulf %325, %329 : vector<8x128xf32>
    %331 = vector.shape_cast %330 : vector<8x128xf32> to vector<8x1x128xf32>
    %332 = vector.broadcast %331 : vector<8x1x128xf32> to vector<8x8x128xf32>
    %333 = arith.mulf %332, %5 : vector<8x8x128xf32>
    %cst_82 = arith.constant dense<0.000000e+00> : vector<8x8xf32>
    %334 = vector.multi_reduction <add>, %333, %cst_82 [2] : vector<8x8x128xf32> to vector<8x8xf32>
    %cst_83 = arith.constant dense<0xFF800000> : vector<8xf32>
    %335 = vector.multi_reduction <maximumf>, %334, %cst_83 [1] : vector<8x8xf32> to vector<8xf32>
    %336 = vector.shape_cast %335 : vector<8xf32> to vector<8x1xf32>
    %337 = vector.broadcast %336 : vector<8x1xf32> to vector<8x8xf32>
    %338 = arith.subf %334, %337 : vector<8x8xf32>
    %339 = math.exp %338 : vector<8x8xf32>
    %cst_84 = arith.constant dense<0.000000e+00> : vector<8xf32>
    %340 = vector.multi_reduction <add>, %339, %cst_84 [1] : vector<8x8xf32> to vector<8xf32>
    %341 = vector.shape_cast %340 : vector<8xf32> to vector<8x1xf32>
    %342 = vector.broadcast %341 : vector<8x1xf32> to vector<8x8xf32>
    %343 = arith.divf %339, %342 : vector<8x8xf32>
    %344 = vector.shape_cast %343 : vector<8x8xf32> to vector<8x8x1xf32>
    %345 = vector.broadcast %344 : vector<8x8x1xf32> to vector<8x8x128xf32>
    %346 = arith.mulf %345, %5 : vector<8x8x128xf32>
    %cst_85 = arith.constant dense<0.000000e+00> : vector<8x128xf32>
    %347 = vector.multi_reduction <add>, %346, %cst_85 [1] : vector<8x8x128xf32> to vector<8x128xf32>
    %348 = tpu.concatenate %330, %347 in 1 : vector<8x128xf32>, vector<8x128xf32> -> vector<8x256xf32>
    %349 = arith.truncf %348 : vector<8x256xf32> to vector<8x256xbf16>
    %cst_86 = arith.constant dense<0.000000e+00> : vector<8x128xf32>
    %350 = tpu.matmul %349, %6, %cst_86 {dimension_numbers = #tpu.dot_dimension_numbers<[1], [0], [0], [1], [0, 0, 1, 1], [], []>} : vector<8x256xbf16>, vector<256x128xbf16>, vector<8x128xf32> -> vector<8x128xf32>
    %351 = math.tanh %350 : vector<8x128xf32>
    %352 = arith.truncf %351 : vector<8x128xf32> to vector<8x128xbf16>
    %353 = arith.index_cast %c5_i32 : i32 to index
    %c0_87 = arith.constant 0 : index
    %c0_88 = arith.constant 0 : index
    %354 = vector.load %arg8[%353, %c0_87, %c0_88] : memref<8x8x128xbf16, #tpu.memory_space<vmem>>, vector<1x8x128xbf16>
    %355 = vector.shape_cast %354 : vector<1x8x128xbf16> to vector<8x128xbf16>
    %356 = vector.shape_cast %352 : vector<8x128xbf16> to vector<1x8x128xbf16>
    tpu.vector_store %arg8[%353, %c0_87, %c0_88], %356 {strides = array<i32>} : memref<8x8x128xbf16, #tpu.memory_space<vmem>>, vector<1x8x128xbf16>,
    %c6_i32 = arith.constant 6 : i32
    %357 = arith.truncf %330 : vector<8x128xf32> to vector<8x128xbf16>
    %cst_89 = arith.constant dense<0.000000e+00> : vector<8x512xf32>
    %358 = tpu.matmul %357, %3, %cst_89 {dimension_numbers = #tpu.dot_dimension_numbers<[1], [0], [0], [1], [0, 0, 1, 1], [], []>} : vector<8x128xbf16>, vector<128x512xbf16>, vector<8x512xf32> -> vector<8x512xf32>
    %359 = arith.index_cast %c6_i32 : i32 to index
    %c0_90 = arith.constant 0 : index
    %c0_91 = arith.constant 0 : index
    %360 = vector.load %arg2[%359, %c0_90, %c0_91] : memref<8x8x512xbf16, #tpu.memory_space<vmem>>, vector<1x8x512xbf16>
    %361 = vector.shape_cast %360 : vector<1x8x512xbf16> to vector<8x512xbf16>
    %362 = arith.extf %361 : vector<8x512xbf16> to vector<8x512xf32>
    %363 = arith.addf %362, %358 : vector<8x512xf32>
    %364 = vector.extract_strided_slice %363 {offsets = [0, 0], sizes = [8, 128], strides = [1, 1]} : vector<8x512xf32> to vector<8x128xf32>
    %365 = arith.negf %364 : vector<8x128xf32>
    %366 = math.exp %365 : vector<8x128xf32>
    %cst_92 = arith.constant 1.000000e+00 : f32
    %367 = vector.broadcast %cst_92 : f32 to vector<8x128xf32>
    %368 = arith.addf %367, %366 : vector<8x128xf32>
    %369 = arith.divf %367, %368 : vector<8x128xf32>
    %370 = vector.extract_strided_slice %363 {offsets = [0, 128], sizes = [8, 128], strides = [1, 1]} : vector<8x512xf32> to vector<8x128xf32>
    %371 = arith.negf %370 : vector<8x128xf32>
    %372 = math.exp %371 : vector<8x128xf32>
    %cst_93 = arith.constant 1.000000e+00 : f32
    %373 = vector.broadcast %cst_93 : f32 to vector<8x128xf32>
    %374 = arith.addf %373, %372 : vector<8x128xf32>
    %375 = arith.divf %373, %374 : vector<8x128xf32>
    %376 = vector.extract_strided_slice %363 {offsets = [0, 256], sizes = [8, 128], strides = [1, 1]} : vector<8x512xf32> to vector<8x128xf32>
    %377 = math.tanh %376 : vector<8x128xf32>
    %378 = vector.extract_strided_slice %363 {offsets = [0, 384], sizes = [8, 128], strides = [1, 1]} : vector<8x512xf32> to vector<8x128xf32>
    %379 = arith.negf %378 : vector<8x128xf32>
    %380 = math.exp %379 : vector<8x128xf32>
    %cst_94 = arith.constant 1.000000e+00 : f32
    %381 = vector.broadcast %cst_94 : f32 to vector<8x128xf32>
    %382 = arith.addf %381, %380 : vector<8x128xf32>
    %383 = arith.divf %381, %382 : vector<8x128xf32>
    %384 = arith.mulf %375, %328 : vector<8x128xf32>
    %385 = arith.mulf %369, %377 : vector<8x128xf32>
    %386 = arith.addf %384, %385 : vector<8x128xf32>
    %387 = math.tanh %386 : vector<8x128xf32>
    %388 = arith.mulf %383, %387 : vector<8x128xf32>
    %389 = vector.shape_cast %388 : vector<8x128xf32> to vector<8x1x128xf32>
    %390 = vector.broadcast %389 : vector<8x1x128xf32> to vector<8x8x128xf32>
    %391 = arith.mulf %390, %5 : vector<8x8x128xf32>
    %cst_95 = arith.constant dense<0.000000e+00> : vector<8x8xf32>
    %392 = vector.multi_reduction <add>, %391, %cst_95 [2] : vector<8x8x128xf32> to vector<8x8xf32>
    %cst_96 = arith.constant dense<0xFF800000> : vector<8xf32>
    %393 = vector.multi_reduction <maximumf>, %392, %cst_96 [1] : vector<8x8xf32> to vector<8xf32>
    %394 = vector.shape_cast %393 : vector<8xf32> to vector<8x1xf32>
    %395 = vector.broadcast %394 : vector<8x1xf32> to vector<8x8xf32>
    %396 = arith.subf %392, %395 : vector<8x8xf32>
    %397 = math.exp %396 : vector<8x8xf32>
    %cst_97 = arith.constant dense<0.000000e+00> : vector<8xf32>
    %398 = vector.multi_reduction <add>, %397, %cst_97 [1] : vector<8x8xf32> to vector<8xf32>
    %399 = vector.shape_cast %398 : vector<8xf32> to vector<8x1xf32>
    %400 = vector.broadcast %399 : vector<8x1xf32> to vector<8x8xf32>
    %401 = arith.divf %397, %400 : vector<8x8xf32>
    %402 = vector.shape_cast %401 : vector<8x8xf32> to vector<8x8x1xf32>
    %403 = vector.broadcast %402 : vector<8x8x1xf32> to vector<8x8x128xf32>
    %404 = arith.mulf %403, %5 : vector<8x8x128xf32>
    %cst_98 = arith.constant dense<0.000000e+00> : vector<8x128xf32>
    %405 = vector.multi_reduction <add>, %404, %cst_98 [1] : vector<8x8x128xf32> to vector<8x128xf32>
    %406 = tpu.concatenate %388, %405 in 1 : vector<8x128xf32>, vector<8x128xf32> -> vector<8x256xf32>
    %407 = arith.truncf %406 : vector<8x256xf32> to vector<8x256xbf16>
    %cst_99 = arith.constant dense<0.000000e+00> : vector<8x128xf32>
    %408 = tpu.matmul %407, %6, %cst_99 {dimension_numbers = #tpu.dot_dimension_numbers<[1], [0], [0], [1], [0, 0, 1, 1], [], []>} : vector<8x256xbf16>, vector<256x128xbf16>, vector<8x128xf32> -> vector<8x128xf32>
    %409 = math.tanh %408 : vector<8x128xf32>
    %410 = arith.truncf %409 : vector<8x128xf32> to vector<8x128xbf16>
    %411 = arith.index_cast %c6_i32 : i32 to index
    %c0_100 = arith.constant 0 : index
    %c0_101 = arith.constant 0 : index
    %412 = vector.load %arg8[%411, %c0_100, %c0_101] : memref<8x8x128xbf16, #tpu.memory_space<vmem>>, vector<1x8x128xbf16>
    %413 = vector.shape_cast %412 : vector<1x8x128xbf16> to vector<8x128xbf16>
    %414 = vector.shape_cast %410 : vector<8x128xbf16> to vector<1x8x128xbf16>
    tpu.vector_store %arg8[%411, %c0_100, %c0_101], %414 {strides = array<i32>} : memref<8x8x128xbf16, #tpu.memory_space<vmem>>, vector<1x8x128xbf16>,
    %c7_i32 = arith.constant 7 : i32
    %415 = arith.truncf %388 : vector<8x128xf32> to vector<8x128xbf16>
    %cst_102 = arith.constant dense<0.000000e+00> : vector<8x512xf32>
    %416 = tpu.matmul %415, %3, %cst_102 {dimension_numbers = #tpu.dot_dimension_numbers<[1], [0], [0], [1], [0, 0, 1, 1], [], []>} : vector<8x128xbf16>, vector<128x512xbf16>, vector<8x512xf32> -> vector<8x512xf32>
    %417 = arith.index_cast %c7_i32 : i32 to index
    %c0_103 = arith.constant 0 : index
    %c0_104 = arith.constant 0 : index
    %418 = vector.load %arg2[%417, %c0_103, %c0_104] : memref<8x8x512xbf16, #tpu.memory_space<vmem>>, vector<1x8x512xbf16>
    %419 = vector.shape_cast %418 : vector<1x8x512xbf16> to vector<8x512xbf16>
    %420 = arith.extf %419 : vector<8x512xbf16> to vector<8x512xf32>
    %421 = arith.addf %420, %416 : vector<8x512xf32>
    %422 = vector.extract_strided_slice %421 {offsets = [0, 0], sizes = [8, 128], strides = [1, 1]} : vector<8x512xf32> to vector<8x128xf32>
    %423 = arith.negf %422 : vector<8x128xf32>
    %424 = math.exp %423 : vector<8x128xf32>
    %cst_105 = arith.constant 1.000000e+00 : f32
    %425 = vector.broadcast %cst_105 : f32 to vector<8x128xf32>
    %426 = arith.addf %425, %424 : vector<8x128xf32>
    %427 = arith.divf %425, %426 : vector<8x128xf32>
    %428 = vector.extract_strided_slice %421 {offsets = [0, 128], sizes = [8, 128], strides = [1, 1]} : vector<8x512xf32> to vector<8x128xf32>
    %429 = arith.negf %428 : vector<8x128xf32>
    %430 = math.exp %429 : vector<8x128xf32>
    %cst_106 = arith.constant 1.000000e+00 : f32
    %431 = vector.broadcast %cst_106 : f32 to vector<8x128xf32>
    %432 = arith.addf %431, %430 : vector<8x128xf32>
    %433 = arith.divf %431, %432 : vector<8x128xf32>
    %434 = vector.extract_strided_slice %421 {offsets = [0, 256], sizes = [8, 128], strides = [1, 1]} : vector<8x512xf32> to vector<8x128xf32>
    %435 = math.tanh %434 : vector<8x128xf32>
    %436 = vector.extract_strided_slice %421 {offsets = [0, 384], sizes = [8, 128], strides = [1, 1]} : vector<8x512xf32> to vector<8x128xf32>
    %437 = arith.negf %436 : vector<8x128xf32>
    %438 = math.exp %437 : vector<8x128xf32>
    %cst_107 = arith.constant 1.000000e+00 : f32
    %439 = vector.broadcast %cst_107 : f32 to vector<8x128xf32>
    %440 = arith.addf %439, %438 : vector<8x128xf32>
    %441 = arith.divf %439, %440 : vector<8x128xf32>
    %442 = arith.mulf %433, %386 : vector<8x128xf32>
    %443 = arith.mulf %427, %435 : vector<8x128xf32>
    %444 = arith.addf %442, %443 : vector<8x128xf32>
    %445 = math.tanh %444 : vector<8x128xf32>
    %446 = arith.mulf %441, %445 : vector<8x128xf32>
    %447 = vector.shape_cast %446 : vector<8x128xf32> to vector<8x1x128xf32>
    %448 = vector.broadcast %447 : vector<8x1x128xf32> to vector<8x8x128xf32>
    %449 = arith.mulf %448, %5 : vector<8x8x128xf32>
    %cst_108 = arith.constant dense<0.000000e+00> : vector<8x8xf32>
    %450 = vector.multi_reduction <add>, %449, %cst_108 [2] : vector<8x8x128xf32> to vector<8x8xf32>
    %cst_109 = arith.constant dense<0xFF800000> : vector<8xf32>
    %451 = vector.multi_reduction <maximumf>, %450, %cst_109 [1] : vector<8x8xf32> to vector<8xf32>
    %452 = vector.shape_cast %451 : vector<8xf32> to vector<8x1xf32>
    %453 = vector.broadcast %452 : vector<8x1xf32> to vector<8x8xf32>
    %454 = arith.subf %450, %453 : vector<8x8xf32>
    %455 = math.exp %454 : vector<8x8xf32>
    %cst_110 = arith.constant dense<0.000000e+00> : vector<8xf32>
    %456 = vector.multi_reduction <add>, %455, %cst_110 [1] : vector<8x8xf32> to vector<8xf32>
    %457 = vector.shape_cast %456 : vector<8xf32> to vector<8x1xf32>
    %458 = vector.broadcast %457 : vector<8x1xf32> to vector<8x8xf32>
    %459 = arith.divf %455, %458 : vector<8x8xf32>
    %460 = vector.shape_cast %459 : vector<8x8xf32> to vector<8x8x1xf32>
    %461 = vector.broadcast %460 : vector<8x8x1xf32> to vector<8x8x128xf32>
    %462 = arith.mulf %461, %5 : vector<8x8x128xf32>
    %cst_111 = arith.constant dense<0.000000e+00> : vector<8x128xf32>
    %463 = vector.multi_reduction <add>, %462, %cst_111 [1] : vector<8x8x128xf32> to vector<8x128xf32>
    %464 = tpu.concatenate %446, %463 in 1 : vector<8x128xf32>, vector<8x128xf32> -> vector<8x256xf32>
    %465 = arith.truncf %464 : vector<8x256xf32> to vector<8x256xbf16>
    %cst_112 = arith.constant dense<0.000000e+00> : vector<8x128xf32>
    %466 = tpu.matmul %465, %6, %cst_112 {dimension_numbers = #tpu.dot_dimension_numbers<[1], [0], [0], [1], [0, 0, 1, 1], [], []>} : vector<8x256xbf16>, vector<256x128xbf16>, vector<8x128xf32> -> vector<8x128xf32>
    %467 = math.tanh %466 : vector<8x128xf32>
    %468 = arith.truncf %467 : vector<8x128xf32> to vector<8x128xbf16>
    %469 = arith.index_cast %c7_i32 : i32 to index
    %c0_113 = arith.constant 0 : index
    %c0_114 = arith.constant 0 : index
    %470 = vector.load %arg8[%469, %c0_113, %c0_114] : memref<8x8x128xbf16, #tpu.memory_space<vmem>>, vector<1x8x128xbf16>
    %471 = vector.shape_cast %470 : vector<1x8x128xbf16> to vector<8x128xbf16>
    %472 = vector.shape_cast %468 : vector<8x128xbf16> to vector<1x8x128xbf16>
    tpu.vector_store %arg8[%469, %c0_113, %c0_114], %472 {strides = array<i32>} : memref<8x8x128xbf16, #tpu.memory_space<vmem>>, vector<1x8x128xbf16>,
    %c8_i32 = arith.constant 8 : i32
    %c0_115 = arith.constant 0 : index
    %c0_116 = arith.constant 0 : index
    %473 = vector.load %arg11[%c0_115, %c0_116] : memref<8x128xf32, #tpu.memory_space<vmem>>, vector<8x128xf32>
    tpu.vector_store %arg11[%c0_115, %c0_116], %446 {strides = array<i32>} : memref<8x128xf32, #tpu.memory_space<vmem>>, vector<8x128xf32>,
    %c0_117 = arith.constant 0 : index
    %c0_118 = arith.constant 0 : index
    %474 = vector.load %arg12[%c0_117, %c0_118] : memref<8x128xf32, #tpu.memory_space<vmem>>, vector<8x128xf32>
    tpu.vector_store %arg12[%c0_117, %c0_118], %444 {strides = array<i32>} : memref<8x128xf32, #tpu.memory_space<vmem>>, vector<8x128xf32>,
    %c0_i32_119 = arith.constant 0 : i32
    %475 = arith.cmpi eq, %arg1, %c0_i32_119 : i32
    %476 = arith.extui %475 : i1 to i32
    %c0_i32_120 = arith.constant 0 : i32
    %477 = arith.cmpi ne, %476, %c0_i32_120 : i32
    scf.if %477 {
      %c0_121 = arith.constant 0 : index
      %c0_122 = arith.constant 0 : index
      %478 = vector.load %arg9[%c0_121, %c0_122] : memref<8x128xf32, #tpu.memory_space<vmem>>, vector<8x128xf32>
      tpu.vector_store %arg9[%c0_121, %c0_122], %446 {strides = array<i32>} : memref<8x128xf32, #tpu.memory_space<vmem>>, vector<8x128xf32>,
      %c0_123 = arith.constant 0 : index
      %c0_124 = arith.constant 0 : index
      %479 = vector.load %arg10[%c0_123, %c0_124] : memref<8x128xf32, #tpu.memory_space<vmem>>, vector<8x128xf32>
      tpu.vector_store %arg10[%c0_123, %c0_124], %444 {strides = array<i32>} : memref<8x128xf32, #tpu.memory_space<vmem>>, vector<8x128xf32>,
    } else {
    }
    return
  }
  func.func @transform_0(%arg0: i32, %arg1: i32) -> (i32, i32, i32) {
    %c0_i32 = arith.constant 0 : i32
    %c0_i32_0 = arith.constant 0 : i32
    return %arg1, %arg0, %c0_i32 : i32, i32, i32
  }
  func.func @transform_1(%arg0: i32, %arg1: i32) -> (i32, i32) {
    %c0_i32 = arith.constant 0 : i32
    %c0_i32_0 = arith.constant 0 : i32
    return %arg0, %c0_i32 : i32, i32
  }
  func.func @transform_2(%arg0: i32, %arg1: i32) -> (i32, i32) {
    %c0_i32 = arith.constant 0 : i32
    %c0_i32_0 = arith.constant 0 : i32
    return %arg0, %c0_i32 : i32, i32
  }
  func.func @transform_3(%arg0: i32, %arg1: i32) -> (i32, i32) {
    %c0_i32 = arith.constant 0 : i32
    %c0_i32_0 = arith.constant 0 : i32
    %c0_i32_1 = arith.constant 0 : i32
    return %c0_i32, %c0_i32_0 : i32, i32
  }
  func.func @transform_4(%arg0: i32, %arg1: i32) -> (i32, i32, i32) {
    %c0_i32 = arith.constant 0 : i32
    %c0_i32_0 = arith.constant 0 : i32
    %c0_i32_1 = arith.constant 0 : i32
    return %arg0, %c0_i32, %c0_i32_0 : i32, i32, i32
  }
  func.func @transform_5(%arg0: i32, %arg1: i32) -> (i32, i32) {
    %c0_i32 = arith.constant 0 : i32
    %c0_i32_0 = arith.constant 0 : i32
    %c0_i32_1 = arith.constant 0 : i32
    return %c0_i32, %c0_i32_0 : i32, i32
  }
  func.func @transform_6(%arg0: i32, %arg1: i32) -> (i32, i32, i32) {
    %c0_i32 = arith.constant 0 : i32
    %c0_i32_0 = arith.constant 0 : i32
    return %arg1, %arg0, %c0_i32 : i32, i32, i32
  }
  func.func @transform_7(%arg0: i32, %arg1: i32) -> (i32, i32) {
    %c0_i32 = arith.constant 0 : i32
    %c0_i32_0 = arith.constant 0 : i32
    return %arg0, %c0_i32 : i32, i32
  }
  func.func @transform_8(%arg0: i32, %arg1: i32) -> (i32, i32) {
    %c0_i32 = arith.constant 0 : i32
    %c0_i32_0 = arith.constant 0 : i32
    return %arg0, %c0_i32 : i32, i32
  }
}

</mosaic_0001>

<bundles_post_ra>
// kernel: tpu_custom_call.1
= control target key start
LH: loop header
LB: loop body
LE: loop exit
PB: predicated region body
PF: predicated region fallthrough
CT: control target
= control target key end

     0   :  { %14 = vsyncpa [#allocation5], 0  ;;  %s8562_s0 = inlined_call_operand.hbm [shape: bf16[8,8,512], index: 0, kind: input, shape index: {}]   ;;  %s8563_s1 = inlined_call_operand.hbm [shape: f32[8,128], index: 1, kind: input, shape index: {}]   ;;  %s8564_s2 = inlined_call_operand.hbm [shape: f32[8,128], index: 2, kind: input, shape index: {}]   ;;  %s8565_s3 = inlined_call_operand.hbm [shape: bf16[128,512], index: 3, kind: input, shape index: {}]   ;;  %s8566_s4 = inlined_call_operand.hbm [shape: bf16[8,8,128], index: 4, kind: input, shape index: {}]   ;;  %s8567_s5 = inlined_call_operand.hbm [shape: bf16[256,128], index: 5, kind: input, shape index: {}]   ;;  %s8568_s6 = inlined_call_operand.hbm [shape: bf16[8,8,128], index: 6, kind: output, shape index: {0}]   ;;  %s8569_s7 = inlined_call_operand.hbm [shape: f32[8,128], index: 7, kind: output, shape index: {1}]   ;;  %s8570_s8 = inlined_call_operand.hbm [shape: f32[8,128], index: 8, kind: output, shape index: {2}]  }
   0x1   :  { %15 = vsyncpa [#allocation8], 0 }
   0x2   :  { %16 = vsyncpa [#allocation11], 0 }
   0x3   :  { %17 = vsyncpa [#allocation14], 0 }
   0x4   :  { %18 = vsyncpa [#allocation6], 0 }
   0x5   :  { %19 = vsyncpa [#allocation17], 0  ;;  %s6715_s27 = smov [#allocation7]   ;;  %s6505_s9 = scalar_lea.hbm %s8563_s1, 128 }
   0x6   :  { %s38_s28 = sshll.u32 %s6715_s27, 4  ;;  %p6506_p0 = scmp.ne.s32.totalorder %s8563_s1, %s6505_s9  ;;  %s39_s28 = int_to_ptr.vmem [resolvable:$true] %s38_s28 }
   0x7   :  { %p6509_p1 = scmp.lt.u32.totalorder %s6505_s9, %s8563_s1 }
   0x9   :  { %p6511_p2 = pnand %p6509_p1, %p6506_p0 }
   0xb   :  { %6514 = shalt.err (!%p6511_p2)
}
   0xc   :  { %s6515_s14 = scalar_lea.vmem %s39_s28, 128  ;;  %p6520_p4 = scmp.lt.s32.totalorder %s39_s28, %s39_s28 }
   0xd   :  { %p6516_p3 = scmp.ne.s32.totalorder %s39_s28, %s6515_s14  ;;  %p6521_p5 = scmp.lt.s32.totalorder %s6515_s14, %s6515_s14 }
   0xf   :  { %p6522_p6 = por %p6521_p5, %p6520_p4 }
  0x11   :  { %p6523_p7 = pnand %p6522_p6, %p6516_p3 }
  0x13   :  { %6526 = shalt.err (!%p6523_p7)
}
  0x14   :  { %41 = dma.hbm_to_vmem [thread:$0]  %s8563_s1, 128, %s39_s28, [#allocation8]  }
  0x15   :  { %s6716_s17 = smov [#allocation10]   ;;  %s6717_s19 = smov [#allocation4]  }
  0x16   :  { %s57_s18 = sshll.u32 %s6716_s17, 4  ;;  %s25_s20 = sshll.u32 %s6717_s19, 4  ;;  %s58_s18 = int_to_ptr.vmem [resolvable:$true] %s57_s18  ;;  %s26_s20 = int_to_ptr.vmem [resolvable:$true] %s25_s20 }
  0x17   :  { %s6527_s23 = scalar_lea.hbm %s8565_s3, 4096 }
  0x18   :  { %p6528_p8 = scmp.ne.s32.totalorder %s8565_s3, %s6527_s23  ;;  %p6531_p9 = scmp.lt.u32.totalorder %s6527_s23, %s8565_s3 }
  0x1a   :  { %p6533_p10 = pnand %p6531_p9, %p6528_p8 }
  0x1c   :  { %6536 = shalt.err (!%p6533_p10)
}
  0x1d   :  { %s6537_s1 = scalar_lea.vmem %s58_s18, 4096  ;;  %p6542_p12 = scmp.lt.s32.totalorder %s58_s18, %s58_s18 }
  0x1e   :  { %p6538_p11 = scmp.ne.s32.totalorder %s58_s18, %s6537_s1  ;;  %p6543_p13 = scmp.lt.s32.totalorder %s6537_s1, %s6537_s1 }
  0x20   :  { %p6544_p0 = por %p6543_p13, %p6542_p12 }
  0x22   :  { %p6545_p1 = pnand %p6544_p0, %p6538_p11 }
  0x24   :  { %6548 = shalt.err (!%p6545_p1)
}
  0x25   :  { %s6718_s28 = smov 256   ;;  %s6719_s29 = smov 16  }
  0x26   :  { %63 = dma.hbm_to_vmem [thread:$0]  %s8565_s3, 4096, %s58_s18, [#allocation11], %s6718_s28, %s6718_s28, %s6719_s29  }
  0x27   :  { %s6549_s12 = scalar_lea.hbm %s8562_s0, 2048 }
  0x28   :  { %p6550_p2 = scmp.ne.s32.totalorder %s8562_s0, %s6549_s12  ;;  %p6553_p3 = scmp.lt.u32.totalorder %s6549_s12, %s8562_s0 }
  0x2a   :  { %p6555_p4 = pnand %p6553_p3, %p6550_p2 }
  0x2c   :  { %6558 = shalt.err (!%p6555_p4)
}
  0x2d   :  { %s6559_s17 = scalar_lea.vmem %s26_s20, 2048  ;;  %p6564_p6 = scmp.lt.s32.totalorder %s26_s20, %s26_s20 }
  0x2e   :  { %p6560_p5 = scmp.ne.s32.totalorder %s26_s20, %s6559_s17  ;;  %p6565_p7 = scmp.lt.s32.totalorder %s6559_s17, %s6559_s17 }
  0x30   :  { %p6566_p8 = por %p6565_p7, %p6564_p6 }
  0x32   :  { %p6567_p9 = pnand %p6566_p8, %p6560_p5 }
  0x34   :  { %6570 = shalt.err (!%p6567_p9)
}
  0x35   :  { %31 = dma.hbm_to_vmem [thread:$0]  %s8562_s0, 2048, %s26_s20, [#allocation5], %s6718_s28, %s6718_s28, %s6719_s29  }
  0x36   :  { %s6720_s19 = smov [#allocation9]   ;;  %s6721_s22 = smov [#allocation12]  }
  0x37   :  { %s48_s21 = sshll.u32 %s6720_s19, 4  ;;  %s69_s23 = sshll.u32 %s6721_s22, 4  ;;  %s49_s21 = int_to_ptr.vmem [resolvable:$true] %s48_s21  ;;  %s70_s23 = int_to_ptr.vmem [resolvable:$true] %s69_s23 }
  0x38   :  { %s6571_s26 = scalar_lea.hbm %s8564_s2, 128 }
  0x39   :  { %p6572_p10 = scmp.ne.s32.totalorder %s8564_s2, %s6571_s26  ;;  %p6575_p11 = scmp.lt.u32.totalorder %s6571_s26, %s8564_s2 }
  0x3b   :  { %p6577_p12 = pnand %p6575_p11, %p6572_p10 }
  0x3d   :  { %6580 = shalt.err (!%p6577_p12)
}
  0x3e   :  { %s6581_s0 = scalar_lea.vmem %s49_s21, 128  ;;  %p6586_p0 = scmp.lt.s32.totalorder %s49_s21, %s49_s21 }
  0x3f   :  { %p6582_p13 = scmp.ne.s32.totalorder %s49_s21, %s6581_s0  ;;  %p6587_p1 = scmp.lt.s32.totalorder %s6581_s0, %s6581_s0 }
  0x41   :  { %p6588_p2 = por %p6587_p1, %p6586_p0 }
  0x43   :  { %p6589_p3 = pnand %p6588_p2, %p6582_p13 }
  0x45   :  { %6592 = shalt.err (!%p6589_p3)
}
  0x46   :  { %51 = dma.hbm_to_vmem [thread:$0]  %s8564_s2, 128, %s49_s21, [#allocation8]  }
  0x47   :  { %s6593_s11 = scalar_lea.hbm %s8566_s4, 512 }
  0x48   :  { %p6594_p4 = scmp.ne.s32.totalorder %s8566_s4, %s6593_s11  ;;  %p6597_p5 = scmp.lt.u32.totalorder %s6593_s11, %s8566_s4 }
  0x4a   :  { %p6599_p6 = pnand %p6597_p5, %p6594_p4 }
  0x4c   :  { %6602 = shalt.err (!%p6599_p6)
}
  0x4d   :  { %s6603_s16 = scalar_lea.vmem %s70_s23, 512  ;;  %p6608_p8 = scmp.lt.s32.totalorder %s70_s23, %s70_s23 }
  0x4e   :  { %p6604_p7 = scmp.ne.s32.totalorder %s70_s23, %s6603_s16  ;;  %p6609_p9 = scmp.lt.s32.totalorder %s6603_s16, %s6603_s16 }
  0x50   :  { %p6610_p10 = por %p6609_p9, %p6608_p8 }
  0x52   :  { %p6611_p11 = pnand %p6610_p10, %p6604_p7 }
  0x54   :  { %6614 = shalt.err (!%p6611_p11)
}
  0x55   :  { %s6722_s2 = smov 64   ;;  %s6723_s17 = smov 4  }
  0x56   :  { %75 = dma.hbm_to_vmem [thread:$0]  %s8566_s4, 512, %s70_s23, [#allocation11], %s6722_s2, %s6722_s2, %s6723_s17  }
  0x57   :  { %s6724_s19 = smov [#allocation13]   ;;  %s6615_s25 = scalar_lea.hbm %s8567_s5, 2048 }
  0x58   :  { %s81_s21 = sshll.u32 %s6724_s19, 4  ;;  %p6616_p12 = scmp.ne.s32.totalorder %s8567_s5, %s6615_s25  ;;  %s82_s21 = int_to_ptr.vmem [resolvable:$true] %s81_s21 }
  0x59   :  { %p6619_p13 = scmp.lt.u32.totalorder %s6615_s25, %s8567_s5 }
  0x5b   :  { %p6621_p0 = pnand %p6619_p13, %p6616_p12 }
  0x5d   :  { %6624 = shalt.err (!%p6621_p0)
}
  0x5e   :  { %s6625_s9 = scalar_lea.vmem %s82_s21, 2048  ;;  %p6630_p2 = scmp.lt.s32.totalorder %s82_s21, %s82_s21 }
  0x5f   :  { %p6626_p1 = scmp.ne.s32.totalorder %s82_s21, %s6625_s9  ;;  %p6631_p3 = scmp.lt.s32.totalorder %s6625_s9, %s6625_s9 }
  0x61   :  { %p6632_p4 = por %p6631_p3, %p6630_p2 }
  0x63   :  { %p6633_p5 = pnand %p6632_p4, %p6626_p1 }
  0x65   :  { %6636 = shalt.err (!%p6633_p5)
}
  0x66   :  { %87 = dma.hbm_to_vmem [thread:$0]  %s8567_s5, 2048, %s82_s21, [#allocation14], %s6722_s2, %s6722_s2, %s6723_s17  }
  0x67   :  { %6703 = dma.done.wait [#allocation5], 2048  }
  0x68   :  { %6704 = vsyncadd [#allocation5], 4294965248 }
  0x69   :  { %6705 = dma.done.wait [#allocation8], 256  }
  0x6a   :  { %6706 = vsyncadd [#allocation8], 4294967040 }
  0x6b   :  { %6707 = dma.done.wait [#allocation11], 4608  }
  0x6c   :  { %6708 = vsyncadd [#allocation11], 4294962688 }
  0x6d   :  { %6709 = dma.done.wait [#allocation14], 2048  }
  0x6e   :  { %6710 = vsyncadd [#allocation14], 4294965248  ;;  %v8571_v0 = vmov 0   ;;  %v6857_v1 = vld [vmem:[#allocation10 + $0x4] ss:$16 sps:$4 sm:$0xff]   ;;  %v441_v39 = vld [vmem:[#allocation4 + $0x8] sm:$0xff] }
  0x6f   :  { %390 = vmatprep.mubr.bf16.mxu0 %v8571_v0  ;;  %431 = vmatprep.mubr.bf16.mxu1 %v8571_v0  ;;  %v6859_v2 = vld [vmem:[#allocation10] ss:$16 sps:$4 sm:$0xff]   ;;  %v6862_v3 = vld [vmem:[#allocation10 + $0x24] ss:$16 sps:$4 sm:$0xff]   ;;  %v6870_v6 = vld [vmem:[#allocation10 + $0xc] ss:$16 sps:$4 sm:$0xff]   ;;  %v445_v46 = vunpack.c.h.bf16 %v441_v39  ;;  %v444_v52 = vunpack.c.l.bf16 %v441_v39 }
  0x70   :  { %5895 = vset.pattern.permute.xlu0 %v8571_v0  ;;  %5894 = vset.pattern.permute.xlu1 %v8571_v0  ;;  %v6865_v4 = vld [vmem:[#allocation10 + $0x20] ss:$16 sps:$4 sm:$0xff]   ;;  %v6868_v5 = vld [vmem:[#allocation10 + $0x44] ss:$16 sps:$4 sm:$0xff]   ;;  %v5910_v7 = vld [vmem:[#allocation10 + $0x8] ss:$16 sps:$4 sm:$0xff]  }
  0x71   :  { %358 = vmatprep.subr.bf16.mxu0 %v6857_v1  ;;  %v5904_v8 = vld [vmem:[#allocation10 + $0x40] ss:$16 sps:$4 sm:$0xff]   ;;  %399 = vmatprep.subr.bf16.mxu1 %v6870_v6  ;;  %v5905_v9 = vld [vmem:[#allocation10 + $0x64] ss:$16 sps:$4 sm:$0xff]   ;;  %v6875_v10 = vld [vmem:[#allocation10 + $0x2c] ss:$16 sps:$4 sm:$0xff]  }
  0x72   :  { %359 = vmatpush1.bf16.msra.mxu0 %v6859_v2  ;;  %400 = vmatpush1.bf16.msra.mxu1 %v5910_v7  ;;  %v6877_v11 = vld [vmem:[#allocation10 + $0x28] ss:$16 sps:$4 sm:$0xff]   ;;  %v5909_v12 = vld [vmem:[#allocation10 + $0x60] ss:$16 sps:$4 sm:$0xff]   ;;  %v5911_v13 = vld [vmem:[#allocation10 + $0x84] ss:$16 sps:$4 sm:$0xff]  }
  0x73   :  { %360 = vmatprep.subr.bf16.mxu0 %v6862_v3  ;;  %401 = vmatprep.subr.bf16.mxu1 %v6875_v10  ;;  %v6880_v14 = vld [vmem:[#allocation10 + $0x4c] ss:$16 sps:$4 sm:$0xff]   ;;  %v6883_v15 = vld [vmem:[#allocation10 + $0x48] ss:$16 sps:$4 sm:$0xff]   ;;  %v5915_v17 = vld [vmem:[#allocation10 + $0x80] ss:$16 sps:$4 sm:$0xff]  }
  0x74   :  { %v6886_v16 = vld [vmem:[#allocation10 + $0x6c] ss:$16 sps:$4 sm:$0xff]   ;;  %v6888_v18 = vld [vmem:[#allocation10 + $0xa4] ss:$16 sps:$4 sm:$0xff]   ;;  %v6891_v19 = vld [vmem:[#allocation10 + $0x68] ss:$16 sps:$4 sm:$0xff]  }
  0x75   :  { %v6894_v20 = vld [vmem:[#allocation10 + $0x8c] ss:$16 sps:$4 sm:$0xff]   ;;  %v6896_v21 = vld [vmem:[#allocation10 + $0xa0] ss:$16 sps:$4 sm:$0xff]   ;;  %v6898_v22 = vld [vmem:[#allocation10 + $0xc4] ss:$16 sps:$4 sm:$0xff]  }
  0x76   :  { %361 = vmatpush1.bf16.msra.mxu0 %v6865_v4  ;;  %402 = vmatpush1.bf16.msra.mxu1 %v6877_v11  ;;  %v6902_v23 = vld [vmem:[#allocation10 + $0x88] ss:$16 sps:$4 sm:$0xff]   ;;  %v6904_v24 = vld [vmem:[#allocation10 + $0xc0] ss:$16 sps:$4 sm:$0xff]   ;;  %v6907_v25 = vld [vmem:[#allocation10 + $0xac] ss:$16 sps:$4 sm:$0xff]  }
  0x77   :  { %362 = vmatprep.subr.bf16.mxu0 %v6868_v5  ;;  %403 = vmatprep.subr.bf16.mxu1 %v6880_v14  ;;  %v6909_v26 = vld [vmem:[#allocation10 + $0xe4] ss:$16 sps:$4 sm:$0xff]   ;;  %v6911_v27 = vld [vmem:[#allocation10 + $0xa8] ss:$16 sps:$4 sm:$0xff]   ;;  %v6914_v28 = vld [vmem:[#allocation10 + $0xcc] ss:$16 sps:$4 sm:$0xff]  }
  0x78   :  { %v6918_v29 = vld [vmem:[#allocation10 + $0xe0] ss:$16 sps:$4 sm:$0xff]   ;;  %v6921_v31 = vld [vmem:[#allocation10 + $0xc8] ss:$16 sps:$4 sm:$0xff]   ;;  %v6924_v32 = vld [vmem:[#allocation10 + $0xec] ss:$16 sps:$4 sm:$0xff]  }
  0x79   :  { %8673 = vst [vmem:[#allocation25_spill] sm:$0xff] %v6918_v29  ;;  %v111_v30 = vld [vmem:[#allocation7] sm:$0xff]  ;;  %v6931_v34 = vld [vmem:[#allocation10 + $0xe8] ss:$16 sps:$4 sm:$0xff]   ;;  %v6726_v7 = vmov 1966171168  }
  0x7a   :  { %363 = vmatpush1.bf16.msra.mxu0 %v5904_v8  ;;  %404 = vmatpush1.bf16.msra.mxu1 %v6883_v15  ;;  %v197_v33 = vpack.c.bf16 %v111_v30, %v111_v30  ;;  %v440_v35 = vld [vmem:[#allocation4] sm:$0xff]  ;;  %v113_v62 = vld [vmem:[#allocation9] sm:$0xff]  ;;  %vm630_vm0 = vcmask 1041409   ;;  %vm632_vm1 = vcmask 1042434   ;;  %vm634_vm2 = vcmask 1043459   ;;  %s6727_s5 = smov [#allocation16]  }
  0x7b   :  { %364 = vmatprep.subr.bf16.mxu0 %v5905_v9  ;;  %405 = vmatprep.subr.bf16.mxu1 %v6886_v16  ;;  %v442_v36 = vunpack.c.l.bf16 %v440_v35  ;;  %v443_v37 = vunpack.c.h.bf16 %v440_v35  ;;  %vm636_vm3 = vcmask 1044484   ;;  %vm638_vm4 = vcmask 1045509   ;;  %s5583_s0 = sshll.u32 %s6727_s5, 4  ;;  %s5584_s0 = int_to_ptr.vmem [resolvable:$true] %s5583_s0 }
  0x7c   :  { %vm640_vm5 = vcmask 1046534   ;;  %vm642_vm6 = vcmask 1047559   ;;  %vm645_vm7 = vcmask 64512   ;;  %s6637_s20 = scalar_lea.vmem %s5584_s0, 128  ;;  %p6642_p7 = scmp.lt.s32.totalorder %s5584_s0, %s5584_s0 }
  0x7d   :  { %p6638_p6 = scmp.ne.s32.totalorder %s5584_s0, %s6637_s20  ;;  %p6643_p8 = scmp.lt.s32.totalorder %s6637_s20, %s6637_s20 }
  0x7e   :  { %365 = vmatpush1.bf16.msra.mxu0 %v5909_v12  ;;  %406 = vmatpush1.bf16.msra.mxu1 %v6891_v19 }
  0x7f   :  { %366 = vmatprep.subr.bf16.mxu0 %v5911_v13  ;;  %407 = vmatprep.subr.bf16.mxu1 %v6894_v20  ;;  %p6644_p9 = por %p6643_p8, %p6642_p7 }
  0x81   :  { %p6645_p10 = pnand %p6644_p9, %p6638_p6 }
  0x82   :  { %367 = vmatpush1.bf16.msra.mxu0 %v5915_v17  ;;  %408 = vmatpush1.bf16.msra.mxu1 %v6902_v23 }
  0x83   :  { %368 = vmatprep.subr.bf16.mxu0 %v6888_v18  ;;  %409 = vmatprep.subr.bf16.mxu1 %v6907_v25 }
  0x86   :  { %369 = vmatpush1.bf16.msra.mxu0 %v6896_v21  ;;  %410 = vmatpush1.bf16.msra.mxu1 %v6911_v27 }
  0x87   :  { %370 = vmatprep.subr.bf16.mxu0 %v6898_v22  ;;  %411 = vmatprep.subr.bf16.mxu1 %v6914_v28 }
  0x8a   :  { %371 = vmatpush1.bf16.msra.mxu0 %v6904_v24  ;;  %412 = vmatpush1.bf16.msra.mxu1 %v6921_v31 }
  0x8b   :  { %372 = vmatprep.subr.bf16.mxu0 %v6909_v26  ;;  %413 = vmatprep.subr.bf16.mxu1 %v6924_v32 }
  0x8e   :  { %373 = vmatpush1.bf16.msra.mxu0 %v6918_v29  ;;  %414 = vmatpush1.bf16.msra.mxu1 %v6931_v34 }
  0x8f   :  { %1099 = vmatprep.subr.bf16.mxu1 %v6857_v1 }
  0x91   :  { %391 = vmatmul.mubr.bf16.vlgmr.msra.gmra.mrb[0].mxu0 %v197_v33  ;;  %432 = vmatmul.mubr.bf16.vlgmr.msra.gmra.mrb[0].mxu1 %v197_v33 }
  0x92   :  { %1100 = vmatpush1.bf16.msra.mxu1 %v6859_v2  ;;  %1131 = vmatprep.mubr.bf16.mxu1 %v8571_v0 }
  0x93   :  { %1101 = vmatprep.subr.bf16.mxu1 %v6862_v3 }
  0x96   :  { %1102 = vmatpush1.bf16.msra.mxu1 %v6865_v4 }
  0x97   :  { %1103 = vmatprep.subr.bf16.mxu1 %v6868_v5 }
  0x9a   :  { %1104 = vmatpush1.bf16.msra.mxu1 %v5904_v8  ;;  %v477_v8 = vunpack.c.l.s4 %v6726_v7 }
  0x9b   :  { %1105 = vmatprep.subr.bf16.mxu1 %v5905_v9  ;;  %v479_v9 = vlaneseq }
  0x9e   :  { %1106 = vmatpush1.bf16.msra.mxu1 %v5909_v12  ;;  %v478_v12 = vunpack.c.0.s8 %v477_v8 }
  0x9f   :  { %1107 = vmatprep.subr.bf16.mxu1 %v5911_v13  ;;  %v6950_v13 = vshrl.u32 %v479_v9, 7 }
  0xa1   :  { %v6953_v30 = vsub.s32 %v478_v12, %v6950_v13  ;;  %v6959_v39 = vsub.s32 0, %v6950_v13 }
  0xa2   :  { %1108 = vmatpush1.bf16.msra.mxu1 %v5915_v17 }
  0xa3   :  { %1109 = vmatprep.subr.bf16.mxu1 %v6888_v18  ;;  %8675 = vst [vmem:[#allocation27_spill] sm:$0xff] %v6953_v30 }
  0xa6   :  { %1110 = vmatpush1.bf16.msra.mxu1 %v6896_v21 }
  0xa7   :  { %1111 = vmatprep.subr.bf16.mxu1 %v6898_v22 }
  0xaa   :  { %1112 = vmatpush1.bf16.msra.mxu1 %v6904_v24 }
  0xab   :  { %1113 = vmatprep.subr.bf16.mxu1 %v6909_v26 }
  0xae   :  { %1114 = vmatpush1.bf16.msra.mxu1 %v6918_v29 }
 0x164   :  { %v392_v38 = vpop.f32.mrb[0].mxu0  ;;  %v433_v48 = vpop.f32.mrb[0].mxu1 }
 0x165   :  { %v446_v40 = vadd.f32 %v442_v36, %v392_v38  ;;  %v394_v41 = vpop.f32.mrb[1].mxu0  ;;  %v435_v49 = vpop.f32.mrb[1].mxu1  ;;  %v448_v55 = vadd.f32 %v444_v52, %v433_v48  ;;  %v5685_v36 = vld [vmem:[#allocation12] sm:$0xff]  }
 0x166   :  { %v447_v42 = vadd.f32 %v443_v37, %v394_v41  ;;  %v396_v43 = vpop.f32.mrb[2].mxu0  ;;  %v449_v50 = vadd.f32 %v445_v46, %v435_v49  ;;  %v437_v51 = vpop.f32.mrb[2].mxu1  ;;  %v5700_v41 = vld [vmem:[#allocation12 + $0x8] sm:$0xff]  }
 0x167   :  { %v5644_v44 = vmul.f32 -1.442695, %v446_v40  ;;  %v397_v45 = vpop.f32.mrb[3].mxu0  ;;  %v438_v53 = vpop.f32.mrb[3].mxu1 }
 0x168   :  { %v5645_v47 = vmul.f32 -1.442695, %v447_v42  ;;  %v5646_v54 = vmul.f32 -1.442695, %v449_v50  ;;  %v6962_v42 = vunpack.c.l.bf16 %v5685_v36  ;;  %v6970_v50 = vunpack.c.h.bf16 %v5685_v36 }
 0x169   :  { %5960 = vpow2.f32 %v5644_v44 }
 0x16a   :  { %5962 = vpow2.f32 %v5645_v47  ;;  %v6967_v47 = vunpack.c.l.bf16 %v5700_v41 }
 0x16b   :  { %5964 = vpow2.f32 %v5646_v54 }
 0x16c   :  { %5966 = vtanh.f32 %v448_v55 }
 0x173   :  { %v5961_v56 = vpop.eup %5960 }
 0x174   :  { %v5963_v57 = vpop.eup %5962  ;;  %v453_v58 = vadd.f32 1.0, %v5961_v56 }
 0x175   :  { %v459_v59 = vadd.f32 1.0, %v5963_v57  ;;  %v5965_v60 = vpop.eup %5964  ;;  %v5701_v57 = vld [vmem:[#allocation12 + $0x10] sm:$0xff]  }
 0x176   :  { %5968 = vrcp.f32 %v453_v58  ;;  %v5967_v61 = vpop.eup %5966  ;;  %v466_v1 = vadd.f32 1.0, %v5965_v60  ;;  %v6986_v7 = vunpack.c.h.bf16 %v5701_v57 }
 0x177   :  { %5970 = vrcp.f32 %v459_v59  ;;  %v6977_v59 = vunpack.c.h.bf16 %v5700_v41 }
 0x178   :  { %5972 = vrcp.f32 %v466_v1  ;;  %8678 = vst [vmem:[#allocation30_spill] sm:$0xff] %v6986_v7 }
 0x179   :  { %8676 = vst [vmem:[#allocation28_spill] sm:$0xff] %v6977_v59 }
 0x180   :  { %v5969_v63 = vpop.eup %5968 }
 0x181   :  { %v5971_v2 = vpop.eup %5970  ;;  %v470_v3 = vmul.f32 %v5969_v63, %v5967_v61  ;;  %v6982_v63 = vunpack.c.l.bf16 %v5701_v57 }
 0x182   :  { %v469_v4 = vmul.f32 %v5971_v2, %v113_v62  ;;  %v5973_v17 = vpop.eup %5972 }
 0x183   :  { %8677 = vst [vmem:[#allocation29_spill] sm:$0xff] %v6982_v63 }
 0x184   :  { %v6947_v5 = vadd.f32 %v470_v3, %v469_v4  ;;  %v5702_v3 = vld [vmem:[#allocation12 + $0x18] sm:$0xff]  }
 0x186   :  { %8674 = vst [vmem:[#allocation26_spill] sm:$0xff] %v6947_v5  ;;  %5974 = vtanh.f32 %v6947_v5 }
 0x190   :  { %v5975_v33 = vpop.eup %5974 }
 0x191   :  { %v473_v35 = vmul.f32 %v5975_v33, %v5973_v17  ;;  %v6990_v33 = vunpack.c.l.bf16 %v5702_v3 }
 0x193   :  { %v6955_v37 = vpack.c.bf16 %v473_v35, %v473_v35  ;;  %v482_v38 = vrot.slane %v473_v35, %v6953_v30  ;;  %v475_v40 = vcombine.high %v473_v35, %v473_v35 }
 0x195   :  { %1132 = vmatmul.mubr.bf16.vlgmr.msra.gmra.mrb[4].mxu1 %v6955_v37  ;;  %v498_v43 = vrot.slane %v482_v38, %v6953_v30  ;;  %v490_v44 = vcombine.high %v482_v38, %v482_v38  ;;  %v489_v45 = vrot.slane %v475_v40, %v6953_v30  ;;  %v6994_v38 = vunpack.c.h.bf16 %v5702_v3 }
 0x197   :  { %v527_v46 = vrot.slane %v498_v43, %v6959_v39  ;;  %v520_v48 = vcombine.high %v498_v43, %v498_v43  ;;  %v512_v49 = vrot.slane %v490_v44, %v6953_v30  ;;  %v505_v51 = vrot.slane %v489_v45, %v6953_v30  ;;  %8679 = vst [vmem:[#allocation31_spill] sm:$0xff] %v6994_v38 }
 0x198   :  { %v491_v52 = vcombine.high %v489_v45, %v489_v45  ;;  %v597_v44 = vand.u32 127, %v479_v9 }
 0x199   :  { %v564_v53 = vmul.f32 %v6962_v42, %v527_v46  ;;  %v535_v54 = vrot.slane %v520_v48, %v6959_v39  ;;  %v531_v55 = vrot.slane %v512_v49, %v6959_v39  ;;  %v522_v56 = vcombine.high %v512_v49, %v512_v49 }
 0x19a   :  { %v519_v61 = vrot.slane %v491_v52, %v6953_v30  ;;  %v543_v1 = vrot.slane %v505_v51, %v6959_v39  ;;  %v521_v2 = vcombine.high %v505_v51, %v505_v51  ;;  %v7000_v46 = vsub.s32 %v597_v44, %v6950_v13 }
 0x19b   :  { %572 = vadd.xlane.f32.xlu0 %v564_v53  ;;  %v566_v58 = vmul.f32 %v6967_v47, %v535_v54  ;;  %v539_v60 = vrot.slane %v522_v56, %v6959_v39  ;;  %v565_v62 = vmul.f32 %v6970_v50, %v531_v55 }
 0x19c   :  { %v547_v8 = vrot.slane %v519_v61, %v6959_v39  ;;  %v523_v12 = vcombine.high %v519_v61, %v519_v61  ;;  %v568_v17 = vmul.f32 %v6982_v63, %v543_v1  ;;  %v551_v35 = vrot.slane %v521_v2, %v6959_v39  ;;  %8680 = vst [vmem:[#allocation32_spill] sm:$0xff] %v7000_v46 }
 0x19d   :  { %576 = vadd.xlane.f32.xlu1 %v566_v58  ;;  %v567_v4 = vmul.f32 %v6977_v59, %v539_v60 }
 0x19e   :  { %v569_v36 = vmul.f32 %v6986_v7, %v547_v8  ;;  %v555_v40 = vrot.slane %v523_v12, %v6959_v39  ;;  %v570_v41 = vmul.f32 %v6990_v33, %v551_v35 }
 0x19f   :  { %574 = vadd.xlane.f32.xlu0 %v565_v62 }
 0x1a0   :  { %v571_v43 = vmul.f32 %v6994_v38, %v555_v40 }
 0x1a1   :  { %578 = vadd.xlane.f32.xlu1 %v567_v4 }
 0x1a3   :  { %580 = vadd.xlane.f32.xlu0 %v568_v17 }
 0x1a5   :  { %582 = vadd.xlane.f32.xlu1 %v569_v36 }
 0x1a7   :  { %584 = vadd.xlane.f32.xlu0 %v570_v41 }
 0x1a9   :  { %586 = vadd.xlane.f32.xlu1 %v571_v43 }
 0x228   :  { %v573_v45 = vpop.xlane.xlu0 %572 }
 0x229   :  { %v601_v51 = vrot.slane %v573_v45, %v7000_v46 }
 0x22a   :  { %v577_v48 = vpop.xlane.xlu1 %576 }
 0x22b   :  { %v609_v53 = vrot.slane %v577_v48, %v7000_v46 }
 0x22c   :  { %v575_v49 = vpop.xlane.xlu0 %574 }
 0x22d   :  { %v605_v52 = vrot.slane %v575_v49, %v7000_v46 }
 0x22e   :  { %v579_v54 = vpop.xlane.xlu1 %578 }
 0x22f   :  { %v631_v55 = vsel %vm630_vm0, %v605_v52, %v601_v51  ;;  %v613_v9 = vrot.slane %v579_v54, %v7000_v46  ;;  %v7023_v51 = vsub.s32 1, %v6950_v13  ;;  %v7026_v52 = vsub.s32 2, %v6950_v13 }
 0x230   :  { %v633_v56 = vsel %vm632_vm1, %v609_v53, %v631_v55  ;;  %v581_v57 = vpop.xlane.xlu0 %580  ;;  %v7029_v53 = vsub.s32 3, %v6950_v13 }
 0x231   :  { %v635_v58 = vsel %vm634_vm2, %v613_v9, %v633_v56  ;;  %v617_v60 = vrot.slane %v581_v57, %v7000_v46  ;;  %8683 = vst [vmem:[#allocation35_spill] sm:$0xff] %v7023_v51  ;;  %8684 = vst [vmem:[#allocation36_spill] sm:$0xff] %v7026_v52 }
 0x232   :  { %v583_v61 = vpop.xlane.xlu1 %582  ;;  %8685 = vst [vmem:[#allocation37_spill] sm:$0xff] %v7029_v53 }
 0x233   :  { %v637_v62 = vsel %vm636_vm3, %v617_v60, %v635_v58  ;;  %v621_v1 = vrot.slane %v583_v61, %v7000_v46 }
 0x234   :  { %v585_v2 = vpop.xlane.xlu0 %584 }
 0x235   :  { %v625_v3 = vrot.slane %v585_v2, %v7000_v46  ;;  %v639_v4 = vsel %vm638_vm4, %v621_v1, %v637_v62  ;;  %v7035_v1 = vsub.s32 4, %v6950_v13 }
 0x236   :  { %v587_v8 = vpop.xlane.xlu1 %586 }
 0x237   :  { %v629_v12 = vrot.slane %v587_v8, %v7000_v46  ;;  %v641_v17 = vsel %vm640_vm5, %v625_v3, %v639_v4  ;;  %8686 = vst [vmem:[#allocation38_spill] sm:$0xff] %v7035_v1 }
 0x239   :  { %v643_v35 = vsel %vm642_vm6, %v629_v12, %v641_v17 }
 0x23a   :  { %v646_v36 = vsel %vm645_vm7, %v643_v35, -inf  ;;  %v7039_v35 = vsub.s32 5, %v6950_v13 }
 0x23b   :  { %647 = vmax.xlane.f32.xlu0 %v646_v36 }
 0x23c   :  { %8687 = vst [vmem:[#allocation39_spill] sm:$0xff] %v7039_v35 }
 0x268   :  { %v7018_v40 = vpop.f32.mrb[4].mxu1 }
 0x269   :  { %8681 = vst [vmem:[#allocation33_spill] sm:$0xff] %v7018_v40  ;;  %v7020_v41 = vpop.f32.mrb[5].mxu1 }
 0x26a   :  { %8682 = vst [vmem:[#allocation34_spill] sm:$0xff] %v7020_v41  ;;  %v1137_v43 = vpop.f32.mrb[6].mxu1 }
 0x26b   :  { %v1138_v44 = vpop.f32.mrb[7].mxu1 }
 0x2c8   :  { %v648_v55 = vpop.xlane.xlu0 %647 }
 0x2c9   :  { %v653_v9 = vrot.slane %v648_v55, %v6959_v39  ;;  %v657_v56 = vrot.slane %v648_v55, %v7023_v51  ;;  %v661_v58 = vrot.slane %v648_v55, %v7026_v52  ;;  %v665_v3 = vrot.slane %v648_v55, %v7029_v53 }
 0x2ca   :  { %v669_v36 = vrot.slane %v648_v55, %v7035_v1 }
 0x2cb   :  { %v691_v60 = vsub.f32 %v575_v49, %v657_v56  ;;  %v690_v62 = vsub.f32 %v573_v45, %v653_v9  ;;  %v692_v4 = vsub.f32 %v577_v48, %v661_v58  ;;  %v693_v44 = vsub.f32 %v579_v54, %v665_v3 }
 0x2cc   :  { %v7043_v49 = vsub.s32 6, %v6950_v13  ;;  %v673_v45 = vrot.slane %v648_v55, %v7039_v35  ;;  %v694_v56 = vsub.f32 %v581_v57, %v669_v36  ;;  %v7047_v48 = vsub.s32 7, %v6950_v13 }
 0x2cd   :  { %v700_v12 = vmul.f32 1.442695, %v691_v60  ;;  %v698_v17 = vmul.f32 1.442695, %v690_v62  ;;  %v702_v43 = vmul.f32 1.442695, %v692_v4 }
 0x2ce   :  { %8688 = vst [vmem:[#allocation40_spill] sm:$0xff] %v7043_v49  ;;  %v704_v9 = vmul.f32 1.442695, %v693_v44  ;;  %8689 = vst [vmem:[#allocation41_spill] sm:$0xff] %v7047_v48  ;;  %v677_v58 = vrot.slane %v648_v55, %v7043_v49  ;;  %v706_v60 = vmul.f32 1.442695, %v694_v56  ;;  %v695_v62 = vsub.f32 %v583_v61, %v673_v45 }
 0x2cf   :  { %5976 = vpow2.f32 %v700_v12  ;;  %v681_v54 = vrot.slane %v648_v55, %v7047_v48 }
 0x2d0   :  { %5978 = vpow2.f32 %v698_v17  ;;  %v708_v3 = vmul.f32 1.442695, %v695_v62  ;;  %v696_v17 = vsub.f32 %v585_v2, %v677_v58 }
 0x2d1   :  { %5980 = vpow2.f32 %v702_v43  ;;  %v697_v36 = vsub.f32 %v587_v8, %v681_v54 }
 0x2d2   :  { %5982 = vpow2.f32 %v704_v9  ;;  %v710_v13 = vmul.f32 1.442695, %v696_v17 }
 0x2d3   :  { %5984 = vpow2.f32 %v706_v60  ;;  %v712_v61 = vmul.f32 1.442695, %v697_v36 }
 0x2d4   :  { %5986 = vpow2.f32 %v708_v3 }
 0x2d5   :  { %5988 = vpow2.f32 %v710_v13 }
 0x2d6   :  { %5990 = vpow2.f32 %v712_v61 }
 0x2d9   :  { %v7050_v12 = vpop.eup %5976 }
 0x2da   :  { %v5979_v4 = vpop.eup %5978  ;;  %726 = vperm.xlu0 %5895, %v7050_v12  }
 0x2db   :  { %723 = vperm.xlu1 %5894, %v5979_v4   ;;  %v7054_v57 = vpop.eup %5980 }
 0x2dc   :  { %v7057_v43 = vpop.eup %5982 }
 0x2dd   :  { %v7060_v44 = vpop.eup %5984 }
 0x2de   :  { %v7063_v55 = vpop.eup %5986 }
 0x2df   :  { %729 = vperm.xlu1 %5894, %v7054_v57   ;;  %v7066_v2 = vpop.eup %5988 }
 0x2e0   :  { %v7069_v8 = vpop.eup %5990 }
 0x2e3   :  { %732 = vperm.xlu1 %5894, %v7057_v43  }
 0x2e7   :  { %735 = vperm.xlu1 %5894, %v7060_v44  }
 0x2eb   :  { %738 = vperm.xlu1 %5894, %v7063_v55  }
 0x2ef   :  { %741 = vperm.xlu1 %5894, %v7066_v2  }
 0x2f3   :  { %744 = vperm.xlu1 %5894, %v7069_v8  }
 0x359   :  { %v727_v60 = vpop.permute.xlu0 %726 }
 0x35a   :  { %v724_v45 = vpop.permute.xlu1 %723  ;;  %v753_v54 = vrot.slane %v727_v60, %v7000_v46 }
 0x35b   :  { %v749_v3 = vrot.slane %v724_v45, %v7000_v46 }
 0x35d   :  { %v778_v0 = vsel %vm630_vm0, %v753_v54, %v749_v3 }
 0x35e   :  { %v730_v9 = vpop.permute.xlu1 %729 }
 0x35f   :  { %v757_v17 = vrot.slane %v730_v9, %v7000_v46 }
 0x361   :  { %v779_v5 = vsel %vm632_vm1, %v757_v17, %v778_v0 }
 0x362   :  { %v733_v56 = vpop.permute.xlu1 %732 }
 0x363   :  { %v761_v13 = vrot.slane %v733_v56, %v7000_v46 }
 0x365   :  { %v780_v41 = vsel %vm634_vm2, %v761_v13, %v779_v5 }
 0x366   :  { %v736_v58 = vpop.permute.xlu1 %735 }
 0x367   :  { %v765_v36 = vrot.slane %v736_v58, %v7000_v46 }
 0x369   :  { %v781_v60 = vsel %vm636_vm3, %v765_v36, %v780_v41 }
 0x36a   :  { %v739_v62 = vpop.permute.xlu1 %738 }
 0x36b   :  { %v769_v30 = vrot.slane %v739_v62, %v7000_v46 }
 0x36d   :  { %v782_v56 = vsel %vm638_vm4, %v769_v30, %v781_v60 }
 0x36e   :  { %v742_v61 = vpop.permute.xlu1 %741 }
 0x36f   :  { %v773_v40 = vrot.slane %v742_v61, %v7000_v46 }
 0x371   :  { %v783_v58 = vsel %vm640_vm5, %v773_v40, %v782_v56 }
 0x372   :  { %v745_v45 = vpop.permute.xlu1 %744 }
 0x373   :  { %v777_v9 = vrot.slane %v745_v45, %v7000_v46 }
 0x375   :  { %v784_v29 = vsel %vm642_vm6, %v777_v9, %v783_v58 }
 0x376   :  { %v786_v54 = vsel %vm645_vm7, %v784_v29, 0.0 }
 0x377   :  { %787 = vadd.xlane.f32.xlu1 %v786_v54 }
 0x404   :  { %v788_v62 = vpop.xlane.xlu1 %787 }
 0x405   :  { %v793_v0 = vrot.slane %v788_v62, %v6959_v39  ;;  %v797_v3 = vrot.slane %v788_v62, %v7023_v51  ;;  %v801_v5 = vrot.slane %v788_v62, %v7026_v52  ;;  %v805_v41 = vrot.slane %v788_v62, %v7029_v53 }
 0x406   :  { %v809_v40 = vrot.slane %v788_v62, %v7035_v1  ;;  %v813_v29 = vrot.slane %v788_v62, %v7039_v35  ;;  %v817_v60 = vrot.slane %v788_v62, %v7043_v49  ;;  %v821_v56 = vrot.slane %v788_v62, %v7047_v48  ;;  %v7109_v62 = vld [vmem:[#allocation13 + $0x48] sm:$0xff]  }
 0x407   :  { %5992 = vrcp.f32 %v793_v0 }
 0x408   :  { %5994 = vrcp.f32 %v797_v3  ;;  %v7101_v3 = vld [vmem:[#allocation13 + $0x40] sm:$0xff]  }
 0x409   :  { %5996 = vrcp.f32 %v801_v5  ;;  %5703 = vmatprep.subr.bf16.mxu0 %v7101_v3  ;;  %5725 = vmatprep.subr.bf16.mxu1 %v7101_v3 }
 0x40a   :  { %5998 = vrcp.f32 %v805_v41 }
 0x40b   :  { %6000 = vrcp.f32 %v809_v40  ;;  %v7126_v40 = vld [vmem:[#allocation13 + $0x58] sm:$0xff]  }
 0x40c   :  { %6002 = vrcp.f32 %v813_v29  ;;  %v7142_v29 = vld [vmem:[#allocation13 + $0x68] sm:$0xff]  }
 0x40d   :  { %6004 = vrcp.f32 %v817_v60  ;;  %8693 = vst [vmem:[#allocation45_spill] sm:$0xff] %v7142_v29  ;;  %v7152_v60 = vld [vmem:[#allocation13 + $0x30] sm:$0xff]  }
 0x40e   :  { %6006 = vrcp.f32 %v821_v56  ;;  %8696 = vst [vmem:[#allocation48_spill] sm:$0xff] %v7152_v60 }
 0x411   :  { %v5993_v30 = vpop.eup %5992 }
 0x412   :  { %v831_v17 = vmul.f32 %v5993_v30, %v5979_v4  ;;  %v5995_v13 = vpop.eup %5994  ;;  %v7118_v30 = vld [vmem:[#allocation13 + $0x50] sm:$0xff]  }
 0x413   :  { %v833_v36 = vmul.f32 %v5995_v13, %v7050_v12  ;;  %v5997_v61 = vpop.eup %5996  ;;  %v7137_v13 = vld [vmem:[#allocation13 + $0x20] sm:$0xff]  }
 0x414   :  { %848 = vperm.xlu0 %5895, %v831_v17   ;;  %v835_v45 = vmul.f32 %v5997_v61, %v7054_v57  ;;  %v5999_v9 = vpop.eup %5998  ;;  %v7103_v57 = vld [vmem:[#allocation13] sm:$0xff]   ;;  %v7129_v17 = vld [vmem:[#allocation13 + $0x18] sm:$0xff]   ;;  %8692 = vst [vmem:[#allocation44_spill] sm:$0xff] %v7137_v13  ;;  %v7148_v61 = vld [vmem:[#allocation13 + $0x70] sm:$0xff]  }
 0x415   :  { %v837_v4 = vmul.f32 %v5999_v9, %v7057_v43  ;;  %v6001_v58 = vpop.eup %6000  ;;  %5704 = vmatpush3.bf16.msra.mxu0 %v7103_v57  ;;  %5726 = vmatpush3.bf16.msra.mxu1 %v7103_v57  ;;  %8690 = vst [vmem:[#allocation42_spill] sm:$0xff] %v7129_v17  ;;  %8695 = vst [vmem:[#allocation47_spill] sm:$0xff] %v7148_v61  ;;  %v7160_v9 = vld [vmem:[#allocation13 + $0x38] sm:$0xff]  }
 0x416   :  { %v839_v54 = vmul.f32 %v6001_v58, %v7060_v44  ;;  %v6003_v12 = vpop.eup %6002  ;;  %5705 = vmatprep.subr.bf16.mxu0 %v7109_v62  ;;  %5727 = vmatprep.subr.bf16.mxu1 %v7109_v62  ;;  %8698 = vst [vmem:[#allocation50_spill] sm:$0xff] %v7160_v9 }
 0x417   :  { %v841_v0 = vmul.f32 %v6003_v12, %v7063_v55  ;;  %v6005_v5 = vpop.eup %6004  ;;  %v7112_v55 = vld [vmem:[#allocation13 + $0x8] sm:$0xff]  }
 0x418   :  { %853 = vperm.xlu0 %5895, %v833_v36   ;;  %v843_v43 = vmul.f32 %v6005_v5, %v7066_v2  ;;  %v6007_v44 = vpop.eup %6006  ;;  %v7121_v2 = vld [vmem:[#allocation13 + $0x10] sm:$0xff]   ;;  %v7145_v36 = vld [vmem:[#allocation13 + $0x28] sm:$0xff]  }
 0x419   :  { %5706 = vmatpush3.bf16.msra.mxu0 %v7112_v55  ;;  %v845_v41 = vmul.f32 %v6007_v44, %v7069_v8  ;;  %5728 = vmatpush3.bf16.msra.mxu1 %v7112_v55  ;;  %v7134_v8 = vld [vmem:[#allocation13 + $0x60] sm:$0xff]   ;;  %8694 = vst [vmem:[#allocation46_spill] sm:$0xff] %v7145_v36 }
 0x41a   :  { %5707 = vmatprep.subr.bf16.mxu0 %v7118_v30  ;;  %5729 = vmatprep.subr.bf16.mxu1 %v7118_v30  ;;  %8691 = vst [vmem:[#allocation43_spill] sm:$0xff] %v7134_v8 }
 0x41c   :  { %858 = vperm.xlu0 %5895, %v835_v45   ;;  %v7155_v45 = vld [vmem:[#allocation13 + $0x78] sm:$0xff]  }
 0x41d   :  { %5708 = vmatpush3.bf16.msra.mxu0 %v7121_v2  ;;  %5730 = vmatpush3.bf16.msra.mxu1 %v7121_v2  ;;  %8697 = vst [vmem:[#allocation49_spill] sm:$0xff] %v7155_v45 }
 0x41e   :  { %5709 = vmatprep.subr.bf16.mxu0 %v7126_v40  ;;  %5731 = vmatprep.subr.bf16.mxu1 %v7126_v40 }
 0x420   :  { %863 = vperm.xlu0 %5895, %v837_v4  }
 0x421   :  { %5710 = vmatpush3.bf16.msra.mxu0 %v7129_v17  ;;  %5732 = vmatpush3.bf16.msra.mxu1 %v7129_v17 }
 0x422   :  { %5711 = vmatprep.subr.bf16.mxu0 %v7134_v8  ;;  %5733 = vmatprep.subr.bf16.mxu1 %v7134_v8 }
 0x424   :  { %868 = vperm.xlu0 %5895, %v839_v54  }
 0x425   :  { %5712 = vmatpush3.bf16.msra.mxu0 %v7137_v13  ;;  %5734 = vmatpush3.bf16.msra.mxu1 %v7137_v13 }
 0x426   :  { %5713 = vmatprep.subr.bf16.mxu0 %v7142_v29  ;;  %5735 = vmatprep.subr.bf16.mxu1 %v7142_v29 }
 0x428   :  { %873 = vperm.xlu0 %5895, %v841_v0  }
 0x429   :  { %5714 = vmatpush3.bf16.msra.mxu0 %v7145_v36  ;;  %5736 = vmatpush3.bf16.msra.mxu1 %v7145_v36 }
 0x42a   :  { %5715 = vmatprep.subr.bf16.mxu0 %v7148_v61  ;;  %5737 = vmatprep.subr.bf16.mxu1 %v7148_v61 }
 0x42c   :  { %878 = vperm.xlu0 %5895, %v843_v43  }
 0x42d   :  { %5716 = vmatpush3.bf16.msra.mxu0 %v7152_v60  ;;  %5738 = vmatpush3.bf16.msra.mxu1 %v7152_v60 }
 0x42e   :  { %5717 = vmatprep.subr.bf16.mxu0 %v7155_v45  ;;  %5739 = vmatprep.subr.bf16.mxu1 %v7155_v45 }
 0x430   :  { %883 = vperm.xlu0 %5895, %v845_v41  }
 0x431   :  { %5718 = vmatpush3.bf16.msra.mxu0 %v7160_v9  ;;  %5740 = vmatpush3.bf16.msra.mxu1 %v7160_v9 }
 0x432   :  { %1140 = vmatprep.subr.bf16.mxu0 %v6870_v6  ;;  %1777 = vmatprep.subr.bf16.mxu1 %v6870_v6 }
 0x493   :  { %v849_v56 = vpop.permute.xlu0 %848 }
 0x494   :  { %v886_v0 = vmul.f32 %v6962_v42, %v849_v56 }
 0x496   :  { %v894_v48 = vrot.slane %v886_v0, 4 }
 0x497   :  { %v854_v4 = vpop.permute.xlu0 %853 }
 0x498   :  { %v887_v54 = vmul.f32 %v6970_v50, %v854_v4  ;;  %v895_v52 = vadd.f32 %v894_v48, %v886_v0 }
 0x49a   :  { %v900_v43 = vrot.slane %v887_v54, 4  ;;  %v896_v60 = vrot.slane %v895_v52, 2 }
 0x49b   :  { %v859_v58 = vpop.permute.xlu0 %858 }
 0x49c   :  { %v888_v12 = vmul.f32 %v6967_v47, %v859_v58  ;;  %v901_v49 = vadd.f32 %v900_v43, %v887_v54 }
 0x49e   :  { %v906_v41 = vrot.slane %v888_v12, 4  ;;  %v902_v9 = vrot.slane %v901_v49, 2 }
 0x49f   :  { %v864_v5 = vpop.permute.xlu0 %863 }
 0x4a0   :  { %v889_v44 = vmul.f32 %v6977_v59, %v864_v5  ;;  %v907_v1 = vadd.f32 %v906_v41, %v888_v12  ;;  %v903_v13 = vadd.f32 %v902_v9, %v901_v49  ;;  %v897_v12 = vadd.f32 %v896_v60, %v895_v52 }
 0x4a2   :  { %v912_v35 = vrot.slane %v889_v44, 4  ;;  %v908_v45 = vrot.slane %v907_v1, 2  ;;  %v898_v8 = vrot.slane %v897_v12, 1 }
 0x4a3   :  { %v869_v53 = vpop.permute.xlu0 %868 }
 0x4a4   :  { %v890_v6 = vmul.f32 %v6982_v63, %v869_v53  ;;  %v913_v51 = vadd.f32 %v912_v35, %v889_v44  ;;  %v909_v53 = vadd.f32 %v908_v45, %v907_v1 }
 0x4a6   :  { %v918_v46 = vrot.slane %v890_v6, 4  ;;  %v914_v61 = vrot.slane %v913_v51, 2 }
 0x4a7   :  { %v874_v4 = vpop.permute.xlu0 %873 }
 0x4a8   :  { %v919_v58 = vadd.f32 %v918_v46, %v890_v6  ;;  %v891_v56 = vmul.f32 %v6986_v7, %v874_v4  ;;  %v915_v48 = vadd.f32 %v914_v61, %v913_v51  ;;  %v904_v46 = vrot.slane %v903_v13, 1 }
 0x4a9   :  { %v910_v7 = vrot.slane %v909_v53, 1  ;;  %v899_v61 = vadd.f32 %v898_v8, %v897_v12  ;;  %v7185_v12 = vld [vmem:[#allocation10 + $0x8] ss:$16 sps:$4 sm:$0xff]  }
 0x4aa   :  { %v924_v5 = vrot.slane %v891_v56, 4  ;;  %v920_v36 = vrot.slane %v919_v58, 2  ;;  %v916_v17 = vrot.slane %v915_v48, 1 }
 0x4ab   :  { %v879_v29 = vpop.permute.xlu0 %878  ;;  %v911_v51 = vadd.f32 %v910_v7, %v909_v53 }
 0x4ac   :  { %v925_v59 = vadd.f32 %v924_v5, %v891_v56  ;;  %v892_v54 = vmul.f32 %v6990_v33, %v879_v29  ;;  %v921_v43 = vadd.f32 %v920_v36, %v919_v58  ;;  %v905_v56 = vadd.f32 %v904_v46, %v903_v13 }
 0x4ad   :  { %v917_v60 = vadd.f32 %v916_v17, %v915_v48  ;;  %v8699_v48 = vmov 0  }
 0x4ae   :  { %v926_v35 = vrot.slane %v925_v59, 2  ;;  %v930_v0 = vrot.slane %v892_v54, 4  ;;  %v922_v9 = vrot.slane %v921_v43, 1 }
 0x4af   :  { %v884_v44 = vpop.permute.xlu0 %883 }
 0x4b0   :  { %v927_v41 = vadd.f32 %v926_v35, %v925_v59  ;;  %v931_v6 = vadd.f32 %v930_v0, %v892_v54  ;;  %v893_v4 = vmul.f32 %v6994_v38, %v884_v44  ;;  %v923_v58 = vadd.f32 %v922_v9, %v921_v43  ;;  %v1183_v9 = vld [vmem:[#allocation4 + $0x18] sm:$0xff] }
 0x4b1   :  { %v950_v59 = vsel %vm630_vm0, %v905_v56, %v899_v61 }
 0x4b2   :  { %v932_v63 = vrot.slane %v931_v6, 2  ;;  %v936_v49 = vrot.slane %v893_v4, 4  ;;  %v928_v29 = vrot.slane %v927_v41, 1  ;;  %v951_v35 = vsel %vm632_vm1, %v911_v51, %v950_v59 }
 0x4b3   :  { %v952_v44 = vsel %vm634_vm2, %v917_v60, %v951_v35  ;;  %v1187_v51 = vunpack.c.h.bf16 %v1183_v9 }
 0x4b4   :  { %v933_v1 = vadd.f32 %v932_v63, %v931_v6  ;;  %v937_v52 = vadd.f32 %v936_v49, %v893_v4  ;;  %v929_v5 = vadd.f32 %v928_v29, %v927_v41  ;;  %v953_v13 = vsel %vm636_vm3, %v923_v58, %v952_v44  ;;  %v8703_v44 = vld [vmem:[#allocation26_spill] sm:$0xff] }
 0x4b6   :  { %v934_v36 = vrot.slane %v933_v1, 1  ;;  %v938_v45 = vrot.slane %v937_v52, 2  ;;  %v954_v7 = vsel %vm638_vm4, %v929_v5, %v953_v13 }
 0x4b8   :  { %v939_v54 = vadd.f32 %v938_v45, %v937_v52  ;;  %v935_v0 = vadd.f32 %v934_v36, %v933_v1  ;;  %v1186_v1 = vunpack.c.l.bf16 %v1183_v9 }
 0x4ba   :  { %v940_v38 = vrot.slane %v939_v54, 1  ;;  %v955_v17 = vsel %vm640_vm5, %v935_v0, %v954_v7 }
 0x4bc   :  { %v941_v63 = vadd.f32 %v940_v38, %v939_v54 }
 0x4be   :  { %v956_v8 = vsel %vm642_vm6, %v941_v63, %v955_v17 }
 0x4bf   :  { %v959_v53 = vpack.c.bf16 %v956_v8, %v956_v8 }
 0x4c1   :  { %1088 = vmatprep.mubr.bf16.mxu0 %v959_v53 }
 0x4c2   :  { %1089 = vmatmul.mubr.bf16.vlgmr.msra.gmra.mrb[4].mxu0 %v6955_v37 }
 0x4c3   :  { %1141 = vmatpush1.bf16.msra.mxu0 %v7185_v12  ;;  %1172 = vmatprep.mubr.bf16.mxu0 %v8699_v48 }
 0x4c4   :  { %1142 = vmatprep.subr.bf16.mxu0 %v6875_v10  ;;  %v7203_v10 = vld [vmem:[#allocation10 + $0x4] ss:$16 sps:$4 sm:$0xff]  }
 0x4c7   :  { %1143 = vmatpush1.bf16.msra.mxu0 %v6877_v11  ;;  %v7207_v11 = vld [vmem:[#allocation10] ss:$16 sps:$4 sm:$0xff]  }
 0x4c8   :  { %1144 = vmatprep.subr.bf16.mxu0 %v6880_v14  ;;  %v7211_v14 = vld [vmem:[#allocation10 + $0x24] ss:$16 sps:$4 sm:$0xff]  }
 0x4cb   :  { %1145 = vmatpush1.bf16.msra.mxu0 %v6883_v15  ;;  %v7214_v15 = vld [vmem:[#allocation10 + $0x20] ss:$16 sps:$4 sm:$0xff]  }
 0x4cc   :  { %1146 = vmatprep.subr.bf16.mxu0 %v6886_v16  ;;  %v7217_v16 = vld [vmem:[#allocation10 + $0x44] ss:$16 sps:$4 sm:$0xff]  }
 0x4cf   :  { %1147 = vmatpush1.bf16.msra.mxu0 %v6891_v19  ;;  %v7220_v19 = vld [vmem:[#allocation10 + $0x40] ss:$16 sps:$4 sm:$0xff]  }
 0x4d0   :  { %1148 = vmatprep.subr.bf16.mxu0 %v6894_v20  ;;  %v7223_v20 = vld [vmem:[#allocation10 + $0x64] ss:$16 sps:$4 sm:$0xff]  }
 0x4d3   :  { %1149 = vmatpush1.bf16.msra.mxu0 %v6902_v23  ;;  %v7226_v23 = vld [vmem:[#allocation10 + $0x60] ss:$16 sps:$4 sm:$0xff]  }
 0x4d4   :  { %1150 = vmatprep.subr.bf16.mxu0 %v6907_v25  ;;  %v7229_v25 = vld [vmem:[#allocation10 + $0x84] ss:$16 sps:$4 sm:$0xff]  }
 0x4d7   :  { %1151 = vmatpush1.bf16.msra.mxu0 %v6911_v27  ;;  %v7232_v27 = vld [vmem:[#allocation10 + $0x80] ss:$16 sps:$4 sm:$0xff]  }
 0x4d8   :  { %1152 = vmatprep.subr.bf16.mxu0 %v6914_v28  ;;  %v8700_v28 = vld [vmem:[#allocation25_spill] sm:$0xff] }
 0x4db   :  { %1153 = vmatpush1.bf16.msra.mxu0 %v6921_v31 }
 0x4dc   :  { %1154 = vmatprep.subr.bf16.mxu0 %v6924_v32  ;;  %v1182_v32 = vld [vmem:[#allocation4 + $0x10] sm:$0xff] }
 0x4dd   :  { %v1185_v46 = vunpack.c.h.bf16 %v1182_v32 }
 0x4df   :  { %1155 = vmatpush1.bf16.msra.mxu0 %v6931_v34 }
 0x4e0   :  { %1736 = vmatprep.subr.bf16.mxu0 %v7203_v10 }
 0x4e2   :  { %1173 = vmatmul.mubr.bf16.vlgmr.msra.gmra.mrb[8].mxu0 %v6955_v37 }
 0x4e3   :  { %1737 = vmatpush1.bf16.msra.mxu0 %v7207_v11  ;;  %1768 = vmatprep.mubr.bf16.mxu0 %v8699_v48 }
 0x4e4   :  { %1738 = vmatprep.subr.bf16.mxu0 %v7211_v14 }
 0x4e7   :  { %1739 = vmatpush1.bf16.msra.mxu0 %v7214_v15 }
 0x4e8   :  { %1740 = vmatprep.subr.bf16.mxu0 %v7217_v16 }
 0x4eb   :  { %1741 = vmatpush1.bf16.msra.mxu0 %v7220_v19 }
 0x4ec   :  { %1742 = vmatprep.subr.bf16.mxu0 %v7223_v20 }
 0x4ef   :  { %1743 = vmatpush1.bf16.msra.mxu0 %v7226_v23 }
 0x4f0   :  { %1744 = vmatprep.subr.bf16.mxu0 %v7229_v25 }
 0x4f3   :  { %1745 = vmatpush1.bf16.msra.mxu0 %v7232_v27 }
 0x4f4   :  { %1746 = vmatprep.subr.bf16.mxu0 %v6888_v18  ;;  %v1184_v18 = vunpack.c.l.bf16 %v1182_v32 }
 0x4f7   :  { %1747 = vmatpush1.bf16.msra.mxu0 %v6896_v21  ;;  %v8701_v21 = vld [vmem:[#allocation34_spill] sm:$0xff] }
 0x4f8   :  { %1748 = vmatprep.subr.bf16.mxu0 %v6898_v22  ;;  %v1189_v41 = vadd.f32 %v1185_v46, %v8701_v21  ;;  %v8702_v22 = vld [vmem:[#allocation33_spill] sm:$0xff] }
 0x4f9   :  { %v1188_v6 = vadd.f32 %v1184_v18, %v8702_v22 }
 0x4fb   :  { %1749 = vmatpush1.bf16.msra.mxu0 %v6904_v24  ;;  %v5664_v24 = vmul.f32 -1.442695, %v1189_v41  ;;  %v5663_v4 = vmul.f32 -1.442695, %v1188_v6 }
 0x4fc   :  { %1750 = vmatprep.subr.bf16.mxu0 %v6909_v26 }
 0x4ff   :  { %1751 = vmatpush1.bf16.msra.mxu0 %v8700_v28 }
 0x500   :  { %5747 = vmatprep.subr.bf16.mxu0 %v7101_v3 }
 0x595   :  { %v5719_v31 = vpop.f32.mrb[4].mxu0 }
 0x596   :  { %v5720_v34 = vpop.f32.mrb[5].mxu0 }
 0x597   :  { %v5721_v37 = vadd.f32 %v5720_v34, %v5719_v31  ;;  %v5722_v38 = vpop.f32.mrb[6].mxu0  ;;  %v8704_v34 = vld [vmem:[#allocation27_spill] sm:$0xff] }
 0x598   :  { %v5723_v43 = vpop.f32.mrb[7].mxu0 }
 0x599   :  { %6008 = vtanh.f32 %v5721_v37 }
 0x59a   :  { %6010 = vpow2.f32 %v5664_v24 }
 0x59b   :  { %6012 = vpow2.f32 %v5663_v4 }
 0x5a3   :  { %v6009_v26 = vpop.eup %6008 }
 0x5a4   :  { %v1097_v49 = vpack.c.bf16 %v6009_v26, %v6009_v26  ;;  %v6011_v3 = vpop.eup %6010 }
 0x5a5   :  { %v6013_v56 = vpop.eup %6012  ;;  %v1201_v29 = vadd.f32 1.0, %v6011_v3 }
 0x5a6   :  { %1098 = vst [vmem:[#allocation15] sm:$0xf] %v1097_v49  ;;  %v1195_v52 = vadd.f32 1.0, %v6013_v56  ;;  %v8705_v56 = vld [vmem:[#allocation29_spill] sm:$0xff] }
 0x5a7   :  { %6014 = vrcp.f32 %v1201_v29 }
 0x5a8   :  { %6016 = vrcp.f32 %v1195_v52  ;;  %v8706_v52 = vld [vmem:[#allocation42_spill] sm:$0xff] }
 0x5b1   :  { %v6015_v54 = vpop.eup %6014 }
 0x5b2   :  { %v6017_v35 = vpop.eup %6016  ;;  %v1211_v13 = vmul.f32 %v6015_v54, %v8703_v44  ;;  %v8712_v54 = vld [vmem:[#allocation46_spill] sm:$0xff] }
 0x5b5   :  { %v1174_v61 = vpop.f32.mrb[8].mxu0 }
 0x5b6   :  { %v1190_v60 = vadd.f32 %v1186_v1, %v1174_v61  ;;  %v1176_v36 = vpop.f32.mrb[9].mxu0 }
 0x5b7   :  { %v1191_v45 = vadd.f32 %v1187_v51, %v1176_v36  ;;  %v1178_v58 = vpop.f32.mrb[10].mxu0  ;;  %v8708_v51 = vld [vmem:[#allocation28_spill] sm:$0xff] }
 0x5b8   :  { %6018 = vtanh.f32 %v1190_v60  ;;  %v1179_v59 = vpop.f32.mrb[11].mxu0 }
 0x5b9   :  { %v5665_v5 = vmul.f32 -1.442695, %v1191_v45  ;;  %v8711_v45 = vld [vmem:[#allocation30_spill] sm:$0xff] }
 0x5bb   :  { %6020 = vpow2.f32 %v5665_v5 }
 0x5c2   :  { %v6019_v0 = vpop.eup %6018 }
 0x5c3   :  { %v1212_v63 = vmul.f32 %v6019_v0, %v6017_v35  ;;  %v8713_v35 = vld [vmem:[#allocation47_spill] sm:$0xff] }
 0x5c5   :  { %v6021_v7 = vpop.eup %6020  ;;  %v7245_v17 = vadd.f32 %v1212_v63, %v1211_v13  ;;  %v8714_v13 = vld [vmem:[#allocation48_spill] sm:$0xff]  ;;  %v8715_v63 = vld [vmem:[#allocation49_spill] sm:$0xff] }
 0x5c6   :  { %v1208_v8 = vadd.f32 1.0, %v6021_v7  ;;  %v8716_v7 = vld [vmem:[#allocation31_spill] sm:$0xff] }
 0x5c7   :  { %6022 = vtanh.f32 %v7245_v17 }
 0x5c8   :  { %6024 = vrcp.f32 %v1208_v8 }
 0x5d1   :  { %v6023_v53 = vpop.eup %6022 }
 0x5d2   :  { %v6025_v28 = vpop.eup %6024 }
 0x5d3   :  { %v1215_v31 = vmul.f32 %v6025_v28, %v6023_v53  ;;  %v8717_v53 = vld [vmem:[#allocation50_spill] sm:$0xff] }
 0x5d4   :  { %v7288_v28 = vld [vmem:[#allocation10 + $0xc] ss:$16 sps:$4 sm:$0xff]  }
 0x5d5   :  { %v7248_v32 = vpack.c.bf16 %v1215_v31, %v1215_v31  ;;  %v1224_v37 = vrot.slane %v1215_v31, %v8704_v34  ;;  %v1217_v38 = vcombine.high %v1215_v31, %v1215_v31 }
 0x5d7   :  { %1769 = vmatmul.mubr.bf16.vlgmr.msra.gmra.mrb[12].mxu0 %v7248_v32  ;;  %v1240_v43 = vrot.slane %v1224_v37, %v8704_v34  ;;  %v1232_v46 = vcombine.high %v1224_v37, %v1224_v37  ;;  %v1231_v18 = vrot.slane %v1217_v38, %v8704_v34 }
 0x5d8   :  { %5748 = vmatpush3.bf16.msra.mxu0 %v7103_v57 }
 0x5d9   :  { %v1269_v21 = vrot.slane %v1240_v43, %v6959_v39  ;;  %v1254_v41 = vrot.slane %v1232_v46, %v8704_v34  ;;  %v1262_v22 = vcombine.high %v1240_v43, %v1240_v43  ;;  %5749 = vmatprep.subr.bf16.mxu0 %v7109_v62  ;;  %v1247_v26 = vrot.slane %v1231_v18, %v8704_v34 }
 0x5da   :  { %v1233_v9 = vcombine.high %v1231_v18, %v1231_v18  ;;  %v8718_v18 = vld [vmem:[#allocation32_spill] sm:$0xff] }
 0x5db   :  { %v1306_v6 = vmul.f32 %v6962_v42, %v1269_v21  ;;  %v1273_v24 = vrot.slane %v1254_v41, %v6959_v39  ;;  %v1277_v4 = vrot.slane %v1262_v22, %v6959_v39  ;;  %v1285_v62 = vrot.slane %v1247_v26, %v6959_v39 }
 0x5dc   :  { %5750 = vmatpush3.bf16.msra.mxu0 %v7112_v55  ;;  %v1264_v3 = vcombine.high %v1254_v41, %v1254_v41  ;;  %v1261_v1 = vrot.slane %v1233_v9, %v8704_v34  ;;  %v1263_v36 = vcombine.high %v1247_v26, %v1247_v26 }
 0x5dd   :  { %1314 = vadd.xlane.f32.xlu1 %v1306_v6  ;;  %v1307_v57 = vmul.f32 %v6970_v50, %v1273_v24  ;;  %5751 = vmatprep.subr.bf16.mxu0 %v7118_v30  ;;  %v1308_v49 = vmul.f32 %v6967_v47, %v1277_v4  ;;  %v1310_v29 = vmul.f32 %v8705_v56, %v1285_v62  ;;  %v8707_v30 = vld [vmem:[#allocation43_spill] sm:$0xff] }
 0x5de   :  { %v1281_v55 = vrot.slane %v1264_v3, %v6959_v39  ;;  %v1289_v60 = vrot.slane %v1261_v1, %v6959_v39  ;;  %v1293_v59 = vrot.slane %v1263_v36, %v6959_v39  ;;  %v1265_v5 = vcombine.high %v1261_v1, %v1261_v1 }
 0x5df   :  { %1316 = vadd.xlane.f32.xlu0 %v1307_v57 }
 0x5e0   :  { %5752 = vmatpush3.bf16.msra.mxu0 %v7121_v2  ;;  %v1309_v61 = vmul.f32 %v8708_v51, %v1281_v55  ;;  %v8709_v2 = vld [vmem:[#allocation44_spill] sm:$0xff]  ;;  %v1311_v58 = vmul.f32 %v8711_v45, %v1289_v60  ;;  %v1312_v0 = vmul.f32 %v6990_v33, %v1293_v59  ;;  %v1297_v44 = vrot.slane %v1265_v5, %v6959_v39 }
 0x5e1   :  { %1318 = vadd.xlane.f32.xlu1 %v1308_v49  ;;  %5753 = vmatprep.subr.bf16.mxu0 %v7126_v40  ;;  %v8710_v40 = vld [vmem:[#allocation45_spill] sm:$0xff] }
 0x5e2   :  { %v1313_v8 = vmul.f32 %v8716_v7, %v1297_v44 }
 0x5e4   :  { %5754 = vmatpush3.bf16.msra.mxu0 %v8706_v52 }
 0x5e5   :  { %1322 = vadd.xlane.f32.xlu1 %v1310_v29  ;;  %5755 = vmatprep.subr.bf16.mxu0 %v8707_v30 }
 0x5e8   :  { %5756 = vmatpush3.bf16.msra.mxu0 %v8709_v2 }
 0x5e9   :  { %1320 = vadd.xlane.f32.xlu1 %v1309_v61  ;;  %5757 = vmatprep.subr.bf16.mxu0 %v8710_v40 }
 0x5ec   :  { %5758 = vmatpush3.bf16.msra.mxu0 %v8712_v54  ;;  %v8719_v54 = vld [vmem:[#allocation35_spill] sm:$0xff] }
 0x5ed   :  { %1324 = vadd.xlane.f32.xlu1 %v1311_v58  ;;  %5759 = vmatprep.subr.bf16.mxu0 %v8713_v35 }
 0x5f0   :  { %5760 = vmatpush3.bf16.msra.mxu0 %v8714_v13  ;;  %v8721_v13 = vld [vmem:[#allocation38_spill] sm:$0xff] }
 0x5f1   :  { %1326 = vadd.xlane.f32.xlu1 %v1312_v0  ;;  %5761 = vmatprep.subr.bf16.mxu0 %v8715_v63  ;;  %v8720_v0 = vld [vmem:[#allocation36_spill] sm:$0xff] }
 0x5f4   :  { %5762 = vmatpush3.bf16.msra.mxu0 %v8717_v53 }
 0x5f5   :  { %1328 = vadd.xlane.f32.xlu1 %v1313_v8  ;;  %2414 = vmatprep.subr.bf16.mxu0 %v7288_v28  ;;  %v8722_v8 = vld [vmem:[#allocation40_spill] sm:$0xff] }
 0x66a   :  { %v1315_v31 = vpop.xlane.xlu1 %1314 }
 0x66b   :  { %v1341_v41 = vrot.slane %v1315_v31, %v8718_v18 }
 0x66c   :  { %v1317_v43 = vpop.xlane.xlu0 %1316 }
 0x66d   :  { %v1345_v21 = vrot.slane %v1317_v43, %v8718_v18 }
 0x66e   :  { %v1319_v37 = vpop.xlane.xlu1 %1318 }
 0x66f   :  { %v1349_v22 = vrot.slane %v1319_v37, %v8718_v18  ;;  %v1370_v24 = vsel %vm630_vm0, %v1345_v21, %v1341_v41 }
 0x671   :  { %v1371_v26 = vsel %vm632_vm1, %v1349_v22, %v1370_v24  ;;  %v8723_v22 = vld [vmem:[#allocation37_spill] sm:$0xff] }
 0x672   :  { %v1323_v38 = vpop.xlane.xlu1 %1322 }
 0x673   :  { %v1357_v3 = vrot.slane %v1323_v38, %v8718_v18 }
 0x676   :  { %v1321_v46 = vpop.xlane.xlu1 %1320 }
 0x677   :  { %v1353_v4 = vrot.slane %v1321_v46, %v8718_v18 }
 0x679   :  { %v1372_v49 = vsel %vm634_vm2, %v1353_v4, %v1371_v26 }
 0x67a   :  { %v1325_v6 = vpop.xlane.xlu1 %1324  ;;  %v1373_v55 = vsel %vm636_vm3, %v1357_v3, %v1372_v49 }
 0x67b   :  { %v1361_v62 = vrot.slane %v1325_v6, %v8718_v18 }
 0x67d   :  { %v1374_v52 = vsel %vm638_vm4, %v1361_v62, %v1373_v55  ;;  %v8724_v55 = vld [vmem:[#allocation39_spill] sm:$0xff] }
 0x67e   :  { %v1327_v57 = vpop.xlane.xlu1 %1326 }
 0x67f   :  { %v1365_v9 = vrot.slane %v1327_v57, %v8718_v18 }
 0x681   :  { %v1375_v30 = vsel %vm640_vm5, %v1365_v9, %v1374_v52 }
 0x682   :  { %v1329_v29 = vpop.xlane.xlu1 %1328 }
 0x683   :  { %v1369_v1 = vrot.slane %v1329_v29, %v8718_v18 }
 0x685   :  { %v1376_v61 = vsel %vm642_vm6, %v1369_v1, %v1375_v30 }
 0x686   :  { %v1378_v60 = vsel %vm645_vm7, %v1376_v61, -inf }
 0x687   :  { %1379 = vmax.xlane.f32.xlu1 %v1378_v60  ;;  %v8725_v60 = vld [vmem:[#allocation41_spill] sm:$0xff] }
 0x6aa   :  { %v7307_v36 = vpop.f32.mrb[12].mxu0 }
 0x6ab   :  { %v7309_v2 = vpop.f32.mrb[13].mxu0 }
 0x6ac   :  { %v1774_v40 = vpop.f32.mrb[14].mxu0 }
 0x6ad   :  { %v1775_v58 = vpop.f32.mrb[15].mxu0 }
 0x714   :  { %v1380_v59 = vpop.xlane.xlu1 %1379 }
 0x715   :  { %v1385_v5 = vrot.slane %v1380_v59, %v6959_v39  ;;  %v1389_v35 = vrot.slane %v1380_v59, %v8719_v54  ;;  %v1393_v44 = vrot.slane %v1380_v59, %v8720_v0  ;;  %v1401_v63 = vrot.slane %v1380_v59, %v8721_v13 }
 0x716   :  { %v1409_v53 = vrot.slane %v1380_v59, %v8722_v8  ;;  %v1397_v24 = vrot.slane %v1380_v59, %v8723_v22  ;;  %v1405_v1 = vrot.slane %v1380_v59, %v8724_v55  ;;  %v1413_v40 = vrot.slane %v1380_v59, %v8725_v60 }
 0x717   :  { %v1423_v21 = vsub.f32 %v1317_v43, %v1389_v35  ;;  %v1422_v41 = vsub.f32 %v1315_v31, %v1385_v5  ;;  %v1426_v4 = vsub.f32 %v1323_v38, %v1401_v63  ;;  %v1424_v26 = vsub.f32 %v1319_v37, %v1393_v44 }
 0x718   :  { %v1428_v9 = vsub.f32 %v1327_v57, %v1409_v53  ;;  %v1425_v30 = vsub.f32 %v1321_v46, %v1397_v24  ;;  %v1427_v43 = vsub.f32 %v1325_v6, %v1405_v1  ;;  %v1429_v38 = vsub.f32 %v1329_v29, %v1413_v40 }
 0x719   :  { %v1432_v49 = vmul.f32 1.442695, %v1423_v21  ;;  %v1430_v62 = vmul.f32 1.442695, %v1422_v41  ;;  %v1438_v3 = vmul.f32 1.442695, %v1426_v4 }
 0x71a   :  { %v1434_v52 = vmul.f32 1.442695, %v1424_v26  ;;  %v1442_v61 = vmul.f32 1.442695, %v1428_v9  ;;  %v1436_v31 = vmul.f32 1.442695, %v1425_v30 }
 0x71b   :  { %6026 = vpow2.f32 %v1432_v49  ;;  %v1440_v37 = vmul.f32 1.442695, %v1427_v43  ;;  %v1444_v57 = vmul.f32 1.442695, %v1429_v38 }
 0x71c   :  { %6028 = vpow2.f32 %v1430_v62 }
 0x71d   :  { %6030 = vpow2.f32 %v1438_v3 }
 0x71e   :  { %6032 = vpow2.f32 %v1434_v52 }
 0x71f   :  { %6034 = vpow2.f32 %v1442_v61 }
 0x720   :  { %6036 = vpow2.f32 %v1436_v31 }
 0x721   :  { %6038 = vpow2.f32 %v1440_v37 }
 0x722   :  { %6040 = vpow2.f32 %v1444_v57 }
 0x725   :  { %v6027_v58 = vpop.eup %6026 }
 0x726   :  { %v6029_v5 = vpop.eup %6028  ;;  %1458 = vperm.xlu0 %5895, %v6027_v58  }
 0x727   :  { %1455 = vperm.xlu1 %5894, %v6029_v5   ;;  %v7319_v35 = vpop.eup %6030 }
 0x728   :  { %v6033_v46 = vpop.eup %6032 }
 0x729   :  { %v7322_v59 = vpop.eup %6034 }
 0x72a   :  { %1467 = vperm.xlu0 %5895, %v7319_v35   ;;  %v6037_v6 = vpop.eup %6036 }
 0x72b   :  { %1461 = vperm.xlu1 %5894, %v6033_v46   ;;  %v6039_v29 = vpop.eup %6038 }
 0x72c   :  { %v7325_v44 = vpop.eup %6040 }
 0x72e   :  { %1473 = vperm.xlu0 %5895, %v7322_v59  }
 0x72f   :  { %1464 = vperm.xlu1 %5894, %v6037_v6  }
 0x733   :  { %1470 = vperm.xlu1 %5894, %v6039_v29  }
 0x737   :  { %1476 = vperm.xlu1 %5894, %v7325_v44  }
 0x7a5   :  { %v1459_v53 = vpop.permute.xlu0 %1458 }
 0x7a6   :  { %v1456_v63 = vpop.permute.xlu1 %1455  ;;  %v1485_v41 = vrot.slane %v1459_v53, %v8718_v18 }
 0x7a7   :  { %v1481_v24 = vrot.slane %v1456_v63, %v8718_v18 }
 0x7a9   :  { %v1468_v26 = vpop.permute.xlu0 %1467  ;;  %v1510_v62 = vsel %vm630_vm0, %v1485_v41, %v1481_v24 }
 0x7aa   :  { %v1462_v21 = vpop.permute.xlu1 %1461  ;;  %v1497_v52 = vrot.slane %v1468_v26, %v8718_v18 }
 0x7ab   :  { %v1489_v4 = vrot.slane %v1462_v21, %v8718_v18 }
 0x7ad   :  { %v1511_v9 = vsel %vm632_vm1, %v1489_v4, %v1510_v62  ;;  %v1474_v61 = vpop.permute.xlu0 %1473 }
 0x7ae   :  { %v1465_v49 = vpop.permute.xlu1 %1464  ;;  %v1505_v37 = vrot.slane %v1474_v61, %v8718_v18 }
 0x7af   :  { %v1493_v3 = vrot.slane %v1465_v49, %v8718_v18 }
 0x7b1   :  { %v1512_v1 = vsel %vm634_vm2, %v1493_v3, %v1511_v9 }
 0x7b2   :  { %v1471_v30 = vpop.permute.xlu1 %1470  ;;  %v1513_v31 = vsel %vm636_vm3, %v1497_v52, %v1512_v1 }
 0x7b3   :  { %v1501_v40 = vrot.slane %v1471_v30, %v8718_v18 }
 0x7b5   :  { %v1514_v43 = vsel %vm638_vm4, %v1501_v40, %v1513_v31 }
 0x7b6   :  { %v1477_v38 = vpop.permute.xlu1 %1476  ;;  %v1515_v63 = vsel %vm640_vm5, %v1505_v37, %v1514_v43 }
 0x7b7   :  { %v1509_v57 = vrot.slane %v1477_v38, %v8718_v18 }
 0x7b9   :  { %v1516_v53 = vsel %vm642_vm6, %v1509_v57, %v1515_v63 }
 0x7ba   :  { %v1518_v21 = vsel %vm645_vm7, %v1516_v53, 0.0 }
 0x7bb   :  { %1519 = vadd.xlane.f32.xlu0 %v1518_v21 }
 0x848   :  { %v1520_v41 = vpop.xlane.xlu0 %1519 }
 0x849   :  { %v1525_v24 = vrot.slane %v1520_v41, %v6959_v39  ;;  %v1529_v4 = vrot.slane %v1520_v41, %v8719_v54  ;;  %v1533_v26 = vrot.slane %v1520_v41, %v8720_v0  ;;  %v1537_v49 = vrot.slane %v1520_v41, %v8723_v22 }
 0x84a   :  { %v1541_v3 = vrot.slane %v1520_v41, %v8721_v13  ;;  %v1545_v52 = vrot.slane %v1520_v41, %v8724_v55  ;;  %v1549_v40 = vrot.slane %v1520_v41, %v8722_v8  ;;  %v1553_v37 = vrot.slane %v1520_v41, %v8725_v60 }
 0x84b   :  { %6042 = vrcp.f32 %v1525_v24 }
 0x84c   :  { %6044 = vrcp.f32 %v1529_v4 }
 0x84d   :  { %6046 = vrcp.f32 %v1533_v26 }
 0x84e   :  { %6048 = vrcp.f32 %v1537_v49 }
 0x84f   :  { %6050 = vrcp.f32 %v1541_v3 }
 0x850   :  { %6052 = vrcp.f32 %v1545_v52 }
 0x851   :  { %6054 = vrcp.f32 %v1549_v40 }
 0x852   :  { %6056 = vrcp.f32 %v1553_v37 }
 0x855   :  { %v6043_v62 = vpop.eup %6042 }
 0x856   :  { %v1563_v9 = vmul.f32 %v6043_v62, %v6029_v5  ;;  %v6045_v1 = vpop.eup %6044 }
 0x857   :  { %v1565_v30 = vmul.f32 %v6045_v1, %v6027_v58  ;;  %v6047_v61 = vpop.eup %6046 }
 0x858   :  { %1580 = vperm.xlu1 %5894, %v1563_v9   ;;  %v1567_v31 = vmul.f32 %v6047_v61, %v6033_v46  ;;  %v6049_v43 = vpop.eup %6048 }
 0x859   :  { %v1569_v38 = vmul.f32 %v6049_v43, %v6037_v6  ;;  %v6051_v57 = vpop.eup %6050 }
 0x85a   :  { %v1571_v5 = vmul.f32 %v6051_v57, %v7319_v35  ;;  %v6053_v63 = vpop.eup %6052 }
 0x85b   :  { %v1573_v58 = vmul.f32 %v6053_v63, %v6039_v29  ;;  %v6055_v53 = vpop.eup %6054 }
 0x85c   :  { %1585 = vperm.xlu1 %5894, %v1565_v30   ;;  %v1575_v21 = vmul.f32 %v6055_v53, %v7322_v59  ;;  %v6057_v24 = vpop.eup %6056 }
 0x85d   :  { %v1577_v46 = vmul.f32 %v6057_v24, %v7325_v44 }
 0x860   :  { %1590 = vperm.xlu1 %5894, %v1567_v31  }
 0x864   :  { %1595 = vperm.xlu1 %5894, %v1569_v38  }
 0x868   :  { %1600 = vperm.xlu1 %5894, %v1571_v5  }
 0x86c   :  { %1605 = vperm.xlu1 %5894, %v1573_v58  }
 0x870   :  { %1610 = vperm.xlu1 %5894, %v1575_v21  }
 0x874   :  { %1615 = vperm.xlu1 %5894, %v1577_v46  }
 0x8d7   :  { %v1581_v4 = vpop.permute.xlu1 %1580 }
 0x8d8   :  { %v1618_v35 = vmul.f32 %v6962_v42, %v1581_v4 }
 0x8da   :  { %v1626_v59 = vrot.slane %v1618_v35, 4 }
 0x8db   :  { %v1586_v41 = vpop.permute.xlu1 %1585 }
 0x8dc   :  { %v1619_v26 = vmul.f32 %v6970_v50, %v1586_v41  ;;  %v1627_v40 = vadd.f32 %v1626_v59, %v1618_v35 }
 0x8de   :  { %v1632_v29 = vrot.slane %v1619_v26, 4  ;;  %v1628_v58 = vrot.slane %v1627_v40, 2 }
 0x8df   :  { %v1591_v6 = vpop.permute.xlu1 %1590 }
 0x8e0   :  { %v1620_v49 = vmul.f32 %v6967_v47, %v1591_v6  ;;  %v1633_v30 = vadd.f32 %v1632_v29, %v1619_v26 }
 0x8e2   :  { %v1638_v9 = vrot.slane %v1620_v49, 4  ;;  %v1634_v38 = vrot.slane %v1633_v30, 2 }
 0x8e3   :  { %v1596_v62 = vpop.permute.xlu1 %1595 }
 0x8e4   :  { %v1621_v3 = vmul.f32 %v8708_v51, %v1596_v62  ;;  %v1639_v61 = vadd.f32 %v1638_v9, %v1620_v49  ;;  %v1635_v4 = vadd.f32 %v1634_v38, %v1633_v30  ;;  %v1629_v49 = vadd.f32 %v1628_v58, %v1627_v40 }
 0x8e6   :  { %v1644_v1 = vrot.slane %v1621_v3, 4  ;;  %v1640_v63 = vrot.slane %v1639_v61, 2  ;;  %v1636_v59 = vrot.slane %v1635_v4, 1 }
 0x8e7   :  { %v1601_v52 = vpop.permute.xlu1 %1600 }
 0x8e8   :  { %v1622_v44 = vmul.f32 %v8705_v56, %v1601_v52  ;;  %v1645_v31 = vadd.f32 %v1644_v1, %v1621_v3  ;;  %v1641_v26 = vadd.f32 %v1640_v63, %v1639_v61 }
 0x8ea   :  { %v1650_v43 = vrot.slane %v1622_v44, 4  ;;  %v1646_v53 = vrot.slane %v1645_v31, 2 }
 0x8eb   :  { %v1606_v37 = vpop.permute.xlu1 %1605 }
 0x8ec   :  { %v1651_v57 = vadd.f32 %v1650_v43, %v1622_v44  ;;  %v1623_v5 = vmul.f32 %v8711_v45, %v1606_v37  ;;  %v1647_v35 = vadd.f32 %v1646_v53, %v1645_v31  ;;  %v1642_v43 = vrot.slane %v1641_v26, 1 }
 0x8ed   :  { %v1630_v37 = vrot.slane %v1629_v49, 1 }
 0x8ee   :  { %v1656_v21 = vrot.slane %v1623_v5, 4  ;;  %v1652_v24 = vrot.slane %v1651_v57, 2  ;;  %v1648_v8 = vrot.slane %v1647_v35, 1  ;;  %v1643_v31 = vadd.f32 %v1642_v43, %v1641_v26  ;;  %v7394_v43 = vld [vmem:[#allocation10 + $0x88] ss:$16 sps:$4 sm:$0xff]  }
 0x8ef   :  { %v1611_v46 = vpop.permute.xlu1 %1610  ;;  %v1631_v63 = vadd.f32 %v1630_v37, %v1629_v49  ;;  %v7397_v37 = vld [vmem:[#allocation10 + $0xac] ss:$16 sps:$4 sm:$0xff]  }
 0x8f0   :  { %v1657_v41 = vadd.f32 %v1656_v21, %v1623_v5  ;;  %v1624_v6 = vmul.f32 %v6990_v33, %v1611_v46  ;;  %v1653_v3 = vadd.f32 %v1652_v24, %v1651_v57  ;;  %v1637_v5 = vadd.f32 %v1636_v59, %v1635_v4  ;;  %v7376_v59 = vld [vmem:[#allocation10 + $0x28] ss:$16 sps:$4 sm:$0xff]  }
 0x8f1   :  { %v1649_v58 = vadd.f32 %v1648_v8, %v1647_v35 }
 0x8f2   :  { %v1658_v62 = vrot.slane %v1657_v41, 2  ;;  %v1662_v29 = vrot.slane %v1624_v6, 4  ;;  %v1654_v38 = vrot.slane %v1653_v3, 1  ;;  %v1682_v46 = vsel %vm630_vm0, %v1637_v5, %v1631_v63  ;;  %v7406_v5 = vld [vmem:[#allocation10 + $0xc8] ss:$16 sps:$4 sm:$0xff]  }
 0x8f3   :  { %v1616_v9 = vpop.permute.xlu1 %1615 }
 0x8f4   :  { %v1659_v1 = vadd.f32 %v1658_v62, %v1657_v41  ;;  %v1663_v52 = vadd.f32 %v1662_v29, %v1624_v6  ;;  %v1625_v44 = vmul.f32 %v8716_v7, %v1616_v9  ;;  %v1655_v24 = vadd.f32 %v1654_v38, %v1653_v3  ;;  %v7373_v3 = vld [vmem:[#allocation10 + $0x2c] ss:$16 sps:$4 sm:$0xff]  }
 0x8f5   :  { %v1683_v62 = vsel %vm632_vm1, %v1643_v31, %v1682_v46  ;;  %v7403_v38 = vld [vmem:[#allocation10 + $0xcc] ss:$16 sps:$4 sm:$0xff]  }
 0x8f6   :  { %v1664_v60 = vrot.slane %v1663_v52, 2  ;;  %v1668_v30 = vrot.slane %v1625_v44, 4  ;;  %v1660_v21 = vrot.slane %v1659_v1, 1  ;;  %v1684_v9 = vsel %vm634_vm2, %v1649_v58, %v1683_v62 }
 0x8f7   :  { %v1685_v4 = vsel %vm636_vm3, %v1655_v24, %v1684_v9 }
 0x8f8   :  { %v1665_v61 = vadd.f32 %v1664_v60, %v1663_v52  ;;  %v1669_v40 = vadd.f32 %v1668_v30, %v1625_v44  ;;  %v1661_v41 = vadd.f32 %v1660_v21, %v1659_v1  ;;  %v7382_v1 = vld [vmem:[#allocation10 + $0x48] ss:$16 sps:$4 sm:$0xff]   ;;  %v7385_v52 = vld [vmem:[#allocation10 + $0x6c] ss:$16 sps:$4 sm:$0xff]  }
 0x8f9   :  { %v7391_v44 = vld [vmem:[#allocation10 + $0x8c] ss:$16 sps:$4 sm:$0xff]   ;;  %v7400_v30 = vld [vmem:[#allocation10 + $0xa8] ss:$16 sps:$4 sm:$0xff]  }
 0x8fa   :  { %v1666_v57 = vrot.slane %v1665_v61, 1  ;;  %v1670_v53 = vrot.slane %v1669_v40, 2  ;;  %v1686_v26 = vsel %vm638_vm4, %v1661_v41, %v1685_v4  ;;  %v7409_v21 = vld [vmem:[#allocation10 + $0xec] ss:$16 sps:$4 sm:$0xff]  }
 0x8fc   :  { %v1671_v6 = vadd.f32 %v1670_v53, %v1669_v40  ;;  %v1667_v29 = vadd.f32 %v1666_v57, %v1665_v61  ;;  %v7412_v61 = vld [vmem:[#allocation10 + $0xe8] ss:$16 sps:$4 sm:$0xff]  }
 0x8fe   :  { %v1672_v13 = vrot.slane %v1671_v6, 1  ;;  %v1687_v8 = vsel %vm640_vm5, %v1667_v29, %v1686_v26  ;;  %v1820_v29 = vld [vmem:[#allocation4 + $0x28] sm:$0xff] }
 0x900   :  { %v1673_v60 = vadd.f32 %v1672_v13, %v1671_v6  ;;  %v7379_v13 = vld [vmem:[#allocation10 + $0x4c] ss:$16 sps:$4 sm:$0xff]  }
 0x902   :  { %v1688_v49 = vsel %vm642_vm6, %v1673_v60, %v1687_v8  ;;  %v1823_v60 = vunpack.c.l.bf16 %v1820_v29  ;;  %v1824_v8 = vunpack.c.h.bf16 %v1820_v29 }
 0x903   :  { %v1691_v35 = vpack.c.bf16 %v1688_v49, %v1688_v49 }
 0x905   :  { %1724 = vmatprep.mubr.bf16.mxu1 %v1691_v35 }
 0x906   :  { %1725 = vmatmul.mubr.bf16.vlgmr.msra.gmra.mrb[8].mxu1 %v7248_v32 }
 0x907   :  { %1778 = vmatpush1.bf16.msra.mxu1 %v7185_v12  ;;  %1809 = vmatprep.mubr.bf16.mxu1 %v8699_v48  ;;  %v7388_v12 = vld [vmem:[#allocation10 + $0x68] ss:$16 sps:$4 sm:$0xff]  }
 0x908   :  { %1779 = vmatprep.subr.bf16.mxu1 %v7373_v3 }
 0x90b   :  { %1780 = vmatpush1.bf16.msra.mxu1 %v7376_v59 }
 0x90c   :  { %1781 = vmatprep.subr.bf16.mxu1 %v7379_v13 }
 0x90f   :  { %1782 = vmatpush1.bf16.msra.mxu1 %v7382_v1 }
 0x910   :  { %1783 = vmatprep.subr.bf16.mxu1 %v7385_v52 }
 0x913   :  { %1784 = vmatpush1.bf16.msra.mxu1 %v7388_v12 }
 0x914   :  { %1785 = vmatprep.subr.bf16.mxu1 %v7391_v44 }
 0x917   :  { %1786 = vmatpush1.bf16.msra.mxu1 %v7394_v43 }
 0x918   :  { %1787 = vmatprep.subr.bf16.mxu1 %v7397_v37 }
 0x91b   :  { %1788 = vmatpush1.bf16.msra.mxu1 %v7400_v30 }
 0x91c   :  { %1789 = vmatprep.subr.bf16.mxu1 %v7403_v38 }
 0x91f   :  { %1790 = vmatpush1.bf16.msra.mxu1 %v7406_v5 }
 0x920   :  { %1791 = vmatprep.subr.bf16.mxu1 %v7409_v21 }
 0x923   :  { %1792 = vmatpush1.bf16.msra.mxu1 %v7412_v61 }
 0x924   :  { %2373 = vmatprep.subr.bf16.mxu1 %v7203_v10  ;;  %v7427_v10 = vld [vmem:[#allocation10 + $0xa4] ss:$16 sps:$4 sm:$0xff]  }
 0x926   :  { %1810 = vmatmul.mubr.bf16.vlgmr.msra.gmra.mrb[12].mxu1 %v7248_v32 }
 0x927   :  { %2374 = vmatpush1.bf16.msra.mxu1 %v7207_v11  ;;  %2405 = vmatprep.mubr.bf16.mxu1 %v8699_v48  ;;  %v7430_v11 = vld [vmem:[#allocation10 + $0xa0] ss:$16 sps:$4 sm:$0xff]  }
 0x928   :  { %2375 = vmatprep.subr.bf16.mxu1 %v7211_v14  ;;  %v7433_v14 = vld [vmem:[#allocation10 + $0xc4] ss:$16 sps:$4 sm:$0xff]  }
 0x92b   :  { %2376 = vmatpush1.bf16.msra.mxu1 %v7214_v15  ;;  %v7436_v15 = vld [vmem:[#allocation10 + $0xc0] ss:$16 sps:$4 sm:$0xff]  }
 0x92c   :  { %2377 = vmatprep.subr.bf16.mxu1 %v7217_v16  ;;  %8726 = vst [vmem:[#allocation25_spill] sm:$0xff] %v7436_v15  ;;  %v7439_v16 = vld [vmem:[#allocation10 + $0xe4] ss:$16 sps:$4 sm:$0xff]  }
 0x92d   :  { %8727 = vst [vmem:[#allocation34_spill] sm:$0xff] %v7439_v16 }
 0x92f   :  { %2378 = vmatpush1.bf16.msra.mxu1 %v7220_v19  ;;  %v7442_v19 = vld [vmem:[#allocation10 + $0xe0] ss:$16 sps:$4 sm:$0xff]  }
 0x930   :  { %2379 = vmatprep.subr.bf16.mxu1 %v7223_v20  ;;  %8728 = vst [vmem:[#allocation33_spill] sm:$0xff] %v7442_v19  ;;  %v7445_v20 = vld [vmem:[#allocation13 + $0x40] sm:$0xff]  }
 0x931   :  { %8729 = vst [vmem:[#allocation26_spill] sm:$0xff] %v7445_v20 }
 0x933   :  { %2380 = vmatpush1.bf16.msra.mxu1 %v7226_v23 }
 0x934   :  { %2381 = vmatprep.subr.bf16.mxu1 %v7229_v25  ;;  %v1819_v25 = vld [vmem:[#allocation4 + $0x20] sm:$0xff] }
 0x935   :  { %v1822_v63 = vunpack.c.h.bf16 %v1819_v25  ;;  %v1821_v58 = vunpack.c.l.bf16 %v1819_v25 }
 0x937   :  { %2382 = vmatpush1.bf16.msra.mxu1 %v7232_v27  ;;  %v1826_v57 = vadd.f32 %v1822_v63, %v7309_v2  ;;  %v1825_v53 = vadd.f32 %v1821_v58, %v7307_v36 }
 0x938   :  { %2383 = vmatprep.subr.bf16.mxu1 %v7427_v10 }
 0x939   :  { %v5667_v24 = vmul.f32 -1.442695, %v1826_v57  ;;  %v5666_v46 = vmul.f32 -1.442695, %v1825_v53 }
 0x93b   :  { %2384 = vmatpush1.bf16.msra.mxu1 %v7430_v11 }
 0x93c   :  { %2385 = vmatprep.subr.bf16.mxu1 %v7433_v14 }
 0x93f   :  { %2386 = vmatpush1.bf16.msra.mxu1 %v7436_v15 }
 0x940   :  { %2387 = vmatprep.subr.bf16.mxu1 %v7439_v16 }
 0x943   :  { %2388 = vmatpush1.bf16.msra.mxu1 %v7442_v19 }
 0x944   :  { %5769 = vmatprep.subr.bf16.mxu1 %v7445_v20 }
 0x9d9   :  { %v5741_v23 = vpop.f32.mrb[8].mxu1 }
 0x9da   :  { %v5742_v27 = vpop.f32.mrb[9].mxu1 }
 0x9db   :  { %v5743_v32 = vadd.f32 %v5742_v27, %v5741_v23  ;;  %v5744_v40 = vpop.f32.mrb[10].mxu1 }
 0x9dc   :  { %v5745_v31 = vpop.f32.mrb[11].mxu1 }
 0x9dd   :  { %6058 = vtanh.f32 %v5743_v32 }
 0x9de   :  { %6060 = vpow2.f32 %v5667_v24 }
 0x9df   :  { %6062 = vpow2.f32 %v5666_v46 }
 0x9e7   :  { %v6059_v41 = vpop.eup %6058 }
 0x9e8   :  { %v1733_v6 = vpack.c.bf16 %v6059_v41, %v6059_v41  ;;  %v6061_v62 = vpop.eup %6060 }
 0x9e9   :  { %v6063_v9 = vpop.eup %6062  ;;  %v1838_v4 = vadd.f32 1.0, %v6061_v62 }
 0x9ea   :  { %1735 = vst [vmem:[#allocation15 + $0x4] sm:$0xf] %v1733_v6  ;;  %v1832_v26 = vadd.f32 1.0, %v6063_v9 }
 0x9eb   :  { %6064 = vrcp.f32 %v1838_v4 }
 0x9ec   :  { %6066 = vrcp.f32 %v1832_v26  ;;  %v7460_v26 = vld [vmem:[#allocation13] sm:$0xff]  }
 0x9ed   :  { %8731 = vst [vmem:[#allocation42_spill] sm:$0xff] %v7460_v26 }
 0x9f5   :  { %v6065_v32 = vpop.eup %6064 }
 0x9f6   :  { %v6067_v40 = vpop.eup %6066  ;;  %v1848_v63 = vmul.f32 %v6065_v32, %v7245_v17  ;;  %v7472_v32 = vld [vmem:[#allocation13 + $0x8] sm:$0xff]  }
 0x9f7   :  { %8733 = vst [vmem:[#allocation28_spill] sm:$0xff] %v7472_v32 }
 0x9f9   :  { %v1811_v49 = vpop.f32.mrb[12].mxu1 }
 0x9fa   :  { %v1827_v35 = vadd.f32 %v1823_v60, %v1811_v49  ;;  %v1813_v2 = vpop.f32.mrb[13].mxu1 }
 0x9fb   :  { %v1828_v36 = vadd.f32 %v1824_v8, %v1813_v2  ;;  %v1815_v23 = vpop.f32.mrb[14].mxu1  ;;  %v7465_v2 = vld [vmem:[#allocation13 + $0x48] sm:$0xff]  }
 0x9fc   :  { %6068 = vtanh.f32 %v1827_v35  ;;  %v1816_v25 = vpop.f32.mrb[15].mxu1  ;;  %8732 = vst [vmem:[#allocation43_spill] sm:$0xff] %v7465_v2 }
 0x9fd   :  { %v5668_v27 = vmul.f32 -1.442695, %v1828_v36 }
 0x9ff   :  { %6070 = vpow2.f32 %v5668_v27 }
 0xa06   :  { %v6069_v31 = vpop.eup %6068 }
 0xa07   :  { %v1849_v58 = vmul.f32 %v6069_v31, %v6067_v40  ;;  %v7476_v31 = vld [vmem:[#allocation13 + $0x50] sm:$0xff]  }
 0xa08   :  { %8734 = vst [vmem:[#allocation44_spill] sm:$0xff] %v7476_v31 }
 0xa09   :  { %v6071_v57 = vpop.eup %6070  ;;  %v7451_v53 = vadd.f32 %v1849_v58, %v1848_v63 }
 0xa0a   :  { %v1845_v24 = vadd.f32 1.0, %v6071_v57 }
 0xa0b   :  { %8730 = vst [vmem:[#allocation29_spill] sm:$0xff] %v7451_v53  ;;  %6072 = vtanh.f32 %v7451_v53 }
 0xa0c   :  { %6074 = vrcp.f32 %v1845_v24 }
 0xa15   :  { %v6073_v46 = vpop.eup %6072 }
 0xa16   :  { %v6075_v41 = vpop.eup %6074 }
 0xa17   :  { %v1852_v6 = vmul.f32 %v6075_v41, %v6073_v46  ;;  %v7481_v46 = vld [vmem:[#allocation13 + $0x10] sm:$0xff]   ;;  %v7484_v41 = vld [vmem:[#allocation13 + $0x58] sm:$0xff]  }
 0xa18   :  { %8735 = vst [vmem:[#allocation45_spill] sm:$0xff] %v7481_v46  ;;  %8736 = vst [vmem:[#allocation30_spill] sm:$0xff] %v7484_v41 }
 0xa19   :  { %v7454_v62 = vpack.c.bf16 %v1852_v6, %v1852_v6  ;;  %v1861_v29 = vrot.slane %v1852_v6, %v8704_v34  ;;  %v1854_v9 = vcombine.high %v1852_v6, %v1852_v6 }
 0xa1b   :  { %2406 = vmatmul.mubr.bf16.vlgmr.msra.gmra.mrb[16].mxu1 %v7454_v62  ;;  %v1877_v17 = vrot.slane %v1861_v29, %v8704_v34  ;;  %v1869_v4 = vcombine.high %v1861_v29, %v1861_v29  ;;  %v1868_v60 = vrot.slane %v1854_v9, %v8704_v34 }
 0xa1c   :  { %5770 = vmatpush3.bf16.msra.mxu1 %v7460_v26 }
 0xa1d   :  { %v1906_v8 = vrot.slane %v1877_v17, %v6959_v39  ;;  %v1891_v49 = vrot.slane %v1869_v4, %v8704_v34  ;;  %v1899_v35 = vcombine.high %v1877_v17, %v1877_v17  ;;  %5771 = vmatprep.subr.bf16.mxu1 %v7465_v2  ;;  %v1884_v27 = vrot.slane %v1868_v60, %v8704_v34  ;;  %v7490_v17 = vld [vmem:[#allocation13 + $0x18] sm:$0xff]   ;;  %v7493_v4 = vld [vmem:[#allocation13 + $0x60] sm:$0xff]  }
 0xa1e   :  { %v1870_v24 = vcombine.high %v1868_v60, %v1868_v60  ;;  %8737 = vst [vmem:[#allocation46_spill] sm:$0xff] %v7490_v17  ;;  %8738 = vst [vmem:[#allocation47_spill] sm:$0xff] %v7493_v4 }
 0xa1f   :  { %v1943_v36 = vmul.f32 %v6962_v42, %v1906_v8  ;;  %v1910_v23 = vrot.slane %v1891_v49, %v6959_v39  ;;  %v1914_v25 = vrot.slane %v1899_v35, %v6959_v39  ;;  %v1922_v58 = vrot.slane %v1884_v27, %v6959_v39  ;;  %v7498_v35 = vld [vmem:[#allocation13 + $0x20] sm:$0xff]  }
 0xa20   :  { %5772 = vmatpush3.bf16.msra.mxu1 %v7472_v32  ;;  %v1901_v57 = vcombine.high %v1891_v49, %v1891_v49  ;;  %v1898_v9 = vrot.slane %v1870_v24, %v8704_v34  ;;  %v1900_v49 = vcombine.high %v1884_v27, %v1884_v27  ;;  %8739 = vst [vmem:[#allocation48_spill] sm:$0xff] %v7498_v35  ;;  %v7509_v27 = vld [vmem:[#allocation13 + $0x70] sm:$0xff]  }
 0xa21   :  { %1951 = vadd.xlane.f32.xlu0 %v1943_v36  ;;  %v1944_v40 = vmul.f32 %v6970_v50, %v1910_v23  ;;  %5773 = vmatprep.subr.bf16.mxu1 %v7476_v31  ;;  %v1945_v63 = vmul.f32 %v6967_v47, %v1914_v25  ;;  %v1947_v6 = vmul.f32 %v8705_v56, %v1922_v58  ;;  %v7501_v36 = vld [vmem:[#allocation13 + $0x68] sm:$0xff]   ;;  %v7514_v24 = vld [vmem:[#allocation13 + $0x30] sm:$0xff]  }
 0xa22   :  { %v1918_v29 = vrot.slane %v1901_v57, %v6959_v39  ;;  %v1926_v8 = vrot.slane %v1898_v9, %v6959_v39  ;;  %8740 = vst [vmem:[#allocation49_spill] sm:$0xff] %v7501_v36  ;;  %v1930_v25 = vrot.slane %v1900_v49, %v6959_v39  ;;  %8742 = vst [vmem:[#allocation50_spill] sm:$0xff] %v7509_v27 }
 0xa23   :  { %1953 = vadd.xlane.f32.xlu1 %v1944_v40  ;;  %v1902_v40 = vcombine.high %v1898_v9, %v1898_v9  ;;  %8743 = vst [vmem:[#allocation32_spill] sm:$0xff] %v7514_v24  ;;  %v7521_v9 = vld [vmem:[#allocation13 + $0x38] sm:$0xff]  }
 0xa24   :  { %5774 = vmatpush3.bf16.msra.mxu1 %v7481_v46  ;;  %v1946_v60 = vmul.f32 %v8708_v51, %v1918_v29  ;;  %v1948_v23 = vmul.f32 %v8711_v45, %v1926_v8  ;;  %v1949_v58 = vmul.f32 %v6990_v33, %v1930_v25  ;;  %8745 = vst [vmem:[#allocation36_spill] sm:$0xff] %v7521_v9 }
 0xa25   :  { %1955 = vadd.xlane.f32.xlu0 %v1945_v63  ;;  %5775 = vmatprep.subr.bf16.mxu1 %v7484_v41  ;;  %v7506_v63 = vld [vmem:[#allocation13 + $0x28] sm:$0xff]   ;;  %v1934_v57 = vrot.slane %v1902_v40, %v6959_v39 }
 0xa26   :  { %8741 = vst [vmem:[#allocation31_spill] sm:$0xff] %v7506_v63 }
 0xa27   :  { %v1950_v29 = vmul.f32 %v8716_v7, %v1934_v57 }
 0xa28   :  { %5776 = vmatpush3.bf16.msra.mxu1 %v7490_v17 }
 0xa29   :  { %1959 = vadd.xlane.f32.xlu0 %v1947_v6  ;;  %5777 = vmatprep.subr.bf16.mxu1 %v7493_v4  ;;  %v7517_v6 = vld [vmem:[#allocation13 + $0x78] sm:$0xff]  }
 0xa2a   :  { %8744 = vst [vmem:[#allocation35_spill] sm:$0xff] %v7517_v6 }
 0xa2c   :  { %5778 = vmatpush3.bf16.msra.mxu1 %v7498_v35 }
 0xa2d   :  { %1957 = vadd.xlane.f32.xlu0 %v1946_v60  ;;  %5779 = vmatprep.subr.bf16.mxu1 %v7501_v36 }
 0xa30   :  { %5780 = vmatpush3.bf16.msra.mxu1 %v7506_v63 }
 0xa31   :  { %1961 = vadd.xlane.f32.xlu0 %v1948_v23  ;;  %5781 = vmatprep.subr.bf16.mxu1 %v7509_v27 }
 0xa34   :  { %5782 = vmatpush3.bf16.msra.mxu1 %v7514_v24 }
 0xa35   :  { %1963 = vadd.xlane.f32.xlu0 %v1949_v58  ;;  %5783 = vmatprep.subr.bf16.mxu1 %v7517_v6 }
 0xa38   :  { %5784 = vmatpush3.bf16.msra.mxu1 %v7521_v9 }
 0xa39   :  { %1965 = vadd.xlane.f32.xlu0 %v1950_v29  ;;  %3051 = vmatprep.subr.bf16.mxu1 %v7288_v28 }
 0xaae   :  { %v1952_v60 = vpop.xlane.xlu0 %1951 }
 0xaaf   :  { %v1978_v58 = vrot.slane %v1952_v60, %v8718_v18 }
 0xab0   :  { %v1954_v23 = vpop.xlane.xlu1 %1953 }
 0xab1   :  { %v1982_v40 = vrot.slane %v1954_v23, %v8718_v18 }
 0xab2   :  { %v1956_v8 = vpop.xlane.xlu0 %1955 }
 0xab3   :  { %v1986_v6 = vrot.slane %v1956_v8, %v8718_v18  ;;  %v2007_v57 = vsel %vm630_vm0, %v1982_v40, %v1978_v58 }
 0xab5   :  { %v2008_v29 = vsel %vm632_vm1, %v1986_v6, %v2007_v57 }
 0xab6   :  { %v1960_v49 = vpop.xlane.xlu0 %1959 }
 0xab7   :  { %v1994_v36 = vrot.slane %v1960_v49, %v8718_v18 }
 0xaba   :  { %v1958_v25 = vpop.xlane.xlu0 %1957 }
 0xabb   :  { %v1990_v27 = vrot.slane %v1958_v25, %v8718_v18 }
 0xabd   :  { %v2009_v28 = vsel %vm634_vm2, %v1990_v27, %v2008_v29 }
 0xabe   :  { %v1962_v24 = vpop.xlane.xlu0 %1961  ;;  %v2010_v17 = vsel %vm636_vm3, %v1994_v36, %v2009_v28 }
 0xabf   :  { %v1998_v63 = vrot.slane %v1962_v24, %v8718_v18 }
 0xac1   :  { %v2011_v40 = vsel %vm638_vm4, %v1998_v63, %v2010_v17 }
 0xac2   :  { %v1964_v9 = vpop.xlane.xlu0 %1963 }
 0xac3   :  { %v2002_v35 = vrot.slane %v1964_v9, %v8718_v18 }
 0xac5   :  { %v2012_v58 = vsel %vm640_vm5, %v2002_v35, %v2011_v40 }
 0xac6   :  { %v1966_v4 = vpop.xlane.xlu0 %1965 }
 0xac7   :  { %v2006_v41 = vrot.slane %v1966_v4, %v8718_v18 }
 0xac9   :  { %v2013_v6 = vsel %vm642_vm6, %v2006_v41, %v2012_v58 }
 0xaca   :  { %v2015_v57 = vsel %vm645_vm7, %v2013_v6, -inf  ;;  %v8748_v6 = vld [vmem:[#allocation38_spill] sm:$0xff] }
 0xacb   :  { %2016 = vmax.xlane.f32.xlu0 %v2015_v57 }
 0xaee   :  { %v7541_v27 = vpop.f32.mrb[16].mxu1 }
 0xaef   :  { %8746 = vst [vmem:[#allocation37_spill] sm:$0xff] %v7541_v27  ;;  %v7543_v29 = vpop.f32.mrb[17].mxu1 }
 0xaf0   :  { %8747 = vst [vmem:[#allocation51_spill] sm:$0xff] %v7543_v29  ;;  %v2411_v46 = vpop.f32.mrb[18].mxu1  ;;  %v8750_v29 = vld [vmem:[#allocation40_spill] sm:$0xff] }
 0xaf1   :  { %v2412_v31 = vpop.f32.mrb[19].mxu1 }
 0xaf2   :  { %v8749_v31 = vld [vmem:[#allocation41_spill] sm:$0xff] }
 0xb58   :  { %v2017_v32 = vpop.xlane.xlu0 %2016 }
 0xb59   :  { %v2022_v36 = vrot.slane %v2017_v32, %v6959_v39  ;;  %v2026_v28 = vrot.slane %v2017_v32, %v8719_v54  ;;  %v2030_v17 = vrot.slane %v2017_v32, %v8720_v0  ;;  %v2034_v35 = vrot.slane %v2017_v32, %v8723_v22 }
 0xb5a   :  { %v2042_v41 = vrot.slane %v2017_v32, %v8724_v55  ;;  %v2038_v57 = vrot.slane %v2017_v32, %v8748_v6  ;;  %v2050_v34 = vrot.slane %v2017_v32, %v8749_v31  ;;  %v2046_v20 = vrot.slane %v2017_v32, %v8750_v29 }
 0xb5b   :  { %v2060_v63 = vsub.f32 %v1954_v23, %v2026_v28  ;;  %v2059_v40 = vsub.f32 %v1952_v60, %v2022_v36  ;;  %v2062_v58 = vsub.f32 %v1958_v25, %v2034_v35  ;;  %v2061_v2 = vsub.f32 %v1956_v8, %v2030_v17 }
 0xb5c   :  { %v2064_v27 = vsub.f32 %v1962_v24, %v2042_v41  ;;  %v2063_v16 = vsub.f32 %v1960_v49, %v2038_v57  ;;  %v2066_v23 = vsub.f32 %v1966_v4, %v2050_v34  ;;  %v2065_v25 = vsub.f32 %v1964_v9, %v2046_v20 }
 0xb5d   :  { %v2069_v26 = vmul.f32 1.442695, %v2060_v63  ;;  %v2067_v46 = vmul.f32 1.442695, %v2059_v40  ;;  %v2073_v53 = vmul.f32 1.442695, %v2062_v58 }
 0xb5e   :  { %v2071_v19 = vmul.f32 1.442695, %v2061_v2  ;;  %v2077_v15 = vmul.f32 1.442695, %v2064_v27  ;;  %v2075_v60 = vmul.f32 1.442695, %v2063_v16 }
 0xb5f   :  { %6076 = vpow2.f32 %v2069_v26  ;;  %v2081_v8 = vmul.f32 1.442695, %v2066_v23  ;;  %v2079_v36 = vmul.f32 1.442695, %v2065_v25 }
 0xb60   :  { %6078 = vpow2.f32 %v2067_v46 }
 0xb61   :  { %6080 = vpow2.f32 %v2073_v53 }
 0xb62   :  { %6082 = vpow2.f32 %v2071_v19 }
 0xb63   :  { %6084 = vpow2.f32 %v2077_v15 }
 0xb64   :  { %6086 = vpow2.f32 %v2075_v60 }
 0xb65   :  { %6088 = vpow2.f32 %v2081_v8 }
 0xb66   :  { %6090 = vpow2.f32 %v2079_v36 }
 0xb69   :  { %v6077_v28 = vpop.eup %6076 }
 0xb6a   :  { %v6079_v17 = vpop.eup %6078  ;;  %2095 = vperm.xlu1 %5894, %v6077_v28  }
 0xb6b   :  { %2092 = vperm.xlu0 %5895, %v6079_v17   ;;  %v7553_v26 = vpop.eup %6080 }
 0xb6c   :  { %v6083_v2 = vpop.eup %6082 }
 0xb6d   :  { %v7556_v34 = vpop.eup %6084 }
 0xb6e   :  { %2101 = vperm.xlu1 %5894, %v7553_v26   ;;  %v6087_v16 = vpop.eup %6086 }
 0xb6f   :  { %2098 = vperm.xlu0 %5895, %v6083_v2   ;;  %v7559_v15 = vpop.eup %6088 }
 0xb70   :  { %v7561_v19 = vpop.eup %6090 }
 0xb72   :  { %2107 = vperm.xlu1 %5894, %v7556_v34  }
 0xb73   :  { %2104 = vperm.xlu0 %5895, %v6087_v16  }
 0xb76   :  { %2113 = vperm.xlu1 %5894, %v7559_v15  }
 0xb77   :  { %2110 = vperm.xlu0 %5895, %v7561_v19  }
 0xbe9   :  { %v2096_v20 = vpop.permute.xlu1 %2095 }
 0xbea   :  { %v2093_v53 = vpop.permute.xlu0 %2092  ;;  %v2122_v32 = vrot.slane %v2096_v20, %v8718_v18 }
 0xbeb   :  { %v2118_v4 = vrot.slane %v2093_v53, %v8718_v18 }
 0xbed   :  { %v2102_v24 = vpop.permute.xlu1 %2101  ;;  %v2147_v27 = vsel %vm630_vm0, %v2122_v32, %v2118_v4 }
 0xbee   :  { %v2099_v9 = vpop.permute.xlu0 %2098  ;;  %v2130_v35 = vrot.slane %v2102_v24, %v8718_v18 }
 0xbef   :  { %v2126_v49 = vrot.slane %v2099_v9, %v8718_v18 }
 0xbf1   :  { %v2148_v41 = vsel %vm632_vm1, %v2126_v49, %v2147_v27  ;;  %v2108_v63 = vpop.permute.xlu1 %2107 }
 0xbf2   :  { %v2105_v40 = vpop.permute.xlu0 %2104  ;;  %v2138_v57 = vrot.slane %v2108_v63, %v8718_v18  ;;  %v2149_v46 = vsel %vm634_vm2, %v2130_v35, %v2148_v41 }
 0xbf3   :  { %v2134_v58 = vrot.slane %v2105_v40, %v8718_v18 }
 0xbf5   :  { %v2150_v23 = vsel %vm636_vm3, %v2134_v58, %v2149_v46  ;;  %v2114_v60 = vpop.permute.xlu1 %2113 }
 0xbf6   :  { %v2146_v25 = vrot.slane %v2114_v60, %v8718_v18  ;;  %v2111_v8 = vpop.permute.xlu0 %2110  ;;  %v2151_v20 = vsel %vm638_vm4, %v2138_v57, %v2150_v23 }
 0xbf7   :  { %v2142_v36 = vrot.slane %v2111_v8, %v8718_v18 }
 0xbf9   :  { %v2152_v53 = vsel %vm640_vm5, %v2142_v36, %v2151_v20 }
 0xbfa   :  { %v2153_v32 = vsel %vm642_vm6, %v2146_v25, %v2152_v53 }
 0xbfb   :  { %v2155_v4 = vsel %vm645_vm7, %v2153_v32, 0.0 }
 0xbfc   :  { %2156 = vadd.xlane.f32.xlu0 %v2155_v4 }
 0xc89   :  { %v2157_v24 = vpop.xlane.xlu0 %2156 }
 0xc8a   :  { %v2162_v9 = vrot.slane %v2157_v24, %v6959_v39  ;;  %v2166_v49 = vrot.slane %v2157_v24, %v8719_v54  ;;  %v2170_v27 = vrot.slane %v2157_v24, %v8720_v0  ;;  %v2174_v35 = vrot.slane %v2157_v24, %v8723_v22 }
 0xc8b   :  { %v2178_v63 = vrot.slane %v2157_v24, %v8748_v6  ;;  %v2182_v57 = vrot.slane %v2157_v24, %v8724_v55  ;;  %v2186_v60 = vrot.slane %v2157_v24, %v8750_v29  ;;  %v2190_v36 = vrot.slane %v2157_v24, %v8749_v31 }
 0xc8c   :  { %6092 = vrcp.f32 %v2162_v9 }
 0xc8d   :  { %6094 = vrcp.f32 %v2166_v49 }
 0xc8e   :  { %6096 = vrcp.f32 %v2170_v27 }
 0xc8f   :  { %6098 = vrcp.f32 %v2174_v35 }
 0xc90   :  { %6100 = vrcp.f32 %v2178_v63 }
 0xc91   :  { %6102 = vrcp.f32 %v2182_v57 }
 0xc92   :  { %6104 = vrcp.f32 %v2186_v60 }
 0xc93   :  { %6106 = vrcp.f32 %v2190_v36 }
 0xc96   :  { %v6093_v41 = vpop.eup %6092 }
 0xc97   :  { %v2200_v40 = vmul.f32 %v6093_v41, %v6079_v17  ;;  %v6095_v58 = vpop.eup %6094 }
 0xc98   :  { %v2202_v46 = vmul.f32 %v6095_v58, %v6077_v28  ;;  %v6097_v23 = vpop.eup %6096 }
 0xc99   :  { %2217 = vperm.xlu1 %5894, %v2200_v40   ;;  %v2204_v25 = vmul.f32 %v6097_v23, %v6083_v2  ;;  %v6099_v8 = vpop.eup %6098 }
 0xc9a   :  { %v2206_v20 = vmul.f32 %v6099_v8, %v7553_v26  ;;  %v6101_v17 = vpop.eup %6100 }
 0xc9b   :  { %v2208_v53 = vmul.f32 %v6101_v17, %v6087_v16  ;;  %v6103_v32 = vpop.eup %6102 }
 0xc9c   :  { %v2210_v28 = vmul.f32 %v6103_v32, %v7556_v34  ;;  %v6105_v4 = vpop.eup %6104 }
 0xc9d   :  { %2222 = vperm.xlu1 %5894, %v2202_v46   ;;  %v2212_v9 = vmul.f32 %v6105_v4, %v7561_v19  ;;  %v6107_v2 = vpop.eup %6106 }
 0xc9e   :  { %v2214_v49 = vmul.f32 %v6107_v2, %v7559_v15 }
 0xca1   :  { %2227 = vperm.xlu1 %5894, %v2204_v25  }
 0xca5   :  { %2232 = vperm.xlu1 %5894, %v2206_v20  }
 0xca9   :  { %2237 = vperm.xlu1 %5894, %v2208_v53  }
 0xcad   :  { %2242 = vperm.xlu1 %5894, %v2210_v28  }
 0xcb1   :  { %2247 = vperm.xlu1 %5894, %v2212_v9  }
 0xcb5   :  { %2252 = vperm.xlu1 %5894, %v2214_v49  }
 0xd18   :  { %v2218_v24 = vpop.permute.xlu1 %2217 }
 0xd19   :  { %v2255_v41 = vmul.f32 %v6962_v42, %v2218_v24 }
 0xd1b   :  { %v2263_v19 = vrot.slane %v2255_v41, 4 }
 0xd1c   :  { %v2223_v27 = vpop.permute.xlu1 %2222 }
 0xd1d   :  { %v2256_v35 = vmul.f32 %v6970_v50, %v2223_v27  ;;  %v2264_v25 = vadd.f32 %v2263_v19, %v2255_v41 }
 0xd1f   :  { %v2269_v34 = vrot.slane %v2256_v35, 4  ;;  %v2265_v4 = vrot.slane %v2264_v25, 2 }
 0xd20   :  { %v2228_v26 = vpop.permute.xlu1 %2227 }
 0xd21   :  { %v2257_v16 = vmul.f32 %v6967_v47, %v2228_v26  ;;  %v2270_v23 = vadd.f32 %v2269_v34, %v2256_v35 }
 0xd23   :  { %v2275_v58 = vrot.slane %v2257_v16, 4  ;;  %v2271_v17 = vrot.slane %v2270_v23, 2 }
 0xd24   :  { %v2233_v63 = vpop.permute.xlu1 %2232 }
 0xd25   :  { %v2258_v40 = vmul.f32 %v8708_v51, %v2233_v63  ;;  %v2276_v60 = vadd.f32 %v2275_v58, %v2257_v16  ;;  %v2272_v27 = vadd.f32 %v2271_v17, %v2270_v23  ;;  %v2266_v16 = vadd.f32 %v2265_v4, %v2264_v25 }
 0xd27   :  { %v2281_v57 = vrot.slane %v2258_v40, 4  ;;  %v2277_v28 = vrot.slane %v2276_v60, 2  ;;  %v2267_v29 = vrot.slane %v2266_v16, 1 }
 0xd28   :  { %v2238_v46 = vpop.permute.xlu1 %2237 }
 0xd29   :  { %v2259_v15 = vmul.f32 %v8705_v56, %v2238_v46  ;;  %v2282_v8 = vadd.f32 %v2281_v57, %v2258_v40  ;;  %v2278_v63 = vadd.f32 %v2277_v28, %v2276_v60  ;;  %v2273_v57 = vrot.slane %v2272_v27, 1 }
 0xd2a   :  { %v2268_v28 = vadd.f32 %v2267_v29, %v2266_v16 }
 0xd2b   :  { %v2287_v36 = vrot.slane %v2259_v15, 4  ;;  %v2283_v9 = vrot.slane %v2282_v8, 2 }
 0xd2c   :  { %v2243_v20 = vpop.permute.xlu1 %2242 }
 0xd2d   :  { %v2288_v53 = vadd.f32 %v2287_v36, %v2259_v15  ;;  %v2260_v32 = vmul.f32 %v8711_v45, %v2243_v20  ;;  %v2284_v41 = vadd.f32 %v2283_v9, %v2282_v8  ;;  %v2279_v20 = vrot.slane %v2278_v63, 1 }
 0xd2f   :  { %v2293_v2 = vrot.slane %v2260_v32, 4  ;;  %v2289_v49 = vrot.slane %v2288_v53, 2  ;;  %v2285_v31 = vrot.slane %v2284_v41, 1  ;;  %v2280_v8 = vadd.f32 %v2279_v20, %v2278_v63 }
 0xd30   :  { %v2248_v24 = vpop.permute.xlu1 %2247 }
 0xd31   :  { %v2294_v26 = vadd.f32 %v2293_v2, %v2260_v32  ;;  %v2261_v35 = vmul.f32 %v6990_v33, %v2248_v24  ;;  %v2290_v58 = vadd.f32 %v2289_v49, %v2288_v53  ;;  %v2274_v32 = vadd.f32 %v2273_v57, %v2272_v27 }
 0xd32   :  { %v2286_v4 = vadd.f32 %v2285_v31, %v2284_v41  ;;  %v7609_v41 = vld [vmem:[#allocation10 + $0x8] ss:$16 sps:$4 sm:$0xff]  }
 0xd33   :  { %v2295_v34 = vrot.slane %v2294_v26, 2  ;;  %v2299_v40 = vrot.slane %v2261_v35, 4  ;;  %v2291_v17 = vrot.slane %v2290_v58, 1  ;;  %v2319_v24 = vsel %vm630_vm0, %v2274_v32, %v2268_v28 }
 0xd34   :  { %v2253_v19 = vpop.permute.xlu1 %2252 }
 0xd35   :  { %v2296_v46 = vadd.f32 %v2295_v34, %v2294_v26  ;;  %v2300_v15 = vadd.f32 %v2299_v40, %v2261_v35  ;;  %v2262_v36 = vmul.f32 %v8716_v7, %v2253_v19  ;;  %v2292_v49 = vadd.f32 %v2291_v17, %v2290_v58 }
 0xd36   :  { %v2320_v34 = vsel %vm632_vm1, %v2280_v8, %v2319_v24  ;;  %v2457_v8 = vld [vmem:[#allocation4 + $0x38] sm:$0xff] }
 0xd37   :  { %v2301_v6 = vrot.slane %v2300_v15, 2  ;;  %v2305_v23 = vrot.slane %v2262_v36, 4  ;;  %v2297_v2 = vrot.slane %v2296_v46, 1  ;;  %v2321_v19 = vsel %vm634_vm2, %v2286_v4, %v2320_v34 }
 0xd38   :  { %v2322_v27 = vsel %vm636_vm3, %v2292_v49, %v2321_v19  ;;  %v2461_v49 = vunpack.c.h.bf16 %v2457_v8 }
 0xd39   :  { %v2302_v60 = vadd.f32 %v2301_v6, %v2300_v15  ;;  %v2306_v25 = vadd.f32 %v2305_v23, %v2262_v36  ;;  %v2298_v26 = vadd.f32 %v2297_v2, %v2296_v46 }
 0xd3b   :  { %v2303_v53 = vrot.slane %v2302_v60, 1  ;;  %v2307_v9 = vrot.slane %v2306_v25, 2  ;;  %v2323_v63 = vsel %vm638_vm4, %v2298_v26, %v2322_v27 }
 0xd3d   :  { %v2308_v35 = vadd.f32 %v2307_v9, %v2306_v25  ;;  %v2304_v40 = vadd.f32 %v2303_v53, %v2302_v60  ;;  %v2460_v53 = vunpack.c.l.bf16 %v2457_v8 }
 0xd3f   :  { %v2309_v55 = vrot.slane %v2308_v35, 1  ;;  %v2324_v29 = vsel %vm640_vm5, %v2304_v40, %v2323_v63 }
 0xd41   :  { %v2310_v6 = vadd.f32 %v2309_v55, %v2308_v35  ;;  %v7627_v55 = vld [vmem:[#allocation10 + $0x4] ss:$16 sps:$4 sm:$0xff]  }
 0xd43   :  { %v2325_v31 = vsel %vm642_vm6, %v2310_v6, %v2324_v29 }
 0xd44   :  { %v2328_v16 = vpack.c.bf16 %v2325_v31, %v2325_v31  ;;  %v8757_v31 = vld [vmem:[#allocation29_spill] sm:$0xff] }
 0xd46   :  { %2361 = vmatprep.mubr.bf16.mxu0 %v2328_v16 }
 0xd47   :  { %2362 = vmatmul.mubr.bf16.vlgmr.msra.gmra.mrb[16].mxu0 %v7454_v62 }
 0xd48   :  { %2415 = vmatpush1.bf16.msra.mxu0 %v7609_v41  ;;  %2446 = vmatprep.mubr.bf16.mxu0 %v8699_v48 }
 0xd49   :  { %2416 = vmatprep.subr.bf16.mxu0 %v7373_v3  ;;  %v7631_v3 = vld [vmem:[#allocation10] ss:$16 sps:$4 sm:$0xff]  }
 0xd4c   :  { %2417 = vmatpush1.bf16.msra.mxu0 %v7376_v59  ;;  %v7635_v59 = vld [vmem:[#allocation10 + $0x24] ss:$16 sps:$4 sm:$0xff]  }
 0xd4d   :  { %2418 = vmatprep.subr.bf16.mxu0 %v7379_v13  ;;  %v7638_v13 = vld [vmem:[#allocation10 + $0x20] ss:$16 sps:$4 sm:$0xff]  }
 0xd50   :  { %2419 = vmatpush1.bf16.msra.mxu0 %v7382_v1  ;;  %v7641_v1 = vld [vmem:[#allocation10 + $0x44] ss:$16 sps:$4 sm:$0xff]  }
 0xd51   :  { %2420 = vmatprep.subr.bf16.mxu0 %v7385_v52  ;;  %v7644_v52 = vld [vmem:[#allocation10 + $0x40] ss:$16 sps:$4 sm:$0xff]  }
 0xd54   :  { %2421 = vmatpush1.bf16.msra.mxu0 %v7388_v12  ;;  %v7647_v12 = vld [vmem:[#allocation10 + $0x64] ss:$16 sps:$4 sm:$0xff]  }
 0xd55   :  { %2422 = vmatprep.subr.bf16.mxu0 %v7391_v44  ;;  %v7650_v44 = vld [vmem:[#allocation10 + $0x60] ss:$16 sps:$4 sm:$0xff]  }
 0xd58   :  { %2423 = vmatpush1.bf16.msra.mxu0 %v7394_v43  ;;  %v7653_v43 = vld [vmem:[#allocation10 + $0x84] ss:$16 sps:$4 sm:$0xff]  }
 0xd59   :  { %2424 = vmatprep.subr.bf16.mxu0 %v7397_v37  ;;  %v7656_v37 = vld [vmem:[#allocation10 + $0x80] ss:$16 sps:$4 sm:$0xff]  }
 0xd5c   :  { %2425 = vmatpush1.bf16.msra.mxu0 %v7400_v30  ;;  %v8751_v30 = vld [vmem:[#allocation25_spill] sm:$0xff] }
 0xd5d   :  { %2426 = vmatprep.subr.bf16.mxu0 %v7403_v38  ;;  %v8752_v38 = vld [vmem:[#allocation34_spill] sm:$0xff] }
 0xd60   :  { %2427 = vmatpush1.bf16.msra.mxu0 %v7406_v5  ;;  %v8753_v5 = vld [vmem:[#allocation33_spill] sm:$0xff] }
 0xd61   :  { %2428 = vmatprep.subr.bf16.mxu0 %v7409_v21  ;;  %v8754_v21 = vld [vmem:[#allocation26_spill] sm:$0xff] }
 0xd64   :  { %2429 = vmatpush1.bf16.msra.mxu0 %v7412_v61 }
 0xd65   :  { %3010 = vmatprep.subr.bf16.mxu0 %v7627_v55 }
 0xd67   :  { %2447 = vmatmul.mubr.bf16.vlgmr.msra.gmra.mrb[20].mxu0 %v7454_v62  ;;  %v2456_v62 = vld [vmem:[#allocation4 + $0x30] sm:$0xff] }
 0xd68   :  { %3011 = vmatpush1.bf16.msra.mxu0 %v7631_v3  ;;  %3042 = vmatprep.mubr.bf16.mxu0 %v8699_v48  ;;  %v2459_v36 = vunpack.c.h.bf16 %v2456_v62 }
 0xd69   :  { %3012 = vmatprep.subr.bf16.mxu0 %v7635_v59 }
 0xd6c   :  { %3013 = vmatpush1.bf16.msra.mxu0 %v7638_v13 }
 0xd6d   :  { %3014 = vmatprep.subr.bf16.mxu0 %v7641_v1 }
 0xd70   :  { %3015 = vmatpush1.bf16.msra.mxu0 %v7644_v52 }
 0xd71   :  { %3016 = vmatprep.subr.bf16.mxu0 %v7647_v12 }
 0xd74   :  { %3017 = vmatpush1.bf16.msra.mxu0 %v7650_v44 }
 0xd75   :  { %3018 = vmatprep.subr.bf16.mxu0 %v7653_v43 }
 0xd78   :  { %3019 = vmatpush1.bf16.msra.mxu0 %v7656_v37 }
 0xd79   :  { %3020 = vmatprep.subr.bf16.mxu0 %v7427_v10  ;;  %v2458_v10 = vunpack.c.l.bf16 %v2456_v62 }
 0xd7c   :  { %3021 = vmatpush1.bf16.msra.mxu0 %v7430_v11  ;;  %v8755_v11 = vld [vmem:[#allocation51_spill] sm:$0xff] }
 0xd7d   :  { %3022 = vmatprep.subr.bf16.mxu0 %v7433_v14  ;;  %v2463_v20 = vadd.f32 %v2459_v36, %v8755_v11  ;;  %v8756_v14 = vld [vmem:[#allocation37_spill] sm:$0xff] }
 0xd7e   :  { %v2462_v23 = vadd.f32 %v2458_v10, %v8756_v14  ;;  %v8759_v14 = vld [vmem:[#allocation42_spill] sm:$0xff] }
 0xd7f   :  { %v5670_v17 = vmul.f32 -1.442695, %v2463_v20 }
 0xd80   :  { %3023 = vmatpush1.bf16.msra.mxu0 %v8751_v30  ;;  %v5669_v32 = vmul.f32 -1.442695, %v2462_v23 }
 0xd81   :  { %3024 = vmatprep.subr.bf16.mxu0 %v8752_v38 }
 0xd84   :  { %3025 = vmatpush1.bf16.msra.mxu0 %v8753_v5 }
 0xd85   :  { %5791 = vmatprep.subr.bf16.mxu0 %v8754_v21 }
 0xe1a   :  { %v5763_v61 = vpop.f32.mrb[16].mxu0 }
 0xe1b   :  { %v5764_v58 = vpop.f32.mrb[17].mxu0 }
 0xe1c   :  { %v5765_v57 = vadd.f32 %v5764_v58, %v5763_v61  ;;  %v5766_v46 = vpop.f32.mrb[18].mxu0 }
 0xe1d   :  { %v5767_v15 = vpop.f32.mrb[19].mxu0  ;;  %v8758_v46 = vld [vmem:[#allocation27_spill] sm:$0xff] }
 0xe1e   :  { %6108 = vtanh.f32 %v5765_v57 }
 0xe1f   :  { %6110 = vpow2.f32 %v5670_v17 }
 0xe20   :  { %6112 = vpow2.f32 %v5669_v32 }
 0xe28   :  { %v6109_v2 = vpop.eup %6108 }
 0xe29   :  { %v2370_v60 = vpack.c.bf16 %v6109_v2, %v6109_v2  ;;  %v6111_v25 = vpop.eup %6110  ;;  %v8760_v2 = vld [vmem:[#allocation43_spill] sm:$0xff] }
 0xe2a   :  { %v6113_v28 = vpop.eup %6112  ;;  %v2475_v4 = vadd.f32 1.0, %v6111_v25 }
 0xe2b   :  { %2372 = vst [vmem:[#allocation15 + $0x8] sm:$0xf] %v2370_v60  ;;  %v2469_v9 = vadd.f32 1.0, %v6113_v28 }
 0xe2c   :  { %6114 = vrcp.f32 %v2475_v4  ;;  %v8761_v4 = vld [vmem:[#allocation28_spill] sm:$0xff] }
 0xe2d   :  { %6116 = vrcp.f32 %v2469_v9  ;;  %v8762_v9 = vld [vmem:[#allocation44_spill] sm:$0xff] }
 0xe36   :  { %v6115_v6 = vpop.eup %6114 }
 0xe37   :  { %v6117_v63 = vpop.eup %6116  ;;  %v2485_v16 = vmul.f32 %v6115_v6, %v8757_v31 }
 0xe3a   :  { %v2448_v24 = vpop.f32.mrb[20].mxu0 }
 0xe3b   :  { %v2464_v26 = vadd.f32 %v2460_v53, %v2448_v24  ;;  %v2450_v35 = vpop.f32.mrb[21].mxu0 }
 0xe3c   :  { %v2465_v34 = vadd.f32 %v2461_v49, %v2450_v35  ;;  %v2452_v40 = vpop.f32.mrb[22].mxu0 }
 0xe3d   :  { %6118 = vtanh.f32 %v2464_v26  ;;  %v2453_v19 = vpop.f32.mrb[23].mxu0  ;;  %v8764_v40 = vld [vmem:[#allocation30_spill] sm:$0xff] }
 0xe3e   :  { %v5671_v27 = vmul.f32 -1.442695, %v2465_v34  ;;  %v8763_v34 = vld [vmem:[#allocation45_spill] sm:$0xff] }
 0xe40   :  { %6120 = vpow2.f32 %v5671_v27 }
 0xe47   :  { %v6119_v29 = vpop.eup %6118 }
 0xe48   :  { %v2486_v30 = vmul.f32 %v6119_v29, %v6117_v63  ;;  %v8765_v63 = vld [vmem:[#allocation46_spill] sm:$0xff]  ;;  %v8766_v29 = vld [vmem:[#allocation47_spill] sm:$0xff] }
 0xe4a   :  { %v6121_v38 = vpop.eup %6120  ;;  %v7669_v5 = vadd.f32 %v2486_v30, %v2485_v16 }
 0xe4b   :  { %v2482_v21 = vadd.f32 1.0, %v6121_v38  ;;  %v8767_v38 = vld [vmem:[#allocation48_spill] sm:$0xff] }
 0xe4c   :  { %6122 = vtanh.f32 %v7669_v5 }
 0xe4d   :  { %6124 = vrcp.f32 %v2482_v21  ;;  %v8768_v21 = vld [vmem:[#allocation49_spill] sm:$0xff] }
 0xe56   :  { %v6123_v61 = vpop.eup %6122 }
 0xe57   :  { %v6125_v62 = vpop.eup %6124 }
 0xe58   :  { %v2489_v58 = vmul.f32 %v6125_v62, %v6123_v61 }
 0xe5a   :  { %v7672_v57 = vpack.c.bf16 %v2489_v58, %v2489_v58  ;;  %v2498_v15 = vrot.slane %v2489_v58, %v8758_v46  ;;  %v2491_v36 = vcombine.high %v2489_v58, %v2489_v58 }
 0xe5c   :  { %3043 = vmatmul.mubr.bf16.vlgmr.msra.gmra.mrb[24].mxu0 %v7672_v57  ;;  %v2514_v10 = vrot.slane %v2498_v15, %v8758_v46  ;;  %v2506_v11 = vcombine.high %v2498_v15, %v2498_v15  ;;  %v2505_v20 = vrot.slane %v2491_v36, %v8758_v46  ;;  %v8769_v15 = vld [vmem:[#allocation31_spill] sm:$0xff]  ;;  %v8770_v36 = vld [vmem:[#allocation50_spill] sm:$0xff] }
 0xe5d   :  { %5792 = vmatpush3.bf16.msra.mxu0 %v8759_v14  ;;  %v8772_v14 = vld [vmem:[#allocation35_spill] sm:$0xff] }
 0xe5e   :  { %v2543_v23 = vrot.slane %v2514_v10, %v6959_v39  ;;  %v2528_v17 = vrot.slane %v2506_v11, %v8758_v46  ;;  %v2536_v32 = vcombine.high %v2514_v10, %v2514_v10  ;;  %5793 = vmatprep.subr.bf16.mxu0 %v8760_v2  ;;  %v2521_v28 = vrot.slane %v2505_v20, %v8758_v46 }
 0xe5f   :  { %v2507_v35 = vcombine.high %v2505_v20, %v2505_v20  ;;  %v8771_v20 = vld [vmem:[#allocation32_spill] sm:$0xff] }
 0xe60   :  { %v2580_v60 = vmul.f32 %v6962_v42, %v2543_v23  ;;  %v2547_v25 = vrot.slane %v2528_v17, %v6959_v39  ;;  %v2551_v8 = vrot.slane %v2536_v32, %v6959_v39  ;;  %v2559_v24 = vrot.slane %v2521_v28, %v6959_v39  ;;  %v7712_v32 = vld [vmem:[#allocation10 + $0xc] ss:$16 sps:$4 sm:$0xff]  }
 0xe61   :  { %5794 = vmatpush3.bf16.msra.mxu0 %v8761_v4  ;;  %v2538_v26 = vcombine.high %v2528_v17, %v2528_v17  ;;  %v2535_v6 = vrot.slane %v2507_v35, %v8758_v46  ;;  %v2537_v30 = vcombine.high %v2521_v28, %v2521_v28  ;;  %v8773_v17 = vld [vmem:[#allocation36_spill] sm:$0xff] }
 0xe62   :  { %2588 = vadd.xlane.f32.xlu0 %v2580_v60  ;;  %v2581_v53 = vmul.f32 %v6970_v50, %v2547_v25  ;;  %5795 = vmatprep.subr.bf16.mxu0 %v8762_v9  ;;  %v2582_v49 = vmul.f32 %v6967_v47, %v2551_v8  ;;  %v2584_v19 = vmul.f32 %v8705_v56, %v2559_v24 }
 0xe63   :  { %v2555_v27 = vrot.slane %v2538_v26, %v6959_v39  ;;  %v2563_v16 = vrot.slane %v2535_v6, %v6959_v39  ;;  %v2567_v62 = vrot.slane %v2537_v30, %v6959_v39  ;;  %v2539_v58 = vcombine.high %v2535_v6, %v2535_v6 }
 0xe64   :  { %2590 = vadd.xlane.f32.xlu1 %v2581_v53 }
 0xe65   :  { %5796 = vmatpush3.bf16.msra.mxu0 %v8763_v34  ;;  %v2583_v31 = vmul.f32 %v8708_v51, %v2555_v27  ;;  %v2585_v61 = vmul.f32 %v8711_v45, %v2563_v16  ;;  %v2586_v10 = vmul.f32 %v6990_v33, %v2567_v62  ;;  %v2571_v11 = vrot.slane %v2539_v58, %v6959_v39 }
 0xe66   :  { %2592 = vadd.xlane.f32.xlu0 %v2582_v49  ;;  %5797 = vmatprep.subr.bf16.mxu0 %v8764_v40 }
 0xe67   :  { %v2587_v23 = vmul.f32 %v8716_v7, %v2571_v11 }
 0xe69   :  { %5798 = vmatpush3.bf16.msra.mxu0 %v8765_v63 }
 0xe6a   :  { %2596 = vadd.xlane.f32.xlu0 %v2584_v19  ;;  %5799 = vmatprep.subr.bf16.mxu0 %v8766_v29 }
 0xe6d   :  { %5800 = vmatpush3.bf16.msra.mxu0 %v8767_v38 }
 0xe6e   :  { %2594 = vadd.xlane.f32.xlu0 %v2583_v31  ;;  %5801 = vmatprep.subr.bf16.mxu0 %v8768_v21 }
 0xe71   :  { %5802 = vmatpush3.bf16.msra.mxu0 %v8769_v15 }
 0xe72   :  { %2598 = vadd.xlane.f32.xlu0 %v2585_v61  ;;  %5803 = vmatprep.subr.bf16.mxu0 %v8770_v36 }
 0xe75   :  { %5804 = vmatpush3.bf16.msra.mxu0 %v8771_v20 }
 0xe76   :  { %2600 = vadd.xlane.f32.xlu0 %v2586_v10  ;;  %5805 = vmatprep.subr.bf16.mxu0 %v8772_v14 }
 0xe79   :  { %5806 = vmatpush3.bf16.msra.mxu0 %v8773_v17 }
 0xe7a   :  { %2602 = vadd.xlane.f32.xlu0 %v2587_v23  ;;  %3688 = vmatprep.subr.bf16.mxu0 %v7712_v32  ;;  %v8774_v23 = vld [vmem:[#allocation39_spill] sm:$0xff] }
 0xeef   :  { %v2589_v2 = vpop.xlane.xlu0 %2588 }
 0xef0   :  { %v2615_v53 = vrot.slane %v2589_v2, %v8718_v18 }
 0xef1   :  { %v2591_v8 = vpop.xlane.xlu1 %2590 }
 0xef2   :  { %v2619_v4 = vrot.slane %v2591_v8, %v8718_v18 }
 0xef3   :  { %v2593_v60 = vpop.xlane.xlu0 %2592 }
 0xef4   :  { %v2623_v9 = vrot.slane %v2593_v60, %v8718_v18  ;;  %v2644_v24 = vsel %vm630_vm0, %v2619_v4, %v2615_v53 }
 0xef6   :  { %v2645_v35 = vsel %vm632_vm1, %v2623_v9, %v2644_v24 }
 0xef7   :  { %v2597_v25 = vpop.xlane.xlu0 %2596 }
 0xef8   :  { %v2631_v27 = vrot.slane %v2597_v25, %v8718_v18 }
 0xefb   :  { %v2595_v28 = vpop.xlane.xlu0 %2594 }
 0xefc   :  { %v2627_v26 = vrot.slane %v2595_v28, %v8718_v18 }
 0xefe   :  { %v2646_v40 = vsel %vm634_vm2, %v2627_v26, %v2645_v35  ;;  %v8775_v26 = vld [vmem:[#allocation38_spill] sm:$0xff] }
 0xeff   :  { %v2599_v49 = vpop.xlane.xlu0 %2598  ;;  %v2647_v29 = vsel %vm636_vm3, %v2631_v27, %v2646_v40  ;;  %v8776_v27 = vld [vmem:[#allocation41_spill] sm:$0xff] }
 0xf00   :  { %v2635_v19 = vrot.slane %v2599_v49, %v8718_v18 }
 0xf02   :  { %v2648_v16 = vsel %vm638_vm4, %v2635_v19, %v2647_v29 }
 0xf03   :  { %v2601_v34 = vpop.xlane.xlu0 %2600 }
 0xf04   :  { %v2639_v6 = vrot.slane %v2601_v34, %v8718_v18 }
 0xf06   :  { %v2649_v30 = vsel %vm640_vm5, %v2639_v6, %v2648_v16  ;;  %v8777_v16 = vld [vmem:[#allocation40_spill] sm:$0xff] }
 0xf07   :  { %v2603_v63 = vpop.xlane.xlu0 %2602 }
 0xf08   :  { %v2643_v31 = vrot.slane %v2603_v63, %v8718_v18 }
 0xf0a   :  { %v2650_v38 = vsel %vm642_vm6, %v2643_v31, %v2649_v30 }
 0xf0b   :  { %v2652_v21 = vsel %vm645_vm7, %v2650_v38, -inf }
 0xf0c   :  { %2653 = vmax.xlane.f32.xlu0 %v2652_v21 }
 0xf2f   :  { %v7731_v61 = vpop.f32.mrb[24].mxu0 }
 0xf30   :  { %v7733_v62 = vpop.f32.mrb[25].mxu0 }
 0xf31   :  { %v3048_v58 = vpop.f32.mrb[26].mxu0 }
 0xf32   :  { %v3049_v15 = vpop.f32.mrb[27].mxu0 }
 0xf99   :  { %v2654_v36 = vpop.xlane.xlu0 %2653 }
 0xf9a   :  { %v2659_v10 = vrot.slane %v2654_v36, %v6959_v39  ;;  %v2663_v11 = vrot.slane %v2654_v36, %v8719_v54  ;;  %v2671_v20 = vrot.slane %v2654_v36, %v8723_v22  ;;  %v2667_v14 = vrot.slane %v2654_v36, %v8720_v0 }
 0xf9b   :  { %v2679_v17 = vrot.slane %v2654_v36, %v8774_v23  ;;  %v2675_v35 = vrot.slane %v2654_v36, %v8775_v26  ;;  %v2687_v6 = vrot.slane %v2654_v36, %v8776_v27  ;;  %v2683_v30 = vrot.slane %v2654_v36, %v8777_v16 }
 0xf9c   :  { %v2697_v4 = vsub.f32 %v2591_v8, %v2663_v11  ;;  %v2696_v53 = vsub.f32 %v2589_v2, %v2659_v10  ;;  %v2699_v9 = vsub.f32 %v2595_v28, %v2671_v20  ;;  %v2698_v19 = vsub.f32 %v2593_v60, %v2667_v14 }
 0xf9d   :  { %v2701_v29 = vsub.f32 %v2599_v49, %v2679_v17  ;;  %v2700_v21 = vsub.f32 %v2597_v25, %v2675_v35  ;;  %v2703_v58 = vsub.f32 %v2603_v63, %v2687_v6  ;;  %v2702_v8 = vsub.f32 %v2601_v34, %v2683_v30 }
 0xf9e   :  { %v2706_v24 = vmul.f32 1.442695, %v2697_v4  ;;  %v2704_v40 = vmul.f32 1.442695, %v2696_v53  ;;  %v2710_v31 = vmul.f32 1.442695, %v2699_v9 }
 0xf9f   :  { %v2708_v38 = vmul.f32 1.442695, %v2698_v19  ;;  %v2714_v15 = vmul.f32 1.442695, %v2701_v29  ;;  %v2712_v2 = vmul.f32 1.442695, %v2700_v21 }
 0xfa0   :  { %6126 = vpow2.f32 %v2706_v24  ;;  %v2718_v28 = vmul.f32 1.442695, %v2703_v58  ;;  %v2716_v60 = vmul.f32 1.442695, %v2702_v8 }
 0xfa1   :  { %6128 = vpow2.f32 %v2704_v40 }
 0xfa2   :  { %6130 = vpow2.f32 %v2710_v31 }
 0xfa3   :  { %6132 = vpow2.f32 %v2708_v38 }
 0xfa4   :  { %6134 = vpow2.f32 %v2714_v15 }
 0xfa5   :  { %6136 = vpow2.f32 %v2712_v2 }
 0xfa6   :  { %6138 = vpow2.f32 %v2718_v28 }
 0xfa7   :  { %6140 = vpow2.f32 %v2716_v60 }
 0xfaa   :  { %v6127_v10 = vpop.eup %6126 }
 0xfab   :  { %2732 = vperm.xlu1 %5894, %v6127_v10   ;;  %v6129_v49 = vpop.eup %6128 }
 0xfac   :  { %v7743_v11 = vpop.eup %6130  ;;  %2729 = vperm.xlu0 %5895, %v6129_v49  }
 0xfad   :  { %v6133_v25 = vpop.eup %6132 }
 0xfae   :  { %v7746_v63 = vpop.eup %6134 }
 0xfaf   :  { %2738 = vperm.xlu1 %5894, %v7743_v11   ;;  %v6137_v34 = vpop.eup %6136 }
 0xfb0   :  { %2735 = vperm.xlu0 %5895, %v6133_v25   ;;  %v7749_v36 = vpop.eup %6138 }
 0xfb1   :  { %v7752_v20 = vpop.eup %6140 }
 0xfb3   :  { %2744 = vperm.xlu1 %5894, %v7746_v63  }
 0xfb4   :  { %2741 = vperm.xlu0 %5895, %v6137_v34  }
 0xfb7   :  { %2750 = vperm.xlu1 %5894, %v7749_v36  }
 0xfb8   :  { %2747 = vperm.xlu0 %5895, %v7752_v20  }
0x102a   :  { %v2733_v14 = vpop.permute.xlu1 %2732 }
0x102b   :  { %v2730_v17 = vpop.permute.xlu0 %2729  ;;  %v2759_v53 = vrot.slane %v2733_v14, %v8718_v18 }
0x102c   :  { %v2755_v9 = vrot.slane %v2730_v17, %v8718_v18 }
0x102e   :  { %v2739_v4 = vpop.permute.xlu1 %2738  ;;  %v2784_v19 = vsel %vm630_vm0, %v2759_v53, %v2755_v9 }
0x102f   :  { %v2736_v24 = vpop.permute.xlu0 %2735  ;;  %v2767_v6 = vrot.slane %v2739_v4, %v8718_v18 }
0x1030   :  { %v2763_v35 = vrot.slane %v2736_v24, %v8718_v18 }
0x1032   :  { %v2745_v40 = vpop.permute.xlu1 %2744  ;;  %v2785_v29 = vsel %vm632_vm1, %v2763_v35, %v2784_v19 }
0x1033   :  { %v2742_v31 = vpop.permute.xlu0 %2741  ;;  %v2775_v21 = vrot.slane %v2745_v40, %v8718_v18  ;;  %v2786_v58 = vsel %vm634_vm2, %v2767_v6, %v2785_v29 }
0x1034   :  { %v2771_v30 = vrot.slane %v2742_v31, %v8718_v18 }
0x1036   :  { %v2751_v38 = vpop.permute.xlu1 %2750  ;;  %v2787_v15 = vsel %vm636_vm3, %v2771_v30, %v2786_v58 }
0x1037   :  { %v2783_v2 = vrot.slane %v2751_v38, %v8718_v18  ;;  %v2748_v8 = vpop.permute.xlu0 %2747  ;;  %v2788_v60 = vsel %vm638_vm4, %v2775_v21, %v2787_v15 }
0x1038   :  { %v2779_v28 = vrot.slane %v2748_v8, %v8718_v18 }
0x103a   :  { %v2789_v14 = vsel %vm640_vm5, %v2779_v28, %v2788_v60 }
0x103b   :  { %v2790_v17 = vsel %vm642_vm6, %v2783_v2, %v2789_v14 }
0x103c   :  { %v2792_v4 = vsel %vm645_vm7, %v2790_v17, 0.0 }
0x103d   :  { %2793 = vadd.xlane.f32.xlu0 %v2792_v4 }
0x10ca   :  { %v2794_v53 = vpop.xlane.xlu0 %2793 }
0x10cb   :  { %v2799_v9 = vrot.slane %v2794_v53, %v6959_v39  ;;  %v2803_v24 = vrot.slane %v2794_v53, %v8719_v54  ;;  %v2807_v35 = vrot.slane %v2794_v53, %v8720_v0  ;;  %v2811_v40 = vrot.slane %v2794_v53, %v8723_v22 }
0x10cc   :  { %v2815_v6 = vrot.slane %v2794_v53, %v8775_v26  ;;  %v2819_v30 = vrot.slane %v2794_v53, %v8774_v23  ;;  %v2823_v58 = vrot.slane %v2794_v53, %v8777_v16  ;;  %v2827_v8 = vrot.slane %v2794_v53, %v8776_v27 }
0x10cd   :  { %6142 = vrcp.f32 %v2799_v9 }
0x10ce   :  { %6144 = vrcp.f32 %v2803_v24 }
0x10cf   :  { %6146 = vrcp.f32 %v2807_v35 }
0x10d0   :  { %6148 = vrcp.f32 %v2811_v40 }
0x10d1   :  { %6150 = vrcp.f32 %v2815_v6 }
0x10d2   :  { %6152 = vrcp.f32 %v2819_v30 }
0x10d3   :  { %6154 = vrcp.f32 %v2823_v58 }
0x10d4   :  { %6156 = vrcp.f32 %v2827_v8 }
0x10d7   :  { %v6143_v19 = vpop.eup %6142 }
0x10d8   :  { %v2837_v29 = vmul.f32 %v6143_v19, %v6129_v49  ;;  %v6145_v31 = vpop.eup %6144 }
0x10d9   :  { %v2839_v38 = vmul.f32 %v6145_v31, %v6127_v10  ;;  %v6147_v21 = vpop.eup %6146 }
0x10da   :  { %2854 = vperm.xlu1 %5894, %v2837_v29   ;;  %v2841_v15 = vmul.f32 %v6147_v21, %v6133_v25  ;;  %v6149_v2 = vpop.eup %6148 }
0x10db   :  { %v2843_v28 = vmul.f32 %v6149_v2, %v7743_v11  ;;  %v6151_v49 = vpop.eup %6150 }
0x10dc   :  { %v2845_v60 = vmul.f32 %v6151_v49, %v6137_v34  ;;  %v6153_v14 = vpop.eup %6152 }
0x10dd   :  { %v2847_v10 = vmul.f32 %v6153_v14, %v7746_v63  ;;  %v6155_v17 = vpop.eup %6154 }
0x10de   :  { %2859 = vperm.xlu1 %5894, %v2839_v38   ;;  %v2849_v4 = vmul.f32 %v6155_v17, %v7752_v20  ;;  %v6157_v25 = vpop.eup %6156 }
0x10df   :  { %v2851_v9 = vmul.f32 %v6157_v25, %v7749_v36 }
0x10e2   :  { %2864 = vperm.xlu1 %5894, %v2841_v15  }
0x10e6   :  { %2869 = vperm.xlu1 %5894, %v2843_v28  }
0x10ea   :  { %2874 = vperm.xlu1 %5894, %v2845_v60  }
0x10ee   :  { %2879 = vperm.xlu1 %5894, %v2847_v10  }
0x10f2   :  { %2884 = vperm.xlu1 %5894, %v2849_v4  }
0x10f6   :  { %2889 = vperm.xlu1 %5894, %v2851_v9  }
0x1159   :  { %v2855_v53 = vpop.permute.xlu1 %2854 }
0x115a   :  { %v2892_v40 = vmul.f32 %v6962_v42, %v2855_v53 }
0x115c   :  { %v2900_v20 = vrot.slane %v2892_v40, 4 }
0x115d   :  { %v2860_v24 = vpop.permute.xlu1 %2859 }
0x115e   :  { %v2893_v35 = vmul.f32 %v6970_v50, %v2860_v24  ;;  %v2901_v58 = vadd.f32 %v2900_v20, %v2892_v40 }
0x1160   :  { %v2906_v63 = vrot.slane %v2893_v35, 4  ;;  %v2902_v10 = vrot.slane %v2901_v58, 2 }
0x1161   :  { %v2865_v11 = vpop.permute.xlu1 %2864 }
0x1162   :  { %v2894_v34 = vmul.f32 %v6967_v47, %v2865_v11  ;;  %v2907_v38 = vadd.f32 %v2906_v63, %v2893_v35 }
0x1164   :  { %v2912_v29 = vrot.slane %v2894_v34, 4  ;;  %v2908_v28 = vrot.slane %v2907_v38, 2 }
0x1165   :  { %v2870_v19 = vpop.permute.xlu1 %2869 }
0x1166   :  { %v2895_v6 = vmul.f32 %v8708_v51, %v2870_v19  ;;  %v2913_v21 = vadd.f32 %v2912_v29, %v2894_v34  ;;  %v2909_v53 = vadd.f32 %v2908_v28, %v2907_v38  ;;  %v2903_v34 = vadd.f32 %v2902_v10, %v2901_v58 }
0x1168   :  { %v2918_v31 = vrot.slane %v2895_v6, 4  ;;  %v2914_v14 = vrot.slane %v2913_v21, 2  ;;  %v2910_v20 = vrot.slane %v2909_v53, 1 }
0x1169   :  { %v2875_v30 = vpop.permute.xlu1 %2874 }
0x116a   :  { %v2896_v36 = vmul.f32 %v8705_v56, %v2875_v30  ;;  %v2919_v15 = vadd.f32 %v2918_v31, %v2895_v6  ;;  %v2915_v35 = vadd.f32 %v2914_v14, %v2913_v21 }
0x116c   :  { %v2924_v2 = vrot.slane %v2896_v36, 4  ;;  %v2920_v17 = vrot.slane %v2919_v15, 2 }
0x116d   :  { %v2880_v8 = vpop.permute.xlu1 %2879 }
0x116e   :  { %v2925_v49 = vadd.f32 %v2924_v2, %v2896_v36  ;;  %v2897_v60 = vmul.f32 %v8711_v45, %v2880_v8  ;;  %v2921_v40 = vadd.f32 %v2920_v17, %v2919_v15  ;;  %v2916_v2 = vrot.slane %v2915_v35, 1 }
0x116f   :  { %v2904_v8 = vrot.slane %v2903_v34, 1 }
0x1170   :  { %v2930_v4 = vrot.slane %v2897_v60, 4  ;;  %v2926_v25 = vrot.slane %v2925_v49, 2  ;;  %v2922_v27 = vrot.slane %v2921_v40, 1  ;;  %v2917_v15 = vadd.f32 %v2916_v2, %v2915_v35  ;;  %v7822_v2 = vld [vmem:[#allocation10 + $0x88] ss:$16 sps:$4 sm:$0xff]  }
0x1171   :  { %v2885_v9 = vpop.permute.xlu1 %2884  ;;  %v2905_v14 = vadd.f32 %v2904_v8, %v2903_v34  ;;  %v7825_v8 = vld [vmem:[#allocation10 + $0xac] ss:$16 sps:$4 sm:$0xff]  }
0x1172   :  { %v2931_v24 = vadd.f32 %v2930_v4, %v2897_v60  ;;  %v2898_v11 = vmul.f32 %v6990_v33, %v2885_v9  ;;  %v2927_v6 = vadd.f32 %v2926_v25, %v2925_v49  ;;  %v2911_v60 = vadd.f32 %v2910_v20, %v2909_v53  ;;  %v7804_v20 = vld [vmem:[#allocation10 + $0x28] ss:$16 sps:$4 sm:$0xff]  }
0x1173   :  { %v2923_v10 = vadd.f32 %v2922_v27, %v2921_v40 }
0x1174   :  { %v2932_v19 = vrot.slane %v2931_v24, 2  ;;  %v2936_v63 = vrot.slane %v2898_v11, 4  ;;  %v2928_v28 = vrot.slane %v2927_v6, 1  ;;  %v2956_v9 = vsel %vm630_vm0, %v2911_v60, %v2905_v14  ;;  %v7834_v60 = vld [vmem:[#allocation10 + $0xc8] ss:$16 sps:$4 sm:$0xff]  }
0x1175   :  { %v2890_v29 = vpop.permute.xlu1 %2889 }
0x1176   :  { %v2933_v31 = vadd.f32 %v2932_v19, %v2931_v24  ;;  %v2937_v30 = vadd.f32 %v2936_v63, %v2898_v11  ;;  %v2899_v36 = vmul.f32 %v8716_v7, %v2890_v29  ;;  %v2929_v25 = vadd.f32 %v2928_v28, %v2927_v6  ;;  %v7801_v6 = vld [vmem:[#allocation10 + $0x2c] ss:$16 sps:$4 sm:$0xff]  }
0x1177   :  { %v2957_v19 = vsel %vm632_vm1, %v2917_v15, %v2956_v9  ;;  %v7831_v28 = vld [vmem:[#allocation10 + $0xcc] ss:$16 sps:$4 sm:$0xff]  }
0x1178   :  { %v2938_v16 = vrot.slane %v2937_v30, 2  ;;  %v2942_v38 = vrot.slane %v2899_v36, 4  ;;  %v2934_v4 = vrot.slane %v2933_v31, 1  ;;  %v2958_v29 = vsel %vm634_vm2, %v2923_v10, %v2957_v19 }
0x1179   :  { %v2959_v53 = vsel %vm636_vm3, %v2929_v25, %v2958_v29 }
0x117a   :  { %v2939_v21 = vadd.f32 %v2938_v16, %v2937_v30  ;;  %v2943_v58 = vadd.f32 %v2942_v38, %v2899_v36  ;;  %v2935_v24 = vadd.f32 %v2934_v4, %v2933_v31  ;;  %v7810_v31 = vld [vmem:[#allocation10 + $0x48] ss:$16 sps:$4 sm:$0xff]   ;;  %v7813_v30 = vld [vmem:[#allocation10 + $0x6c] ss:$16 sps:$4 sm:$0xff]  }
0x117b   :  { %v7819_v36 = vld [vmem:[#allocation10 + $0x8c] ss:$16 sps:$4 sm:$0xff]   ;;  %v7828_v38 = vld [vmem:[#allocation10 + $0xa8] ss:$16 sps:$4 sm:$0xff]  }
0x117c   :  { %v2940_v49 = vrot.slane %v2939_v21, 1  ;;  %v2944_v17 = vrot.slane %v2943_v58, 2  ;;  %v2960_v35 = vsel %vm638_vm4, %v2935_v24, %v2959_v53  ;;  %v7837_v4 = vld [vmem:[#allocation10 + $0xec] ss:$16 sps:$4 sm:$0xff]  }
0x117e   :  { %v2945_v11 = vadd.f32 %v2944_v17, %v2943_v58  ;;  %v2941_v63 = vadd.f32 %v2940_v49, %v2939_v21  ;;  %v7840_v21 = vld [vmem:[#allocation10 + $0xe8] ss:$16 sps:$4 sm:$0xff]  }
0x1180   :  { %v2946_v23 = vrot.slane %v2945_v11, 1  ;;  %v2961_v27 = vsel %vm640_vm5, %v2941_v63, %v2960_v35  ;;  %v3094_v63 = vld [vmem:[#allocation4 + $0x48] sm:$0xff] }
0x1182   :  { %v2947_v16 = vadd.f32 %v2946_v23, %v2945_v11  ;;  %v7807_v23 = vld [vmem:[#allocation10 + $0x4c] ss:$16 sps:$4 sm:$0xff]  }
0x1184   :  { %v2962_v34 = vsel %vm642_vm6, %v2947_v16, %v2961_v27  ;;  %v3097_v16 = vunpack.c.l.bf16 %v3094_v63  ;;  %v3098_v27 = vunpack.c.h.bf16 %v3094_v63 }
0x1185   :  { %v2965_v40 = vpack.c.bf16 %v2962_v34, %v2962_v34 }
0x1187   :  { %2998 = vmatprep.mubr.bf16.mxu1 %v2965_v40 }
0x1188   :  { %2999 = vmatmul.mubr.bf16.vlgmr.msra.gmra.mrb[20].mxu1 %v7672_v57 }
0x1189   :  { %3052 = vmatpush1.bf16.msra.mxu1 %v7609_v41  ;;  %3083 = vmatprep.mubr.bf16.mxu1 %v8699_v48  ;;  %v7816_v41 = vld [vmem:[#allocation10 + $0x68] ss:$16 sps:$4 sm:$0xff]  }
0x118a   :  { %3053 = vmatprep.subr.bf16.mxu1 %v7801_v6 }
0x118d   :  { %3054 = vmatpush1.bf16.msra.mxu1 %v7804_v20 }
0x118e   :  { %3055 = vmatprep.subr.bf16.mxu1 %v7807_v23 }
0x1191   :  { %3056 = vmatpush1.bf16.msra.mxu1 %v7810_v31 }
0x1192   :  { %3057 = vmatprep.subr.bf16.mxu1 %v7813_v30 }
0x1195   :  { %3058 = vmatpush1.bf16.msra.mxu1 %v7816_v41 }
0x1196   :  { %3059 = vmatprep.subr.bf16.mxu1 %v7819_v36 }
0x1199   :  { %3060 = vmatpush1.bf16.msra.mxu1 %v7822_v2 }
0x119a   :  { %3061 = vmatprep.subr.bf16.mxu1 %v7825_v8 }
0x119d   :  { %3062 = vmatpush1.bf16.msra.mxu1 %v7828_v38 }
0x119e   :  { %3063 = vmatprep.subr.bf16.mxu1 %v7831_v28 }
0x11a1   :  { %3064 = vmatpush1.bf16.msra.mxu1 %v7834_v60 }
0x11a2   :  { %3065 = vmatprep.subr.bf16.mxu1 %v7837_v4 }
0x11a5   :  { %3066 = vmatpush1.bf16.msra.mxu1 %v7840_v21 }
0x11a6   :  { %3647 = vmatprep.subr.bf16.mxu1 %v7627_v55  ;;  %v7855_v55 = vld [vmem:[#allocation10 + $0xa4] ss:$16 sps:$4 sm:$0xff]  }
0x11a8   :  { %3084 = vmatmul.mubr.bf16.vlgmr.msra.gmra.mrb[24].mxu1 %v7672_v57 }
0x11a9   :  { %3648 = vmatpush1.bf16.msra.mxu1 %v7631_v3  ;;  %3679 = vmatprep.mubr.bf16.mxu1 %v8699_v48  ;;  %v7858_v3 = vld [vmem:[#allocation10 + $0xa0] ss:$16 sps:$4 sm:$0xff]  }
0x11aa   :  { %3649 = vmatprep.subr.bf16.mxu1 %v7635_v59  ;;  %v7861_v59 = vld [vmem:[#allocation10 + $0xc4] ss:$16 sps:$4 sm:$0xff]  }
0x11ad   :  { %3650 = vmatpush1.bf16.msra.mxu1 %v7638_v13  ;;  %v7864_v13 = vld [vmem:[#allocation10 + $0xc0] ss:$16 sps:$4 sm:$0xff]  }
0x11ae   :  { %3651 = vmatprep.subr.bf16.mxu1 %v7641_v1  ;;  %8778 = vst [vmem:[#allocation25_spill] sm:$0xff] %v7864_v13  ;;  %v7867_v1 = vld [vmem:[#allocation10 + $0xe4] ss:$16 sps:$4 sm:$0xff]  }
0x11af   :  { %8779 = vst [vmem:[#allocation34_spill] sm:$0xff] %v7867_v1 }
0x11b1   :  { %3652 = vmatpush1.bf16.msra.mxu1 %v7644_v52  ;;  %v7870_v52 = vld [vmem:[#allocation10 + $0xe0] ss:$16 sps:$4 sm:$0xff]  }
0x11b2   :  { %3653 = vmatprep.subr.bf16.mxu1 %v7647_v12  ;;  %8780 = vst [vmem:[#allocation33_spill] sm:$0xff] %v7870_v52  ;;  %v7873_v12 = vld [vmem:[#allocation13 + $0x40] sm:$0xff]  }
0x11b3   :  { %8781 = vst [vmem:[#allocation26_spill] sm:$0xff] %v7873_v12 }
0x11b5   :  { %3654 = vmatpush1.bf16.msra.mxu1 %v7650_v44 }
0x11b6   :  { %3655 = vmatprep.subr.bf16.mxu1 %v7653_v43  ;;  %v3093_v43 = vld [vmem:[#allocation4 + $0x40] sm:$0xff] }
0x11b7   :  { %v3096_v14 = vunpack.c.h.bf16 %v3093_v43  ;;  %v3095_v10 = vunpack.c.l.bf16 %v3093_v43 }
0x11b9   :  { %3656 = vmatpush1.bf16.msra.mxu1 %v7656_v37  ;;  %v3100_v49 = vadd.f32 %v3096_v14, %v7733_v62  ;;  %v3099_v17 = vadd.f32 %v3095_v10, %v7731_v61 }
0x11ba   :  { %3657 = vmatprep.subr.bf16.mxu1 %v7855_v55 }
0x11bb   :  { %v5673_v25 = vmul.f32 -1.442695, %v3100_v49  ;;  %v5672_v9 = vmul.f32 -1.442695, %v3099_v17 }
0x11bd   :  { %3658 = vmatpush1.bf16.msra.mxu1 %v7858_v3 }
0x11be   :  { %3659 = vmatprep.subr.bf16.mxu1 %v7861_v59 }
0x11c1   :  { %3660 = vmatpush1.bf16.msra.mxu1 %v7864_v13 }
0x11c2   :  { %3661 = vmatprep.subr.bf16.mxu1 %v7867_v1 }
0x11c5   :  { %3662 = vmatpush1.bf16.msra.mxu1 %v7870_v52 }
0x11c6   :  { %5813 = vmatprep.subr.bf16.mxu1 %v7873_v12 }
0x125b   :  { %v5785_v44 = vpop.f32.mrb[20].mxu1 }
0x125c   :  { %v5786_v37 = vpop.f32.mrb[21].mxu1 }
0x125d   :  { %v5787_v57 = vadd.f32 %v5786_v37, %v5785_v44  ;;  %v5788_v58 = vpop.f32.mrb[22].mxu1 }
0x125e   :  { %v5789_v15 = vpop.f32.mrb[23].mxu1 }
0x125f   :  { %6158 = vtanh.f32 %v5787_v57 }
0x1260   :  { %6160 = vpow2.f32 %v5673_v25 }
0x1261   :  { %6162 = vpow2.f32 %v5672_v9 }
0x1269   :  { %v6159_v24 = vpop.eup %6158 }
0x126a   :  { %v3007_v11 = vpack.c.bf16 %v6159_v24, %v6159_v24  ;;  %v6161_v19 = vpop.eup %6160 }
0x126b   :  { %v6163_v29 = vpop.eup %6162  ;;  %v3112_v53 = vadd.f32 1.0, %v6161_v19 }
0x126c   :  { %3009 = vst [vmem:[#allocation15 + $0xc] sm:$0xf] %v3007_v11  ;;  %v3106_v35 = vadd.f32 1.0, %v6163_v29 }
0x126d   :  { %6164 = vrcp.f32 %v3112_v53 }
0x126e   :  { %6166 = vrcp.f32 %v3106_v35  ;;  %v7888_v35 = vld [vmem:[#allocation13] sm:$0xff]  }
0x126f   :  { %8783 = vst [vmem:[#allocation37_spill] sm:$0xff] %v7888_v35 }
0x1277   :  { %v6165_v57 = vpop.eup %6164 }
0x1278   :  { %v6167_v58 = vpop.eup %6166  ;;  %v3122_v14 = vmul.f32 %v6165_v57, %v7669_v5  ;;  %v7900_v57 = vld [vmem:[#allocation13 + $0x8] sm:$0xff]  }
0x1279   :  { %8785 = vst [vmem:[#allocation42_spill] sm:$0xff] %v7900_v57 }
0x127b   :  { %v3085_v34 = vpop.f32.mrb[24].mxu1 }
0x127c   :  { %v3101_v40 = vadd.f32 %v3097_v16, %v3085_v34  ;;  %v3087_v62 = vpop.f32.mrb[25].mxu1 }
0x127d   :  { %v3102_v61 = vadd.f32 %v3098_v27, %v3087_v62  ;;  %v3089_v44 = vpop.f32.mrb[26].mxu1  ;;  %v7893_v62 = vld [vmem:[#allocation13 + $0x48] sm:$0xff]  }
0x127e   :  { %6168 = vtanh.f32 %v3101_v40  ;;  %v3090_v43 = vpop.f32.mrb[27].mxu1  ;;  %8784 = vst [vmem:[#allocation29_spill] sm:$0xff] %v7893_v62 }
0x127f   :  { %v5674_v37 = vmul.f32 -1.442695, %v3102_v61 }
0x1281   :  { %6170 = vpow2.f32 %v5674_v37 }
0x1288   :  { %v6169_v15 = vpop.eup %6168 }
0x1289   :  { %v3123_v10 = vmul.f32 %v6169_v15, %v6167_v58  ;;  %v7904_v15 = vld [vmem:[#allocation13 + $0x50] sm:$0xff]  }
0x128a   :  { %8786 = vst [vmem:[#allocation43_spill] sm:$0xff] %v7904_v15 }
0x128b   :  { %v6171_v49 = vpop.eup %6170  ;;  %v7879_v17 = vadd.f32 %v3123_v10, %v3122_v14 }
0x128c   :  { %v3119_v25 = vadd.f32 1.0, %v6171_v49 }
0x128d   :  { %8782 = vst [vmem:[#allocation51_spill] sm:$0xff] %v7879_v17  ;;  %6172 = vtanh.f32 %v7879_v17 }
0x128e   :  { %6174 = vrcp.f32 %v3119_v25 }
0x1297   :  { %v6173_v9 = vpop.eup %6172 }
0x1298   :  { %v6175_v24 = vpop.eup %6174 }
0x1299   :  { %v3126_v11 = vmul.f32 %v6175_v24, %v6173_v9  ;;  %v7909_v9 = vld [vmem:[#allocation13 + $0x10] sm:$0xff]   ;;  %v7912_v24 = vld [vmem:[#allocation13 + $0x58] sm:$0xff]  }
0x129a   :  { %8787 = vst [vmem:[#allocation28_spill] sm:$0xff] %v7909_v9  ;;  %8788 = vst [vmem:[#allocation44_spill] sm:$0xff] %v7912_v24 }
0x129b   :  { %v7882_v19 = vpack.c.bf16 %v3126_v11, %v3126_v11  ;;  %v3135_v63 = vrot.slane %v3126_v11, %v8758_v46  ;;  %v3128_v29 = vcombine.high %v3126_v11, %v3126_v11 }
0x129d   :  { %3680 = vmatmul.mubr.bf16.vlgmr.msra.gmra.mrb[28].mxu1 %v7882_v19  ;;  %v3151_v5 = vrot.slane %v3135_v63, %v8758_v46  ;;  %v3143_v53 = vcombine.high %v3135_v63, %v3135_v63  ;;  %v3142_v16 = vrot.slane %v3128_v29, %v8758_v46 }
0x129e   :  { %5814 = vmatpush3.bf16.msra.mxu1 %v7888_v35 }
0x129f   :  { %v3180_v27 = vrot.slane %v3151_v5, %v6959_v39  ;;  %v3165_v34 = vrot.slane %v3143_v53, %v8758_v46  ;;  %v3173_v40 = vcombine.high %v3151_v5, %v3151_v5  ;;  %5815 = vmatprep.subr.bf16.mxu1 %v7893_v62  ;;  %v3158_v37 = vrot.slane %v3142_v16, %v8758_v46  ;;  %v7918_v5 = vld [vmem:[#allocation13 + $0x18] sm:$0xff]   ;;  %v7921_v53 = vld [vmem:[#allocation13 + $0x60] sm:$0xff]  }
0x12a0   :  { %v3144_v49 = vcombine.high %v3142_v16, %v3142_v16  ;;  %8789 = vst [vmem:[#allocation45_spill] sm:$0xff] %v7918_v5  ;;  %8790 = vst [vmem:[#allocation30_spill] sm:$0xff] %v7921_v53 }
0x12a1   :  { %v3217_v61 = vmul.f32 %v6962_v42, %v3180_v27  ;;  %v3184_v44 = vrot.slane %v3165_v34, %v6959_v39  ;;  %v3188_v43 = vrot.slane %v3173_v40, %v6959_v39  ;;  %v3196_v10 = vrot.slane %v3158_v37, %v6959_v39  ;;  %v7926_v40 = vld [vmem:[#allocation13 + $0x20] sm:$0xff]  }
0x12a2   :  { %5816 = vmatpush3.bf16.msra.mxu1 %v7900_v57  ;;  %v3175_v25 = vcombine.high %v3165_v34, %v3165_v34  ;;  %v3172_v29 = vrot.slane %v3144_v49, %v8758_v46  ;;  %v3174_v16 = vcombine.high %v3158_v37, %v3158_v37  ;;  %8791 = vst [vmem:[#allocation46_spill] sm:$0xff] %v7926_v40  ;;  %v7937_v37 = vld [vmem:[#allocation13 + $0x70] sm:$0xff]  }
0x12a3   :  { %3225 = vadd.xlane.f32.xlu0 %v3217_v61  ;;  %v3218_v58 = vmul.f32 %v6970_v50, %v3184_v44  ;;  %5817 = vmatprep.subr.bf16.mxu1 %v7904_v15  ;;  %v3219_v14 = vmul.f32 %v6967_v47, %v3188_v43  ;;  %v3221_v11 = vmul.f32 %v8705_v56, %v3196_v10  ;;  %v7929_v61 = vld [vmem:[#allocation13 + $0x68] sm:$0xff]  }
0x12a4   :  { %v3192_v63 = vrot.slane %v3175_v25, %v6959_v39  ;;  %v3200_v34 = vrot.slane %v3172_v29, %v6959_v39  ;;  %8792 = vst [vmem:[#allocation47_spill] sm:$0xff] %v7929_v61  ;;  %v3204_v43 = vrot.slane %v3174_v16, %v6959_v39  ;;  %8794 = vst [vmem:[#allocation49_spill] sm:$0xff] %v7937_v37  ;;  %v7942_v25 = vld [vmem:[#allocation13 + $0x30] sm:$0xff]  }
0x12a5   :  { %3227 = vadd.xlane.f32.xlu1 %v3218_v58  ;;  %v3176_v58 = vcombine.high %v3172_v29, %v3172_v29  ;;  %8795 = vst [vmem:[#allocation31_spill] sm:$0xff] %v7942_v25  ;;  %v7949_v29 = vld [vmem:[#allocation13 + $0x38] sm:$0xff]  }
0x12a6   :  { %5818 = vmatpush3.bf16.msra.mxu1 %v7909_v9  ;;  %v3220_v27 = vmul.f32 %v8708_v51, %v3192_v63  ;;  %v3222_v44 = vmul.f32 %v8711_v45, %v3200_v34  ;;  %v3223_v10 = vmul.f32 %v6990_v33, %v3204_v43  ;;  %8797 = vst [vmem:[#allocation32_spill] sm:$0xff] %v7949_v29 }
0x12a7   :  { %3229 = vadd.xlane.f32.xlu0 %v3219_v14  ;;  %5819 = vmatprep.subr.bf16.mxu1 %v7912_v24  ;;  %v7934_v14 = vld [vmem:[#allocation13 + $0x28] sm:$0xff]   ;;  %v3208_v49 = vrot.slane %v3176_v58, %v6959_v39 }
0x12a8   :  { %8793 = vst [vmem:[#allocation48_spill] sm:$0xff] %v7934_v14 }
0x12a9   :  { %v3224_v63 = vmul.f32 %v8716_v7, %v3208_v49 }
0x12aa   :  { %5820 = vmatpush3.bf16.msra.mxu1 %v7918_v5 }
0x12ab   :  { %3233 = vadd.xlane.f32.xlu0 %v3221_v11  ;;  %5821 = vmatprep.subr.bf16.mxu1 %v7921_v53  ;;  %v7945_v11 = vld [vmem:[#allocation13 + $0x78] sm:$0xff]  }
0x12ac   :  { %8796 = vst [vmem:[#allocation50_spill] sm:$0xff] %v7945_v11 }
0x12ae   :  { %5822 = vmatpush3.bf16.msra.mxu1 %v7926_v40 }
0x12af   :  { %3231 = vadd.xlane.f32.xlu0 %v3220_v27  ;;  %5823 = vmatprep.subr.bf16.mxu1 %v7929_v61 }
0x12b2   :  { %5824 = vmatpush3.bf16.msra.mxu1 %v7934_v14 }
0x12b3   :  { %3235 = vadd.xlane.f32.xlu0 %v3222_v44  ;;  %5825 = vmatprep.subr.bf16.mxu1 %v7937_v37 }
0x12b6   :  { %5826 = vmatpush3.bf16.msra.mxu1 %v7942_v25 }
0x12b7   :  { %3237 = vadd.xlane.f32.xlu0 %v3223_v10  ;;  %5827 = vmatprep.subr.bf16.mxu1 %v7945_v11 }
0x12ba   :  { %5828 = vmatpush3.bf16.msra.mxu1 %v7949_v29 }
0x12bb   :  { %3239 = vadd.xlane.f32.xlu0 %v3224_v63  ;;  %4325 = vmatprep.subr.bf16.mxu1 %v7712_v32 }
0x1330   :  { %v3226_v16 = vpop.xlane.xlu0 %3225 }
0x1331   :  { %v3252_v10 = vrot.slane %v3226_v16, %v8718_v18 }
0x1332   :  { %v3228_v44 = vpop.xlane.xlu1 %3227 }
0x1333   :  { %v3256_v58 = vrot.slane %v3228_v44, %v8718_v18 }
0x1334   :  { %v3230_v27 = vpop.xlane.xlu0 %3229 }
0x1335   :  { %v3260_v11 = vrot.slane %v3230_v27, %v8718_v18  ;;  %v3281_v49 = vsel %vm630_vm0, %v3256_v58, %v3252_v10 }
0x1337   :  { %v3282_v63 = vsel %vm632_vm1, %v3260_v11, %v3281_v49 }
0x1338   :  { %v3234_v34 = vpop.xlane.xlu0 %3233 }
0x1339   :  { %v3268_v61 = vrot.slane %v3234_v34, %v8718_v18 }
0x133c   :  { %v3232_v43 = vpop.xlane.xlu0 %3231 }
0x133d   :  { %v3264_v37 = vrot.slane %v3232_v43, %v8718_v18 }
0x133f   :  { %v3283_v32 = vsel %vm634_vm2, %v3264_v37, %v3282_v63 }
0x1340   :  { %v3236_v25 = vpop.xlane.xlu0 %3235  ;;  %v3284_v53 = vsel %vm636_vm3, %v3268_v61, %v3283_v32 }
0x1341   :  { %v3272_v14 = vrot.slane %v3236_v25, %v8718_v18 }
0x1343   :  { %v3285_v24 = vsel %vm638_vm4, %v3272_v14, %v3284_v53 }
0x1344   :  { %v3238_v29 = vpop.xlane.xlu0 %3237 }
0x1345   :  { %v3276_v40 = vrot.slane %v3238_v29, %v8718_v18 }
0x1347   :  { %v3286_v10 = vsel %vm640_vm5, %v3276_v40, %v3285_v24 }
0x1348   :  { %v3240_v5 = vpop.xlane.xlu0 %3239 }
0x1349   :  { %v3280_v58 = vrot.slane %v3240_v5, %v8718_v18 }
0x134b   :  { %v3287_v11 = vsel %vm642_vm6, %v3280_v58, %v3286_v10 }
0x134c   :  { %v3289_v49 = vsel %vm645_vm7, %v3287_v11, -inf  ;;  %v8800_v11 = vld [vmem:[#allocation39_spill] sm:$0xff] }
0x134d   :  { %3290 = vmax.xlane.f32.xlu0 %v3289_v49 }
0x1370   :  { %v7969_v37 = vpop.f32.mrb[28].mxu1 }
0x1371   :  { %8798 = vst [vmem:[#allocation35_spill] sm:$0xff] %v7969_v37  ;;  %v7971_v63 = vpop.f32.mrb[29].mxu1 }
0x1372   :  { %8799 = vst [vmem:[#allocation36_spill] sm:$0xff] %v7971_v63  ;;  %v3685_v9 = vpop.f32.mrb[30].mxu1  ;;  %v8802_v63 = vld [vmem:[#allocation41_spill] sm:$0xff] }
0x1373   :  { %v3686_v15 = vpop.f32.mrb[31].mxu1 }
0x1374   :  { %v8801_v15 = vld [vmem:[#allocation40_spill] sm:$0xff] }
0x13da   :  { %v3291_v57 = vpop.xlane.xlu0 %3290 }
0x13db   :  { %v3296_v61 = vrot.slane %v3291_v57, %v6959_v39  ;;  %v3300_v53 = vrot.slane %v3291_v57, %v8719_v54  ;;  %v3304_v14 = vrot.slane %v3291_v57, %v8720_v0  ;;  %v3308_v24 = vrot.slane %v3291_v57, %v8723_v22 }
0x13dc   :  { %v3312_v40 = vrot.slane %v3291_v57, %v8775_v26  ;;  %v3316_v49 = vrot.slane %v3291_v57, %v8800_v11  ;;  %v3320_v46 = vrot.slane %v3291_v57, %v8801_v15  ;;  %v3324_v12 = vrot.slane %v3291_v57, %v8802_v63 }
0x13dd   :  { %v3333_v32 = vsub.f32 %v3226_v16, %v3296_v61  ;;  %v3334_v58 = vsub.f32 %v3228_v44, %v3300_v53  ;;  %v3335_v10 = vsub.f32 %v3230_v27, %v3304_v14  ;;  %v3336_v62 = vsub.f32 %v3232_v43, %v3308_v24 }
0x13de   :  { %v3337_v17 = vsub.f32 %v3234_v34, %v3312_v40  ;;  %v3338_v52 = vsub.f32 %v3236_v25, %v3316_v49  ;;  %v3339_v13 = vsub.f32 %v3238_v29, %v3320_v46  ;;  %v3340_v44 = vsub.f32 %v3240_v5, %v3324_v12 }
0x13df   :  { %v3341_v35 = vmul.f32 1.442695, %v3333_v32  ;;  %v3343_v9 = vmul.f32 1.442695, %v3334_v58  ;;  %v3345_v37 = vmul.f32 1.442695, %v3335_v10 }
0x13e0   :  { %v3347_v1 = vmul.f32 1.442695, %v3336_v62  ;;  %v3349_v16 = vmul.f32 1.442695, %v3337_v17  ;;  %v3351_v27 = vmul.f32 1.442695, %v3338_v52 }
0x13e1   :  { %6176 = vpow2.f32 %v3341_v35  ;;  %v3353_v43 = vmul.f32 1.442695, %v3339_v13  ;;  %v3355_v61 = vmul.f32 1.442695, %v3340_v44 }
0x13e2   :  { %6178 = vpow2.f32 %v3343_v9 }
0x13e3   :  { %6180 = vpow2.f32 %v3345_v37 }
0x13e4   :  { %6182 = vpow2.f32 %v3347_v1 }
0x13e5   :  { %6184 = vpow2.f32 %v3349_v16 }
0x13e6   :  { %6186 = vpow2.f32 %v3351_v27 }
0x13e7   :  { %6188 = vpow2.f32 %v3353_v43 }
0x13e8   :  { %6190 = vpow2.f32 %v3355_v61 }
0x13eb   :  { %v6177_v53 = vpop.eup %6176 }
0x13ec   :  { %v6179_v14 = vpop.eup %6178  ;;  %3366 = vperm.xlu0 %5895, %v6177_v53  }
0x13ed   :  { %3369 = vperm.xlu1 %5894, %v6179_v14   ;;  %v6181_v35 = vpop.eup %6180 }
0x13ee   :  { %v6183_v57 = vpop.eup %6182 }
0x13ef   :  { %v7981_v46 = vpop.eup %6184 }
0x13f0   :  { %3372 = vperm.xlu0 %5895, %v6181_v35   ;;  %v7983_v17 = vpop.eup %6186 }
0x13f1   :  { %3375 = vperm.xlu1 %5894, %v6183_v57   ;;  %v7987_v13 = vpop.eup %6188 }
0x13f2   :  { %v7989_v1 = vpop.eup %6190 }
0x13f4   :  { %3378 = vperm.xlu0 %5895, %v7981_v46  }
0x13f5   :  { %3381 = vperm.xlu1 %5894, %v7983_v17  }
0x13f8   :  { %3384 = vperm.xlu0 %5895, %v7987_v13  }
0x13f9   :  { %3387 = vperm.xlu1 %5894, %v7989_v1  }
0x146b   :  { %v3367_v52 = vpop.permute.xlu0 %3366 }
0x146c   :  { %v3370_v12 = vpop.permute.xlu1 %3369  ;;  %v3392_v5 = vrot.slane %v3367_v52, %v8718_v18 }
0x146d   :  { %v3396_v62 = vrot.slane %v3370_v12, %v8718_v18 }
0x146f   :  { %v3373_v25 = vpop.permute.xlu0 %3372  ;;  %v3421_v37 = vsel %vm630_vm0, %v3396_v62, %v3392_v5 }
0x1470   :  { %v3376_v29 = vpop.permute.xlu1 %3375  ;;  %v3400_v34 = vrot.slane %v3373_v25, %v8718_v18 }
0x1471   :  { %v3404_v24 = vrot.slane %v3376_v29, %v8718_v18 }
0x1472   :  { %v3422_v40 = vsel %vm632_vm1, %v3400_v34, %v3421_v37 }
0x1473   :  { %v3379_v32 = vpop.permute.xlu0 %3378  ;;  %v3423_v9 = vsel %vm634_vm2, %v3404_v24, %v3422_v40 }
0x1474   :  { %v3382_v58 = vpop.permute.xlu1 %3381  ;;  %v3408_v10 = vrot.slane %v3379_v32, %v8718_v18 }
0x1475   :  { %v3412_v49 = vrot.slane %v3382_v58, %v8718_v18 }
0x1476   :  { %v3424_v16 = vsel %vm636_vm3, %v3408_v10, %v3423_v9 }
0x1477   :  { %v3385_v44 = vpop.permute.xlu0 %3384  ;;  %v3425_v52 = vsel %vm638_vm4, %v3412_v49, %v3424_v16 }
0x1478   :  { %v3388_v27 = vpop.permute.xlu1 %3387  ;;  %v3416_v43 = vrot.slane %v3385_v44, %v8718_v18 }
0x1479   :  { %v3420_v61 = vrot.slane %v3388_v27, %v8718_v18 }
0x147a   :  { %v3426_v12 = vsel %vm640_vm5, %v3416_v43, %v3425_v52 }
0x147b   :  { %v3427_v62 = vsel %vm642_vm6, %v3420_v61, %v3426_v12 }
0x147c   :  { %v3429_v5 = vsel %vm645_vm7, %v3427_v62, 0.0 }
0x147d   :  { %3430 = vadd.xlane.f32.xlu0 %v3429_v5 }
0x150a   :  { %v3431_v25 = vpop.xlane.xlu0 %3430 }
0x150b   :  { %v3436_v29 = vrot.slane %v3431_v25, %v6959_v39  ;;  %v3440_v34 = vrot.slane %v3431_v25, %v8719_v54  ;;  %v3444_v37 = vrot.slane %v3431_v25, %v8720_v0  ;;  %v3448_v24 = vrot.slane %v3431_v25, %v8723_v22 }
0x150c   :  { %v3452_v32 = vrot.slane %v3431_v25, %v8775_v26  ;;  %v3456_v49 = vrot.slane %v3431_v25, %v8800_v11  ;;  %v3460_v44 = vrot.slane %v3431_v25, %v8801_v15  ;;  %v3464_v61 = vrot.slane %v3431_v25, %v8802_v63 }
0x150d   :  { %6192 = vrcp.f32 %v3436_v29 }
0x150e   :  { %6194 = vrcp.f32 %v3440_v34 }
0x150f   :  { %6196 = vrcp.f32 %v3444_v37 }
0x1510   :  { %6198 = vrcp.f32 %v3448_v24 }
0x1511   :  { %6200 = vrcp.f32 %v3452_v32 }
0x1512   :  { %6202 = vrcp.f32 %v3456_v49 }
0x1513   :  { %6204 = vrcp.f32 %v3460_v44 }
0x1514   :  { %6206 = vrcp.f32 %v3464_v61 }
0x1517   :  { %v6193_v40 = vpop.eup %6192 }
0x1518   :  { %v3474_v58 = vmul.f32 %v6193_v40, %v6177_v53  ;;  %v6195_v10 = vpop.eup %6194 }
0x1519   :  { %v3476_v9 = vmul.f32 %v6195_v10, %v6179_v14  ;;  %v6197_v16 = vpop.eup %6196 }
0x151a   :  { %3491 = vperm.xlu1 %5894, %v3474_v58   ;;  %v3478_v27 = vmul.f32 %v6197_v16, %v6181_v35  ;;  %v6199_v43 = vpop.eup %6198 }
0x151b   :  { %v3480_v52 = vmul.f32 %v6199_v43, %v6183_v57  ;;  %v6201_v12 = vpop.eup %6200 }
0x151c   :  { %v3482_v53 = vmul.f32 %v6201_v12, %v7981_v46  ;;  %v6203_v62 = vpop.eup %6202 }
0x151d   :  { %v3484_v14 = vmul.f32 %v6203_v62, %v7983_v17  ;;  %v6205_v5 = vpop.eup %6204 }
0x151e   :  { %3496 = vperm.xlu1 %5894, %v3476_v9   ;;  %v3486_v29 = vmul.f32 %v6205_v5, %v7987_v13  ;;  %v6207_v35 = vpop.eup %6206 }
0x151f   :  { %v3488_v34 = vmul.f32 %v6207_v35, %v7989_v1 }
0x1522   :  { %3501 = vperm.xlu1 %5894, %v3478_v27  }
0x1526   :  { %3506 = vperm.xlu1 %5894, %v3480_v52  }
0x152a   :  { %3511 = vperm.xlu1 %5894, %v3482_v53  }
0x152e   :  { %3516 = vperm.xlu1 %5894, %v3484_v14  }
0x1532   :  { %3521 = vperm.xlu1 %5894, %v3486_v29  }
0x1536   :  { %3526 = vperm.xlu1 %5894, %v3488_v34  }
0x1599   :  { %v3492_v25 = vpop.permute.xlu1 %3491 }
0x159a   :  { %v3529_v40 = vmul.f32 %v6962_v42, %v3492_v25 }
0x159c   :  { %v3537_v13 = vrot.slane %v3529_v40, 4 }
0x159d   :  { %v3497_v57 = vpop.permute.xlu1 %3496 }
0x159e   :  { %v3530_v24 = vmul.f32 %v6970_v50, %v3497_v57  ;;  %v3538_v27 = vadd.f32 %v3537_v13, %v3529_v40 }
0x15a0   :  { %v3543_v17 = vrot.slane %v3530_v24, 4  ;;  %v3539_v5 = vrot.slane %v3538_v27, 2 }
0x15a1   :  { %v3502_v37 = vpop.permute.xlu1 %3501 }
0x15a2   :  { %v3531_v46 = vmul.f32 %v6967_v47, %v3502_v37  ;;  %v3544_v16 = vadd.f32 %v3543_v17, %v3530_v24 }
0x15a4   :  { %v3549_v10 = vrot.slane %v3531_v46, 4  ;;  %v3545_v12 = vrot.slane %v3544_v16, 2 }
0x15a5   :  { %v3507_v32 = vpop.permute.xlu1 %3506 }
0x15a6   :  { %v3532_v58 = vmul.f32 %v8708_v51, %v3507_v32  ;;  %v3550_v44 = vadd.f32 %v3549_v10, %v3531_v46  ;;  %v3546_v57 = vadd.f32 %v3545_v12, %v3544_v16  ;;  %v3540_v46 = vadd.f32 %v3539_v5, %v3538_v27 }
0x15a8   :  { %v3555_v49 = vrot.slane %v3532_v58, 4  ;;  %v3551_v14 = vrot.slane %v3550_v44, 2  ;;  %v3541_v63 = vrot.slane %v3540_v46, 1 }
0x15a9   :  { %v3512_v9 = vpop.permute.xlu1 %3511 }
0x15aa   :  { %v3533_v1 = vmul.f32 %v8705_v56, %v3512_v9  ;;  %v3556_v43 = vadd.f32 %v3555_v49, %v3532_v58  ;;  %v3552_v32 = vadd.f32 %v3551_v14, %v3550_v44  ;;  %v3547_v49 = vrot.slane %v3546_v57, 1 }
0x15ab   :  { %v3542_v14 = vadd.f32 %v3541_v63, %v3540_v46 }
0x15ac   :  { %v3561_v61 = vrot.slane %v3533_v1, 4  ;;  %v3557_v29 = vrot.slane %v3556_v43, 2 }
0x15ad   :  { %v3517_v52 = vpop.permute.xlu1 %3516 }
0x15ae   :  { %v3562_v53 = vadd.f32 %v3561_v61, %v3533_v1  ;;  %v3534_v62 = vmul.f32 %v8711_v45, %v3517_v52  ;;  %v3558_v40 = vadd.f32 %v3557_v29, %v3556_v43  ;;  %v3553_v52 = vrot.slane %v3552_v32, 1 }
0x15b0   :  { %v3567_v35 = vrot.slane %v3534_v62, 4  ;;  %v3563_v34 = vrot.slane %v3562_v53, 2  ;;  %v3559_v15 = vrot.slane %v3558_v40, 1  ;;  %v3554_v43 = vadd.f32 %v3553_v52, %v3552_v32 }
0x15b1   :  { %v3522_v25 = vpop.permute.xlu1 %3521 }
0x15b2   :  { %v3568_v37 = vadd.f32 %v3567_v35, %v3534_v62  ;;  %v3535_v24 = vmul.f32 %v6990_v33, %v3522_v25  ;;  %v3564_v10 = vadd.f32 %v3563_v34, %v3562_v53  ;;  %v3548_v62 = vadd.f32 %v3547_v49, %v3546_v57 }
0x15b3   :  { %v3560_v5 = vadd.f32 %v3559_v15, %v3558_v40  ;;  %v8037_v40 = vld [vmem:[#allocation10 + $0x8] ss:$16 sps:$4 sm:$0xff]  }
0x15b4   :  { %v3569_v17 = vrot.slane %v3568_v37, 2  ;;  %v3573_v58 = vrot.slane %v3535_v24, 4  ;;  %v3565_v12 = vrot.slane %v3564_v10, 1  ;;  %v3593_v25 = vsel %vm630_vm0, %v3548_v62, %v3542_v14 }
0x15b5   :  { %v3527_v13 = vpop.permute.xlu1 %3526 }
0x15b6   :  { %v3570_v9 = vadd.f32 %v3569_v17, %v3568_v37  ;;  %v3574_v1 = vadd.f32 %v3573_v58, %v3535_v24  ;;  %v3536_v61 = vmul.f32 %v8716_v7, %v3527_v13  ;;  %v3566_v34 = vadd.f32 %v3565_v12, %v3564_v10 }
0x15b7   :  { %v3594_v17 = vsel %vm632_vm1, %v3554_v43, %v3593_v25  ;;  %v3731_v43 = vld [vmem:[#allocation4 + $0x58] sm:$0xff] }
0x15b8   :  { %v3575_v11 = vrot.slane %v3574_v1, 2  ;;  %v3579_v16 = vrot.slane %v3536_v61, 4  ;;  %v3571_v35 = vrot.slane %v3570_v9, 1  ;;  %v3595_v13 = vsel %vm634_vm2, %v3560_v5, %v3594_v17 }
0x15b9   :  { %v3596_v57 = vsel %vm636_vm3, %v3566_v34, %v3595_v13  ;;  %v3735_v34 = vunpack.c.h.bf16 %v3731_v43 }
0x15ba   :  { %v3576_v44 = vadd.f32 %v3575_v11, %v3574_v1  ;;  %v3580_v27 = vadd.f32 %v3579_v16, %v3536_v61  ;;  %v3572_v37 = vadd.f32 %v3571_v35, %v3570_v9 }
0x15bc   :  { %v3577_v53 = vrot.slane %v3576_v44, 1  ;;  %v3581_v29 = vrot.slane %v3580_v27, 2  ;;  %v3597_v32 = vsel %vm638_vm4, %v3572_v37, %v3596_v57 }
0x15be   :  { %v3582_v24 = vadd.f32 %v3581_v29, %v3580_v27  ;;  %v3578_v58 = vadd.f32 %v3577_v53, %v3576_v44  ;;  %v3734_v53 = vunpack.c.l.bf16 %v3731_v43 }
0x15c0   :  { %v3583_v26 = vrot.slane %v3582_v24, 1  ;;  %v3598_v63 = vsel %vm640_vm5, %v3578_v58, %v3597_v32 }
0x15c2   :  { %v3584_v11 = vadd.f32 %v3583_v26, %v3582_v24  ;;  %v8055_v26 = vld [vmem:[#allocation10 + $0x4] ss:$16 sps:$4 sm:$0xff]  }
0x15c4   :  { %v3599_v15 = vsel %vm642_vm6, %v3584_v11, %v3598_v63 }
0x15c5   :  { %v3602_v46 = vpack.c.bf16 %v3599_v15, %v3599_v15  ;;  %v8809_v15 = vld [vmem:[#allocation51_spill] sm:$0xff] }
0x15c7   :  { %3635 = vmatprep.mubr.bf16.mxu0 %v3602_v46 }
0x15c8   :  { %3636 = vmatmul.mubr.bf16.vlgmr.msra.gmra.mrb[28].mxu0 %v7882_v19 }
0x15c9   :  { %3689 = vmatpush1.bf16.msra.mxu0 %v8037_v40  ;;  %3720 = vmatprep.mubr.bf16.mxu0 %v8699_v48 }
0x15ca   :  { %3690 = vmatprep.subr.bf16.mxu0 %v7801_v6  ;;  %v8059_v6 = vld [vmem:[#allocation10] ss:$16 sps:$4 sm:$0xff]  }
0x15cd   :  { %3691 = vmatpush1.bf16.msra.mxu0 %v7804_v20  ;;  %v8063_v20 = vld [vmem:[#allocation10 + $0x24] ss:$16 sps:$4 sm:$0xff]  }
0x15ce   :  { %3692 = vmatprep.subr.bf16.mxu0 %v7807_v23  ;;  %v8066_v23 = vld [vmem:[#allocation10 + $0x20] ss:$16 sps:$4 sm:$0xff]  }
0x15d1   :  { %3693 = vmatpush1.bf16.msra.mxu0 %v7810_v31  ;;  %v8069_v31 = vld [vmem:[#allocation10 + $0x44] ss:$16 sps:$4 sm:$0xff]  }
0x15d2   :  { %3694 = vmatprep.subr.bf16.mxu0 %v7813_v30  ;;  %v8072_v30 = vld [vmem:[#allocation10 + $0x40] ss:$16 sps:$4 sm:$0xff]  }
0x15d5   :  { %3695 = vmatpush1.bf16.msra.mxu0 %v7816_v41  ;;  %v8075_v41 = vld [vmem:[#allocation10 + $0x64] ss:$16 sps:$4 sm:$0xff]  }
0x15d6   :  { %3696 = vmatprep.subr.bf16.mxu0 %v7819_v36  ;;  %v8078_v36 = vld [vmem:[#allocation10 + $0x60] ss:$16 sps:$4 sm:$0xff]  }
0x15d9   :  { %3697 = vmatpush1.bf16.msra.mxu0 %v7822_v2  ;;  %v8081_v2 = vld [vmem:[#allocation10 + $0x84] ss:$16 sps:$4 sm:$0xff]  }
0x15da   :  { %3698 = vmatprep.subr.bf16.mxu0 %v7825_v8  ;;  %v8084_v8 = vld [vmem:[#allocation10 + $0x80] ss:$16 sps:$4 sm:$0xff]  }
0x15dd   :  { %3699 = vmatpush1.bf16.msra.mxu0 %v7828_v38  ;;  %v8803_v38 = vld [vmem:[#allocation25_spill] sm:$0xff] }
0x15de   :  { %3700 = vmatprep.subr.bf16.mxu0 %v7831_v28  ;;  %v8804_v28 = vld [vmem:[#allocation34_spill] sm:$0xff] }
0x15e1   :  { %3701 = vmatpush1.bf16.msra.mxu0 %v7834_v60  ;;  %v8805_v60 = vld [vmem:[#allocation33_spill] sm:$0xff] }
0x15e2   :  { %3702 = vmatprep.subr.bf16.mxu0 %v7837_v4  ;;  %v8806_v4 = vld [vmem:[#allocation26_spill] sm:$0xff] }
0x15e5   :  { %3703 = vmatpush1.bf16.msra.mxu0 %v7840_v21 }
0x15e6   :  { %4284 = vmatprep.subr.bf16.mxu0 %v8055_v26 }
0x15e8   :  { %3721 = vmatmul.mubr.bf16.vlgmr.msra.gmra.mrb[32].mxu0 %v7882_v19  ;;  %v3730_v19 = vld [vmem:[#allocation4 + $0x50] sm:$0xff] }
0x15e9   :  { %4285 = vmatpush1.bf16.msra.mxu0 %v8059_v6  ;;  %4316 = vmatprep.mubr.bf16.mxu0 %v8699_v48  ;;  %v3733_v61 = vunpack.c.h.bf16 %v3730_v19 }
0x15ea   :  { %4286 = vmatprep.subr.bf16.mxu0 %v8063_v20 }
0x15ed   :  { %4287 = vmatpush1.bf16.msra.mxu0 %v8066_v23 }
0x15ee   :  { %4288 = vmatprep.subr.bf16.mxu0 %v8069_v31 }
0x15f1   :  { %4289 = vmatpush1.bf16.msra.mxu0 %v8072_v30 }
0x15f2   :  { %4290 = vmatprep.subr.bf16.mxu0 %v8075_v41 }
0x15f5   :  { %4291 = vmatpush1.bf16.msra.mxu0 %v8078_v36 }
0x15f6   :  { %4292 = vmatprep.subr.bf16.mxu0 %v8081_v2 }
0x15f9   :  { %4293 = vmatpush1.bf16.msra.mxu0 %v8084_v8 }
0x15fa   :  { %4294 = vmatprep.subr.bf16.mxu0 %v7855_v55  ;;  %v3732_v55 = vunpack.c.l.bf16 %v3730_v19 }
0x15fd   :  { %4295 = vmatpush1.bf16.msra.mxu0 %v7858_v3  ;;  %v8807_v3 = vld [vmem:[#allocation36_spill] sm:$0xff] }
0x15fe   :  { %4296 = vmatprep.subr.bf16.mxu0 %v7861_v59  ;;  %v3737_v52 = vadd.f32 %v3733_v61, %v8807_v3  ;;  %v8808_v59 = vld [vmem:[#allocation35_spill] sm:$0xff] }
0x15ff   :  { %v3736_v16 = vadd.f32 %v3732_v55, %v8808_v59  ;;  %v8811_v59 = vld [vmem:[#allocation37_spill] sm:$0xff] }
0x1600   :  { %v5676_v12 = vmul.f32 -1.442695, %v3737_v52 }
0x1601   :  { %4297 = vmatpush1.bf16.msra.mxu0 %v8803_v38  ;;  %v5675_v62 = vmul.f32 -1.442695, %v3736_v16 }
0x1602   :  { %4298 = vmatprep.subr.bf16.mxu0 %v8804_v28 }
0x1605   :  { %4299 = vmatpush1.bf16.msra.mxu0 %v8805_v60 }
0x1606   :  { %5835 = vmatprep.subr.bf16.mxu0 %v8806_v4 }
0x169b   :  { %v5807_v21 = vpop.f32.mrb[28].mxu0 }
0x169c   :  { %v5808_v10 = vpop.f32.mrb[29].mxu0 }
0x169d   :  { %v5809_v49 = vadd.f32 %v5808_v10, %v5807_v21  ;;  %v5810_v9 = vpop.f32.mrb[30].mxu0 }
0x169e   :  { %v5811_v1 = vpop.f32.mrb[31].mxu0  ;;  %v8810_v9 = vld [vmem:[#allocation27_spill] sm:$0xff] }
0x169f   :  { %6208 = vtanh.f32 %v5809_v49 }
0x16a0   :  { %6210 = vpow2.f32 %v5676_v12 }
0x16a1   :  { %6212 = vpow2.f32 %v5675_v62 }
0x16a9   :  { %v6209_v35 = vpop.eup %6208 }
0x16aa   :  { %v3644_v44 = vpack.c.bf16 %v6209_v35, %v6209_v35  ;;  %v6211_v27 = vpop.eup %6210  ;;  %v8812_v35 = vld [vmem:[#allocation29_spill] sm:$0xff] }
0x16ab   :  { %v6213_v14 = vpop.eup %6212  ;;  %v3749_v5 = vadd.f32 1.0, %v6211_v27 }
0x16ac   :  { %3646 = vst [vmem:[#allocation15 + $0x10] sm:$0xf] %v3644_v44  ;;  %v3743_v29 = vadd.f32 1.0, %v6213_v14 }
0x16ad   :  { %6214 = vrcp.f32 %v3749_v5  ;;  %v8813_v5 = vld [vmem:[#allocation42_spill] sm:$0xff] }
0x16ae   :  { %6216 = vrcp.f32 %v3743_v29  ;;  %v8814_v29 = vld [vmem:[#allocation43_spill] sm:$0xff] }
0x16b7   :  { %v6215_v11 = vpop.eup %6214 }
0x16b8   :  { %v6217_v32 = vpop.eup %6216  ;;  %v3759_v46 = vmul.f32 %v6215_v11, %v8809_v15 }
0x16bb   :  { %v3722_v25 = vpop.f32.mrb[32].mxu0 }
0x16bc   :  { %v3738_v37 = vadd.f32 %v3734_v53, %v3722_v25  ;;  %v3724_v24 = vpop.f32.mrb[33].mxu0 }
0x16bd   :  { %v3739_v17 = vadd.f32 %v3735_v34, %v3724_v24  ;;  %v3726_v58 = vpop.f32.mrb[34].mxu0 }
0x16be   :  { %6218 = vtanh.f32 %v3738_v37  ;;  %v3727_v13 = vpop.f32.mrb[35].mxu0  ;;  %v8816_v58 = vld [vmem:[#allocation44_spill] sm:$0xff] }
0x16bf   :  { %v5677_v57 = vmul.f32 -1.442695, %v3739_v17  ;;  %v8815_v17 = vld [vmem:[#allocation28_spill] sm:$0xff] }
0x16c1   :  { %6220 = vpow2.f32 %v5677_v57 }
0x16c8   :  { %v6219_v63 = vpop.eup %6218 }
0x16c9   :  { %v3760_v38 = vmul.f32 %v6219_v63, %v6217_v32  ;;  %v8817_v32 = vld [vmem:[#allocation45_spill] sm:$0xff]  ;;  %v8818_v63 = vld [vmem:[#allocation30_spill] sm:$0xff] }
0x16cb   :  { %v6221_v28 = vpop.eup %6220  ;;  %v8097_v60 = vadd.f32 %v3760_v38, %v3759_v46 }
0x16cc   :  { %v3756_v4 = vadd.f32 1.0, %v6221_v28  ;;  %v8819_v28 = vld [vmem:[#allocation46_spill] sm:$0xff] }
0x16cd   :  { %6222 = vtanh.f32 %v8097_v60 }
0x16ce   :  { %6224 = vrcp.f32 %v3756_v4  ;;  %v8820_v4 = vld [vmem:[#allocation47_spill] sm:$0xff] }
0x16d7   :  { %v6223_v21 = vpop.eup %6222 }
0x16d8   :  { %v6225_v19 = vpop.eup %6224 }
0x16d9   :  { %v3763_v10 = vmul.f32 %v6225_v19, %v6223_v21 }
0x16db   :  { %v8100_v49 = vpack.c.bf16 %v3763_v10, %v3763_v10  ;;  %v3772_v1 = vrot.slane %v3763_v10, %v8810_v9  ;;  %v3765_v61 = vcombine.high %v3763_v10, %v3763_v10 }
0x16dd   :  { %4317 = vmatmul.mubr.bf16.vlgmr.msra.gmra.mrb[36].mxu0 %v8100_v49  ;;  %v3788_v55 = vrot.slane %v3772_v1, %v8810_v9  ;;  %v3780_v3 = vcombine.high %v3772_v1, %v3772_v1  ;;  %v3779_v52 = vrot.slane %v3765_v61, %v8810_v9  ;;  %v8821_v1 = vld [vmem:[#allocation48_spill] sm:$0xff]  ;;  %v8822_v61 = vld [vmem:[#allocation49_spill] sm:$0xff] }
0x16de   :  { %5836 = vmatpush3.bf16.msra.mxu0 %v8811_v59  ;;  %v8824_v59 = vld [vmem:[#allocation50_spill] sm:$0xff] }
0x16df   :  { %v3817_v16 = vrot.slane %v3788_v55, %v6959_v39  ;;  %v3802_v12 = vrot.slane %v3780_v3, %v8810_v9  ;;  %v3810_v62 = vcombine.high %v3788_v55, %v3788_v55  ;;  %5837 = vmatprep.subr.bf16.mxu0 %v8812_v35  ;;  %v3795_v14 = vrot.slane %v3779_v52, %v8810_v9 }
0x16e0   :  { %v3781_v24 = vcombine.high %v3779_v52, %v3779_v52  ;;  %v8823_v52 = vld [vmem:[#allocation31_spill] sm:$0xff] }
0x16e1   :  { %v3854_v44 = vmul.f32 %v6962_v42, %v3817_v16  ;;  %v3821_v27 = vrot.slane %v3802_v12, %v6959_v39  ;;  %v3825_v43 = vrot.slane %v3810_v62, %v6959_v39  ;;  %v3833_v25 = vrot.slane %v3795_v14, %v6959_v39  ;;  %v6467_v62 = vld [vmem:[#allocation10 + $0xc] ss:$16 sps:$4 sm:$0xff]  }
0x16e2   :  { %5838 = vmatpush3.bf16.msra.mxu0 %v8813_v5  ;;  %v3812_v37 = vcombine.high %v3802_v12, %v3802_v12  ;;  %v3809_v11 = vrot.slane %v3781_v24, %v8810_v9  ;;  %v3811_v38 = vcombine.high %v3795_v14, %v3795_v14  ;;  %v8825_v12 = vld [vmem:[#allocation32_spill] sm:$0xff] }
0x16e3   :  { %3862 = vadd.xlane.f32.xlu0 %v3854_v44  ;;  %v3855_v53 = vmul.f32 %v6970_v50, %v3821_v27  ;;  %5839 = vmatprep.subr.bf16.mxu0 %v8814_v29  ;;  %v3856_v34 = vmul.f32 %v6967_v47, %v3825_v43  ;;  %v3858_v13 = vmul.f32 %v8705_v56, %v3833_v25 }
0x16e4   :  { %v3829_v57 = vrot.slane %v3812_v37, %v6959_v39  ;;  %v3837_v46 = vrot.slane %v3809_v11, %v6959_v39  ;;  %v3841_v19 = vrot.slane %v3811_v38, %v6959_v39  ;;  %v3813_v10 = vcombine.high %v3809_v11, %v3809_v11 }
0x16e5   :  { %3864 = vadd.xlane.f32.xlu1 %v3855_v53 }
0x16e6   :  { %5840 = vmatpush3.bf16.msra.mxu0 %v8815_v17  ;;  %v3857_v15 = vmul.f32 %v8708_v51, %v3829_v57  ;;  %v3859_v21 = vmul.f32 %v8711_v45, %v3837_v46  ;;  %v3860_v55 = vmul.f32 %v6990_v33, %v3841_v19  ;;  %v3845_v3 = vrot.slane %v3813_v10, %v6959_v39 }
0x16e7   :  { %3866 = vadd.xlane.f32.xlu0 %v3856_v34  ;;  %5841 = vmatprep.subr.bf16.mxu0 %v8816_v58 }
0x16e8   :  { %v3861_v16 = vmul.f32 %v8716_v7, %v3845_v3 }
0x16ea   :  { %5842 = vmatpush3.bf16.msra.mxu0 %v8817_v32 }
0x16eb   :  { %3870 = vadd.xlane.f32.xlu0 %v3858_v13  ;;  %5843 = vmatprep.subr.bf16.mxu0 %v8818_v63 }
0x16ee   :  { %5844 = vmatpush3.bf16.msra.mxu0 %v8819_v28 }
0x16ef   :  { %3868 = vadd.xlane.f32.xlu0 %v3857_v15  ;;  %5845 = vmatprep.subr.bf16.mxu0 %v8820_v4 }
0x16f2   :  { %5846 = vmatpush3.bf16.msra.mxu0 %v8821_v1 }
0x16f3   :  { %3872 = vadd.xlane.f32.xlu0 %v3859_v21  ;;  %5847 = vmatprep.subr.bf16.mxu0 %v8822_v61 }
0x16f6   :  { %5848 = vmatpush3.bf16.msra.mxu0 %v8823_v52 }
0x16f7   :  { %3874 = vadd.xlane.f32.xlu0 %v3860_v55  ;;  %5849 = vmatprep.subr.bf16.mxu0 %v8824_v59 }
0x16fa   :  { %5850 = vmatpush3.bf16.msra.mxu0 %v8825_v12 }
0x16fb   :  { %3876 = vadd.xlane.f32.xlu0 %v3861_v16  ;;  %4962 = vmatprep.subr.bf16.mxu0 %v6467_v62  ;;  %v8826_v16 = vld [vmem:[#allocation38_spill] sm:$0xff] }
0x1770   :  { %v3863_v35 = vpop.xlane.xlu0 %3862 }
0x1771   :  { %v3889_v53 = vrot.slane %v3863_v35, %v8718_v18 }
0x1772   :  { %v3865_v43 = vpop.xlane.xlu1 %3864 }
0x1773   :  { %v3893_v5 = vrot.slane %v3865_v43, %v8718_v18 }
0x1774   :  { %v3867_v44 = vpop.xlane.xlu0 %3866 }
0x1775   :  { %v3897_v29 = vrot.slane %v3867_v44, %v8718_v18  ;;  %v3918_v25 = vsel %vm630_vm0, %v3893_v5, %v3889_v53 }
0x1777   :  { %v3919_v24 = vsel %vm632_vm1, %v3897_v29, %v3918_v25  ;;  %v8827_v29 = vld [vmem:[#allocation39_spill] sm:$0xff] }
0x1778   :  { %v3871_v27 = vpop.xlane.xlu0 %3870 }
0x1779   :  { %v3905_v57 = vrot.slane %v3871_v27, %v8718_v18 }
0x177c   :  { %v3869_v14 = vpop.xlane.xlu0 %3868 }
0x177d   :  { %v3901_v37 = vrot.slane %v3869_v14, %v8718_v18 }
0x177f   :  { %v3920_v58 = vsel %vm634_vm2, %v3901_v37, %v3919_v24 }
0x1780   :  { %v3873_v34 = vpop.xlane.xlu0 %3872  ;;  %v3921_v32 = vsel %vm636_vm3, %v3905_v57, %v3920_v58 }
0x1781   :  { %v3909_v13 = vrot.slane %v3873_v34, %v8718_v18 }
0x1783   :  { %v3922_v15 = vsel %vm638_vm4, %v3909_v13, %v3921_v32  ;;  %v8828_v13 = vld [vmem:[#allocation40_spill] sm:$0xff] }
0x1784   :  { %v3875_v17 = vpop.xlane.xlu0 %3874 }
0x1785   :  { %v3913_v11 = vrot.slane %v3875_v17, %v8718_v18 }
0x1787   :  { %v3923_v38 = vsel %vm640_vm5, %v3913_v11, %v3922_v15  ;;  %v8829_v15 = vld [vmem:[#allocation41_spill] sm:$0xff] }
0x1788   :  { %v3877_v63 = vpop.xlane.xlu0 %3876 }
0x1789   :  { %v3917_v46 = vrot.slane %v3877_v63, %v8718_v18 }
0x178b   :  { %v3924_v28 = vsel %vm642_vm6, %v3917_v46, %v3923_v38 }
0x178c   :  { %v3926_v4 = vsel %vm645_vm7, %v3924_v28, -inf }
0x178d   :  { %3927 = vmax.xlane.f32.xlu0 %v3926_v4 }
0x17b0   :  { %v8156_v21 = vpop.f32.mrb[36].mxu0 }
0x17b1   :  { %v8158_v19 = vpop.f32.mrb[37].mxu0 }
0x17b2   :  { %v4322_v10 = vpop.f32.mrb[38].mxu0 }
0x17b3   :  { %v4323_v1 = vpop.f32.mrb[39].mxu0 }
0x181a   :  { %v3928_v61 = vpop.xlane.xlu0 %3927 }
0x181b   :  { %v3933_v55 = vrot.slane %v3928_v61, %v6959_v39  ;;  %v3937_v3 = vrot.slane %v3928_v61, %v8719_v54  ;;  %v3941_v52 = vrot.slane %v3928_v61, %v8720_v0  ;;  %v3945_v59 = vrot.slane %v3928_v61, %v8723_v22 }
0x181c   :  { %v3949_v12 = vrot.slane %v3928_v61, %v8826_v16  ;;  %v3953_v25 = vrot.slane %v3928_v61, %v8827_v29  ;;  %v3957_v57 = vrot.slane %v3928_v61, %v8828_v13  ;;  %v3961_v46 = vrot.slane %v3928_v61, %v8829_v15 }
0x181d   :  { %v3970_v62 = vsub.f32 %v3863_v35, %v3933_v55  ;;  %v3971_v5 = vsub.f32 %v3865_v43, %v3937_v3  ;;  %v3972_v53 = vsub.f32 %v3867_v44, %v3941_v52  ;;  %v3973_v37 = vsub.f32 %v3869_v14, %v3945_v59 }
0x181e   :  { %v3974_v11 = vsub.f32 %v3871_v27, %v3949_v12  ;;  %v3975_v38 = vsub.f32 %v3873_v34, %v3953_v25  ;;  %v3976_v4 = vsub.f32 %v3875_v17, %v3957_v57  ;;  %v3977_v43 = vsub.f32 %v3877_v63, %v3961_v46 }
0x181f   :  { %v3978_v24 = vmul.f32 1.442695, %v3970_v62  ;;  %v3980_v58 = vmul.f32 1.442695, %v3971_v5  ;;  %v3982_v32 = vmul.f32 1.442695, %v3972_v53 }
0x1820   :  { %v3984_v28 = vmul.f32 1.442695, %v3973_v37  ;;  %v3986_v35 = vmul.f32 1.442695, %v3974_v11  ;;  %v3988_v44 = vmul.f32 1.442695, %v3975_v38 }
0x1821   :  { %6226 = vpow2.f32 %v3978_v24  ;;  %v3990_v14 = vmul.f32 1.442695, %v3976_v4  ;;  %v3992_v10 = vmul.f32 1.442695, %v3977_v43 }
0x1822   :  { %6228 = vpow2.f32 %v3980_v58 }
0x1823   :  { %6230 = vpow2.f32 %v3982_v32 }
0x1824   :  { %6232 = vpow2.f32 %v3984_v28 }
0x1825   :  { %6234 = vpow2.f32 %v3986_v35 }
0x1826   :  { %6236 = vpow2.f32 %v3988_v44 }
0x1827   :  { %6238 = vpow2.f32 %v3990_v14 }
0x1828   :  { %6240 = vpow2.f32 %v3992_v10 }
0x182b   :  { %v6227_v1 = vpop.eup %6226 }
0x182c   :  { %v6229_v55 = vpop.eup %6228  ;;  %4003 = vperm.xlu0 %5895, %v6227_v1  }
0x182d   :  { %4006 = vperm.xlu1 %5894, %v6229_v55   ;;  %v6231_v27 = vpop.eup %6230 }
0x182e   :  { %v6233_v34 = vpop.eup %6232 }
0x182f   :  { %v8168_v17 = vpop.eup %6234 }
0x1830   :  { %4009 = vperm.xlu0 %5895, %v6231_v27   ;;  %v8170_v61 = vpop.eup %6236 }
0x1831   :  { %4012 = vperm.xlu1 %5894, %v6233_v34   ;;  %v8174_v63 = vpop.eup %6238 }
0x1832   :  { %v8176_v3 = vpop.eup %6240 }
0x1834   :  { %4015 = vperm.xlu0 %5895, %v8168_v17  }
0x1835   :  { %4018 = vperm.xlu1 %5894, %v8170_v61  }
0x1838   :  { %4021 = vperm.xlu0 %5895, %v8174_v63  }
0x1839   :  { %4024 = vperm.xlu1 %5894, %v8176_v3  }
0x18ab   :  { %v4004_v52 = vpop.permute.xlu0 %4003 }
0x18ac   :  { %v4007_v59 = vpop.permute.xlu1 %4006  ;;  %v4029_v62 = vrot.slane %v4004_v52, %v8718_v18 }
0x18ad   :  { %v4033_v12 = vrot.slane %v4007_v59, %v8718_v18 }
0x18af   :  { %v4010_v5 = vpop.permute.xlu0 %4009  ;;  %v4058_v37 = vsel %vm630_vm0, %v4033_v12, %v4029_v62 }
0x18b0   :  { %v4013_v53 = vpop.permute.xlu1 %4012  ;;  %v4037_v25 = vrot.slane %v4010_v5, %v8718_v18 }
0x18b1   :  { %v4041_v24 = vrot.slane %v4013_v53, %v8718_v18 }
0x18b2   :  { %v4059_v58 = vsel %vm632_vm1, %v4037_v25, %v4058_v37 }
0x18b3   :  { %v4016_v57 = vpop.permute.xlu0 %4015  ;;  %v4060_v38 = vsel %vm634_vm2, %v4041_v24, %v4059_v58 }
0x18b4   :  { %v4019_v11 = vpop.permute.xlu1 %4018  ;;  %v4045_v32 = vrot.slane %v4016_v57, %v8718_v18 }
0x18b5   :  { %v4049_v46 = vrot.slane %v4019_v11, %v8718_v18 }
0x18b6   :  { %v4061_v28 = vsel %vm636_vm3, %v4045_v32, %v4060_v38 }
0x18b7   :  { %v4022_v4 = vpop.permute.xlu0 %4021  ;;  %v4062_v14 = vsel %vm638_vm4, %v4049_v46, %v4061_v28 }
0x18b8   :  { %v4025_v35 = vpop.permute.xlu1 %4024  ;;  %v4053_v43 = vrot.slane %v4022_v4, %v8718_v18 }
0x18b9   :  { %v4057_v44 = vrot.slane %v4025_v35, %v8718_v18 }
0x18ba   :  { %v4063_v10 = vsel %vm640_vm5, %v4053_v43, %v4062_v14 }
0x18bb   :  { %v4064_v52 = vsel %vm642_vm6, %v4057_v44, %v4063_v10 }
0x18bc   :  { %v4066_v59 = vsel %vm645_vm7, %v4064_v52, 0.0 }
0x18bd   :  { %4067 = vadd.xlane.f32.xlu0 %v4066_v59 }
0x194a   :  { %v4068_v12 = vpop.xlane.xlu0 %4067 }
0x194b   :  { %v4073_v62 = vrot.slane %v4068_v12, %v6959_v39  ;;  %v4077_v5 = vrot.slane %v4068_v12, %v8719_v54  ;;  %v4081_v53 = vrot.slane %v4068_v12, %v8720_v0  ;;  %v4085_v25 = vrot.slane %v4068_v12, %v8723_v22 }
0x194c   :  { %v4089_v24 = vrot.slane %v4068_v12, %v8826_v16  ;;  %v4093_v11 = vrot.slane %v4068_v12, %v8827_v29  ;;  %v4097_v38 = vrot.slane %v4068_v12, %v8828_v13  ;;  %v4101_v35 = vrot.slane %v4068_v12, %v8829_v15 }
0x194d   :  { %6242 = vrcp.f32 %v4073_v62 }
0x194e   :  { %6244 = vrcp.f32 %v4077_v5 }
0x194f   :  { %6246 = vrcp.f32 %v4081_v53 }
0x1950   :  { %6248 = vrcp.f32 %v4085_v25 }
0x1951   :  { %6250 = vrcp.f32 %v4089_v24 }
0x1952   :  { %6252 = vrcp.f32 %v4093_v11 }
0x1953   :  { %6254 = vrcp.f32 %v4097_v38 }
0x1954   :  { %6256 = vrcp.f32 %v4101_v35 }
0x1957   :  { %v6243_v37 = vpop.eup %6242 }
0x1958   :  { %v4111_v58 = vmul.f32 %v6243_v37, %v6227_v1  ;;  %v6245_v57 = vpop.eup %6244 }
0x1959   :  { %v4113_v32 = vmul.f32 %v6245_v57, %v6229_v55  ;;  %v6247_v46 = vpop.eup %6246 }
0x195a   :  { %4128 = vperm.xlu1 %5894, %v4111_v58   ;;  %v4115_v28 = vmul.f32 %v6247_v46, %v6231_v27  ;;  %v6249_v4 = vpop.eup %6248 }
0x195b   :  { %v4117_v43 = vmul.f32 %v6249_v4, %v6233_v34  ;;  %v6251_v44 = vpop.eup %6250 }
0x195c   :  { %v4119_v1 = vmul.f32 %v6251_v44, %v8168_v17  ;;  %v6253_v14 = vpop.eup %6252 }
0x195d   :  { %v4121_v55 = vmul.f32 %v6253_v14, %v8170_v61  ;;  %v6255_v10 = vpop.eup %6254 }
0x195e   :  { %4133 = vperm.xlu1 %5894, %v4113_v32   ;;  %v4123_v52 = vmul.f32 %v6255_v10, %v8174_v63  ;;  %v6257_v27 = vpop.eup %6256 }
0x195f   :  { %v4125_v59 = vmul.f32 %v6257_v27, %v8176_v3 }
0x1962   :  { %4138 = vperm.xlu1 %5894, %v4115_v28  }
0x1966   :  { %4143 = vperm.xlu1 %5894, %v4117_v43  }
0x196a   :  { %4148 = vperm.xlu1 %5894, %v4119_v1  }
0x196e   :  { %4153 = vperm.xlu1 %5894, %v4121_v55  }
0x1972   :  { %4158 = vperm.xlu1 %5894, %v4123_v52  }
0x1976   :  { %4163 = vperm.xlu1 %5894, %v4125_v59  }
0x19d9   :  { %v4129_v12 = vpop.permute.xlu1 %4128 }
0x19da   :  { %v4166_v53 = vmul.f32 %v6962_v42, %v4129_v12 }
0x19dc   :  { %v4174_v63 = vrot.slane %v4166_v53, 4 }
0x19dd   :  { %v4134_v34 = vpop.permute.xlu1 %4133 }
0x19de   :  { %v4167_v5 = vmul.f32 %v6970_v50, %v4134_v34  ;;  %v4175_v46 = vadd.f32 %v4174_v63, %v4166_v53 }
0x19e0   :  { %v4180_v61 = vrot.slane %v4167_v5, 4  ;;  %v4176_v14 = vrot.slane %v4175_v46, 2 }
0x19e1   :  { %v4139_v62 = vpop.permute.xlu1 %4138 }
0x19e2   :  { %v4168_v17 = vmul.f32 %v6967_v47, %v4139_v62  ;;  %v4181_v11 = vadd.f32 %v4180_v61, %v4167_v5  ;;  %v4177_v5 = vadd.f32 %v4176_v14, %v4175_v46 }
0x19e4   :  { %v4186_v24 = vrot.slane %v4168_v17, 4  ;;  %v4182_v35 = vrot.slane %v4181_v11, 2 }
0x19e5   :  { %v4144_v25 = vpop.permute.xlu1 %4143 }
0x19e6   :  { %v4169_v37 = vmul.f32 %v8708_v51, %v4144_v25  ;;  %v4187_v32 = vadd.f32 %v4186_v24, %v4168_v17  ;;  %v4183_v59 = vadd.f32 %v4182_v35, %v4181_v11 }
0x19e8   :  { %v4192_v58 = vrot.slane %v4169_v37, 4  ;;  %v4188_v1 = vrot.slane %v4187_v32, 2  ;;  %v4184_v24 = vrot.slane %v4183_v59, 1 }
0x19e9   :  { %v4149_v57 = vpop.permute.xlu1 %4148 }
0x19ea   :  { %v4170_v3 = vmul.f32 %v8705_v56, %v4149_v57  ;;  %v4193_v38 = vadd.f32 %v4192_v58, %v4169_v37  ;;  %v4189_v62 = vadd.f32 %v4188_v1, %v4187_v32 }
0x19ec   :  { %v4198_v28 = vrot.slane %v4170_v3, 4  ;;  %v4194_v55 = vrot.slane %v4193_v38, 2 }
0x19ed   :  { %v4154_v4 = vpop.permute.xlu1 %4153 }
0x19ee   :  { %v4199_v43 = vadd.f32 %v4198_v28, %v4170_v3  ;;  %v4171_v44 = vmul.f32 %v8711_v45, %v4154_v4  ;;  %v4195_v17 = vadd.f32 %v4194_v55, %v4193_v38  ;;  %v4190_v3 = vrot.slane %v4189_v62, 1 }
0x19ef   :  { %v4178_v28 = vrot.slane %v4177_v5, 1 }
0x19f0   :  { %v4204_v10 = vrot.slane %v4171_v44, 4  ;;  %v4200_v52 = vrot.slane %v4199_v43, 2  ;;  %v4196_v4 = vrot.slane %v4195_v17, 1  ;;  %v4191_v38 = vadd.f32 %v4190_v3, %v4189_v62  ;;  %v8244_v3 = vld [vmem:[#allocation10 + $0x8c] ss:$16 sps:$4 sm:$0xff]  }
0x19f1   :  { %v4159_v27 = vpop.permute.xlu1 %4158  ;;  %v4179_v1 = vadd.f32 %v4178_v28, %v4177_v5  ;;  %v8247_v28 = vld [vmem:[#allocation10 + $0x88] ss:$16 sps:$4 sm:$0xff]  }
0x19f2   :  { %v4205_v12 = vadd.f32 %v4204_v10, %v4171_v44  ;;  %v4172_v34 = vmul.f32 %v6990_v33, %v4159_v27  ;;  %v4201_v61 = vadd.f32 %v4200_v52, %v4199_v43  ;;  %v4185_v44 = vadd.f32 %v4184_v24, %v4183_v59  ;;  %v8226_v24 = vld [vmem:[#allocation10 + $0x2c] ss:$16 sps:$4 sm:$0xff]  }
0x19f3   :  { %v4197_v14 = vadd.f32 %v4196_v4, %v4195_v17  ;;  %v8250_v4 = vld [vmem:[#allocation10 + $0xac] ss:$16 sps:$4 sm:$0xff]  }
0x19f4   :  { %v4206_v53 = vrot.slane %v4205_v12, 2  ;;  %v4210_v25 = vrot.slane %v4172_v34, 4  ;;  %v4202_v35 = vrot.slane %v4201_v61, 1  ;;  %v4230_v27 = vsel %vm630_vm0, %v4185_v44, %v4179_v1  ;;  %v8259_v44 = vld [vmem:[#allocation10 + $0xc8] ss:$16 sps:$4 sm:$0xff]  }
0x19f5   :  { %v4164_v37 = vpop.permute.xlu1 %4163 }
0x19f6   :  { %v4207_v63 = vadd.f32 %v4206_v53, %v4205_v12  ;;  %v4211_v58 = vadd.f32 %v4210_v25, %v4172_v34  ;;  %v4173_v57 = vmul.f32 %v8716_v7, %v4164_v37  ;;  %v4203_v52 = vadd.f32 %v4202_v35, %v4201_v61  ;;  %v8256_v35 = vld [vmem:[#allocation10 + $0xcc] ss:$16 sps:$4 sm:$0xff]  }
0x19f7   :  { %v4231_v53 = vsel %vm632_vm1, %v4191_v38, %v4230_v27 }
0x19f8   :  { %v4212_v15 = vrot.slane %v4211_v58, 2  ;;  %v4216_v11 = vrot.slane %v4173_v57, 4  ;;  %v4208_v10 = vrot.slane %v4207_v63, 1  ;;  %v4232_v37 = vsel %vm634_vm2, %v4197_v14, %v4231_v53 }
0x19f9   :  { %v4233_v59 = vsel %vm636_vm3, %v4203_v52, %v4232_v37 }
0x19fa   :  { %v4213_v32 = vadd.f32 %v4212_v15, %v4211_v58  ;;  %v4217_v46 = vadd.f32 %v4216_v11, %v4173_v57  ;;  %v4209_v12 = vadd.f32 %v4208_v10, %v4207_v63  ;;  %v8229_v63 = vld [vmem:[#allocation10 + $0x28] ss:$16 sps:$4 sm:$0xff]   ;;  %v8238_v57 = vld [vmem:[#allocation10 + $0x6c] ss:$16 sps:$4 sm:$0xff]  }
0x19fb   :  { %v8235_v58 = vld [vmem:[#allocation10 + $0x48] ss:$16 sps:$4 sm:$0xff]   ;;  %v8262_v10 = vld [vmem:[#allocation10 + $0xec] ss:$16 sps:$4 sm:$0xff]  }
0x19fc   :  { %v4214_v43 = vrot.slane %v4213_v32, 1  ;;  %v4218_v55 = vrot.slane %v4217_v46, 2  ;;  %v4234_v62 = vsel %vm638_vm4, %v4209_v12, %v4233_v59  ;;  %v8253_v11 = vld [vmem:[#allocation10 + $0xa8] ss:$16 sps:$4 sm:$0xff]  }
0x19fe   :  { %v4219_v34 = vadd.f32 %v4218_v55, %v4217_v46  ;;  %v4215_v25 = vadd.f32 %v4214_v43, %v4213_v32  ;;  %v8265_v32 = vld [vmem:[#allocation10 + $0xe8] ss:$16 sps:$4 sm:$0xff]  }
0x1a00   :  { %v4220_v13 = vrot.slane %v4219_v34, 1  ;;  %v4235_v5 = vsel %vm640_vm5, %v4215_v25, %v4234_v62  ;;  %v4368_v25 = vld [vmem:[#allocation4 + $0x68] sm:$0xff] }
0x1a02   :  { %v4221_v15 = vadd.f32 %v4220_v13, %v4219_v34  ;;  %v8232_v13 = vld [vmem:[#allocation10 + $0x4c] ss:$16 sps:$4 sm:$0xff]  }
0x1a04   :  { %v4236_v17 = vsel %vm642_vm6, %v4221_v15, %v4235_v5  ;;  %v4371_v15 = vunpack.c.l.bf16 %v4368_v25  ;;  %v4372_v5 = vunpack.c.h.bf16 %v4368_v25 }
0x1a05   :  { %v4239_v61 = vpack.c.bf16 %v4236_v17, %v4236_v17 }
0x1a07   :  { %4272 = vmatprep.mubr.bf16.mxu1 %v4239_v61 }
0x1a08   :  { %4273 = vmatmul.mubr.bf16.vlgmr.msra.gmra.mrb[32].mxu1 %v8100_v49 }
0x1a09   :  { %4326 = vmatpush1.bf16.msra.mxu1 %v8037_v40  ;;  %4357 = vmatprep.mubr.bf16.mxu1 %v8699_v48  ;;  %v8241_v40 = vld [vmem:[#allocation10 + $0x68] ss:$16 sps:$4 sm:$0xff]  }
0x1a0a   :  { %4327 = vmatprep.subr.bf16.mxu1 %v8226_v24 }
0x1a0d   :  { %4328 = vmatpush1.bf16.msra.mxu1 %v8229_v63 }
0x1a0e   :  { %4329 = vmatprep.subr.bf16.mxu1 %v8232_v13 }
0x1a11   :  { %4330 = vmatpush1.bf16.msra.mxu1 %v8235_v58 }
0x1a12   :  { %4331 = vmatprep.subr.bf16.mxu1 %v8238_v57 }
0x1a15   :  { %4332 = vmatpush1.bf16.msra.mxu1 %v8241_v40 }
0x1a16   :  { %4333 = vmatprep.subr.bf16.mxu1 %v8244_v3 }
0x1a19   :  { %4334 = vmatpush1.bf16.msra.mxu1 %v8247_v28 }
0x1a1a   :  { %4335 = vmatprep.subr.bf16.mxu1 %v8250_v4 }
0x1a1d   :  { %4336 = vmatpush1.bf16.msra.mxu1 %v8253_v11 }
0x1a1e   :  { %4337 = vmatprep.subr.bf16.mxu1 %v8256_v35 }
0x1a21   :  { %4338 = vmatpush1.bf16.msra.mxu1 %v8259_v44 }
0x1a22   :  { %4339 = vmatprep.subr.bf16.mxu1 %v8262_v10 }
0x1a25   :  { %4340 = vmatpush1.bf16.msra.mxu1 %v8265_v32 }
0x1a26   :  { %4921 = vmatprep.subr.bf16.mxu1 %v8055_v26  ;;  %v6482_v26 = vld [vmem:[#allocation10 + $0xa4] ss:$16 sps:$4 sm:$0xff]  }
0x1a28   :  { %4358 = vmatmul.mubr.bf16.vlgmr.msra.gmra.mrb[36].mxu1 %v8100_v49  ;;  %v6484_v49 = vld [vmem:[#allocation10 + $0xc4] ss:$16 sps:$4 sm:$0xff]  }
0x1a29   :  { %4922 = vmatpush1.bf16.msra.mxu1 %v8059_v6  ;;  %4953 = vmatprep.mubr.bf16.mxu1 %v8699_v48  ;;  %v6483_v6 = vld [vmem:[#allocation10 + $0xa0] ss:$16 sps:$4 sm:$0xff]  }
0x1a2a   :  { %4923 = vmatprep.subr.bf16.mxu1 %v8063_v20  ;;  %v6485_v20 = vld [vmem:[#allocation10 + $0xc0] ss:$16 sps:$4 sm:$0xff]  }
0x1a2d   :  { %4924 = vmatpush1.bf16.msra.mxu1 %v8066_v23  ;;  %v6486_v23 = vld [vmem:[#allocation10 + $0xe4] ss:$16 sps:$4 sm:$0xff]  }
0x1a2e   :  { %4925 = vmatprep.subr.bf16.mxu1 %v8069_v31  ;;  %v6487_v31 = vld [vmem:[#allocation10 + $0xe0] ss:$16 sps:$4 sm:$0xff]  }
0x1a31   :  { %4926 = vmatpush1.bf16.msra.mxu1 %v8072_v30  ;;  %v6488_v30 = vld [vmem:[#allocation13 + $0x40] sm:$0xff]  }
0x1a32   :  { %4927 = vmatprep.subr.bf16.mxu1 %v8075_v41 }
0x1a35   :  { %4928 = vmatpush1.bf16.msra.mxu1 %v8078_v36  ;;  %v4367_v36 = vld [vmem:[#allocation4 + $0x60] sm:$0xff] }
0x1a36   :  { %4929 = vmatprep.subr.bf16.mxu1 %v8081_v2  ;;  %v4370_v1 = vunpack.c.h.bf16 %v4367_v36  ;;  %v4369_v14 = vunpack.c.l.bf16 %v4367_v36 }
0x1a38   :  { %v4374_v43 = vadd.f32 %v4370_v1, %v8158_v19  ;;  %v4373_v55 = vadd.f32 %v4369_v14, %v8156_v21 }
0x1a39   :  { %4930 = vmatpush1.bf16.msra.mxu1 %v8084_v8 }
0x1a3a   :  { %4931 = vmatprep.subr.bf16.mxu1 %v6482_v26  ;;  %v5679_v52 = vmul.f32 -1.442695, %v4374_v43  ;;  %v5678_v27 = vmul.f32 -1.442695, %v4373_v55 }
0x1a3d   :  { %4932 = vmatpush1.bf16.msra.mxu1 %v6483_v6 }
0x1a3e   :  { %4933 = vmatprep.subr.bf16.mxu1 %v6484_v49 }
0x1a41   :  { %4934 = vmatpush1.bf16.msra.mxu1 %v6485_v20 }
0x1a42   :  { %4935 = vmatprep.subr.bf16.mxu1 %v6486_v23 }
0x1a45   :  { %4936 = vmatpush1.bf16.msra.mxu1 %v6487_v31 }
0x1a46   :  { %5857 = vmatprep.subr.bf16.mxu1 %v6488_v30 }
0x1adb   :  { %v5829_v41 = vpop.f32.mrb[32].mxu1 }
0x1adc   :  { %v5830_v46 = vpop.f32.mrb[33].mxu1 }
0x1add   :  { %v5831_v2 = vadd.f32 %v5830_v46, %v5829_v41  ;;  %v5832_v38 = vpop.f32.mrb[34].mxu1 }
0x1ade   :  { %v5833_v8 = vpop.f32.mrb[35].mxu1 }
0x1adf   :  { %6258 = vtanh.f32 %v5831_v2 }
0x1ae0   :  { %6260 = vpow2.f32 %v5679_v52 }
0x1ae1   :  { %6262 = vpow2.f32 %v5678_v27 }
0x1ae9   :  { %v6259_v12 = vpop.eup %6258 }
0x1aea   :  { %v4281_v34 = vpack.c.bf16 %v6259_v12, %v6259_v12  ;;  %v6261_v53 = vpop.eup %6260  ;;  %v6489_v12 = vld [vmem:[#allocation13] sm:$0xff]  }
0x1aeb   :  { %v6263_v37 = vpop.eup %6262  ;;  %v4386_v59 = vadd.f32 1.0, %v6261_v53 }
0x1aec   :  { %4283 = vst [vmem:[#allocation15 + $0x14] sm:$0xf] %v4281_v34  ;;  %v4380_v62 = vadd.f32 1.0, %v6263_v37  ;;  %v6490_v37 = vld [vmem:[#allocation13 + $0x48] sm:$0xff]  }
0x1aed   :  { %6264 = vrcp.f32 %v4386_v59 }
0x1aee   :  { %6266 = vrcp.f32 %v4380_v62 }
0x1af7   :  { %v6265_v20 = vpop.eup %6264 }
0x1af8   :  { %v6267_v23 = vpop.eup %6266  ;;  %v4396_v30 = vmul.f32 %v6265_v20, %v8097_v60  ;;  %v6493_v20 = vld [vmem:[#allocation13 + $0x10] sm:$0xff]  }
0x1afb   :  { %v4359_v17 = vpop.f32.mrb[36].mxu1 }
0x1afc   :  { %v4375_v61 = vadd.f32 %v4371_v15, %v4359_v17  ;;  %v4361_v19 = vpop.f32.mrb[37].mxu1  ;;  %v6491_v17 = vld [vmem:[#allocation13 + $0x8] sm:$0xff]  }
0x1afd   :  { %v4376_v21 = vadd.f32 %v4372_v5, %v4361_v19  ;;  %v4363_v26 = vpop.f32.mrb[38].mxu1  ;;  %v6492_v19 = vld [vmem:[#allocation13 + $0x50] sm:$0xff]  }
0x1afe   :  { %6268 = vtanh.f32 %v4375_v61  ;;  %v4364_v6 = vpop.f32.mrb[39].mxu1 }
0x1aff   :  { %v5680_v49 = vmul.f32 -1.442695, %v4376_v21 }
0x1b01   :  { %6270 = vpow2.f32 %v5680_v49 }
0x1b08   :  { %v6269_v31 = vpop.eup %6268 }
0x1b09   :  { %v4397_v41 = vmul.f32 %v6269_v31, %v6267_v23  ;;  %v6494_v23 = vld [vmem:[#allocation13 + $0x58] sm:$0xff]  }
0x1b0b   :  { %v6271_v36 = vpop.eup %6270  ;;  %v8283_v46 = vadd.f32 %v4397_v41, %v4396_v30 }
0x1b0c   :  { %v4393_v2 = vadd.f32 1.0, %v6271_v36  ;;  %v6495_v36 = vld [vmem:[#allocation13 + $0x18] sm:$0xff]  }
0x1b0d   :  { %6272 = vtanh.f32 %v8283_v46 }
0x1b0e   :  { %6274 = vrcp.f32 %v4393_v2  ;;  %v6496_v2 = vld [vmem:[#allocation13 + $0x60] sm:$0xff]  }
0x1b17   :  { %v6273_v38 = vpop.eup %6272 }
0x1b18   :  { %v6275_v8 = vpop.eup %6274 }
0x1b19   :  { %v4400_v1 = vmul.f32 %v6275_v8, %v6273_v38 }
0x1b1b   :  { %v8286_v14 = vpack.c.bf16 %v4400_v1, %v4400_v1  ;;  %v4409_v43 = vrot.slane %v4400_v1, %v8810_v9  ;;  %v4402_v55 = vcombine.high %v4400_v1, %v4400_v1 }
0x1b1d   :  { %4954 = vmatmul.mubr.bf16.vlgmr.msra.gmra.mrb[40].mxu1 %v8286_v14  ;;  %v4425_v60 = vrot.slane %v4409_v43, %v8810_v9  ;;  %v4417_v52 = vcombine.high %v4409_v43, %v4409_v43  ;;  %v4416_v27 = vrot.slane %v4402_v55, %v8810_v9  ;;  %v6497_v43 = vld [vmem:[#allocation13 + $0x20] sm:$0xff]   ;;  %v6498_v55 = vld [vmem:[#allocation13 + $0x68] sm:$0xff]  }
0x1b1e   :  { %5858 = vmatpush3.bf16.msra.mxu1 %v6489_v12  ;;  %v6499_v12 = vld [vmem:[#allocation13 + $0x28] sm:$0xff]  }
0x1b1f   :  { %v4454_v34 = vrot.slane %v4425_v60, %v6959_v39  ;;  %v4439_v53 = vrot.slane %v4417_v52, %v8810_v9  ;;  %v4447_v25 = vcombine.high %v4425_v60, %v4425_v60  ;;  %5859 = vmatprep.subr.bf16.mxu1 %v6490_v37  ;;  %v4432_v5 = vrot.slane %v4416_v27, %v8810_v9  ;;  %v6501_v37 = vld [vmem:[#allocation13 + $0x30] sm:$0xff]  }
0x1b20   :  { %v4418_v49 = vcombine.high %v4416_v27, %v4416_v27 }
0x1b21   :  { %v4491_v59 = vmul.f32 %v6962_v42, %v4454_v34  ;;  %v4458_v15 = vrot.slane %v4439_v53, %v6959_v39  ;;  %v4462_v62 = vrot.slane %v4447_v25, %v6959_v39  ;;  %v4470_v26 = vrot.slane %v4432_v5, %v6959_v39  ;;  %v6500_v34 = vld [vmem:[#allocation13 + $0x70] sm:$0xff]  }
0x1b22   :  { %5860 = vmatpush3.bf16.msra.mxu1 %v6491_v17  ;;  %v4449_v6 = vcombine.high %v4439_v53, %v4439_v53  ;;  %v4446_v41 = vrot.slane %v4418_v49, %v8810_v9  ;;  %v4448_v1 = vcombine.high %v4432_v5, %v4432_v5 }
0x1b23   :  { %4499 = vadd.xlane.f32.xlu0 %v4491_v59  ;;  %v4492_v61 = vmul.f32 %v6970_v50, %v4458_v15  ;;  %5861 = vmatprep.subr.bf16.mxu1 %v6492_v19  ;;  %v4493_v21 = vmul.f32 %v6967_v47, %v4462_v62  ;;  %v4495_v31 = vmul.f32 %v8705_v56, %v4470_v26  ;;  %v6502_v59 = vld [vmem:[#allocation13 + $0x78] sm:$0xff]  }
0x1b24   :  { %v4466_v30 = vrot.slane %v4449_v6, %v6959_v39  ;;  %v4474_v8 = vrot.slane %v4446_v41, %v6959_v39  ;;  %v4478_v52 = vrot.slane %v4448_v1, %v6959_v39  ;;  %v4450_v27 = vcombine.high %v4446_v41, %v4446_v41  ;;  %v6503_v62 = vld [vmem:[#allocation13 + $0x38] sm:$0xff]  }
0x1b25   :  { %4501 = vadd.xlane.f32.xlu1 %v4492_v61 }
0x1b26   :  { %5862 = vmatpush3.bf16.msra.mxu1 %v6493_v20  ;;  %v4494_v38 = vmul.f32 %v8708_v51, %v4466_v30  ;;  %v4496_v60 = vmul.f32 %v8711_v45, %v4474_v8  ;;  %v4497_v53 = vmul.f32 %v6990_v33, %v4478_v52  ;;  %v4482_v25 = vrot.slane %v4450_v27, %v6959_v39 }
0x1b27   :  { %4503 = vadd.xlane.f32.xlu0 %v4493_v21  ;;  %5863 = vmatprep.subr.bf16.mxu1 %v6494_v23 }
0x1b28   :  { %v4498_v15 = vmul.f32 %v8716_v7, %v4482_v25 }
0x1b2a   :  { %5864 = vmatpush3.bf16.msra.mxu1 %v6495_v36 }
0x1b2b   :  { %4507 = vadd.xlane.f32.xlu0 %v4495_v31  ;;  %5865 = vmatprep.subr.bf16.mxu1 %v6496_v2 }
0x1b2e   :  { %5866 = vmatpush3.bf16.msra.mxu1 %v6497_v43 }
0x1b2f   :  { %4505 = vadd.xlane.f32.xlu0 %v4494_v38  ;;  %5867 = vmatprep.subr.bf16.mxu1 %v6498_v55 }
0x1b32   :  { %5868 = vmatpush3.bf16.msra.mxu1 %v6499_v12 }
0x1b33   :  { %4509 = vadd.xlane.f32.xlu0 %v4496_v60  ;;  %5869 = vmatprep.subr.bf16.mxu1 %v6500_v34 }
0x1b36   :  { %5870 = vmatpush3.bf16.msra.mxu1 %v6501_v37 }
0x1b37   :  { %4511 = vadd.xlane.f32.xlu0 %v4497_v53  ;;  %5871 = vmatprep.subr.bf16.mxu1 %v6502_v59 }
0x1b3a   :  { %5872 = vmatpush3.bf16.msra.mxu1 %v6503_v62 }
0x1b3b   :  { %4513 = vadd.xlane.f32.xlu0 %v4498_v15 }
0x1bb0   :  { %v4500_v5 = vpop.xlane.xlu0 %4499 }
0x1bb1   :  { %v4526_v6 = vrot.slane %v4500_v5, %v8718_v18 }
0x1bb2   :  { %v4502_v19 = vpop.xlane.xlu1 %4501 }
0x1bb3   :  { %v4530_v26 = vrot.slane %v4502_v19, %v8718_v18 }
0x1bb4   :  { %v4504_v17 = vpop.xlane.xlu0 %4503 }
0x1bb5   :  { %v4534_v49 = vrot.slane %v4504_v17, %v8718_v18  ;;  %v4555_v23 = vsel %vm630_vm0, %v4530_v26, %v4526_v6 }
0x1bb7   :  { %v4556_v30 = vsel %vm632_vm1, %v4534_v49, %v4555_v23 }
0x1bb8   :  { %v4508_v61 = vpop.xlane.xlu0 %4507 }
0x1bb9   :  { %v4542_v38 = vrot.slane %v4508_v61, %v8718_v18 }
0x1bbc   :  { %v4506_v21 = vpop.xlane.xlu0 %4505 }
0x1bbd   :  { %v4538_v31 = vrot.slane %v4506_v21, %v8718_v18 }
0x1bbf   :  { %v4557_v36 = vsel %vm634_vm2, %v4538_v31, %v4556_v30 }
0x1bc0   :  { %v4510_v20 = vpop.xlane.xlu0 %4509  ;;  %v4558_v1 = vsel %vm636_vm3, %v4542_v38, %v4557_v36 }
0x1bc1   :  { %v4546_v2 = vrot.slane %v4510_v20, %v8718_v18 }
0x1bc3   :  { %v4559_v55 = vsel %vm638_vm4, %v4546_v2, %v4558_v1  ;;  %v8830_v1 = vld [vmem:[#allocation40_spill] sm:$0xff] }
0x1bc4   :  { %v4512_v41 = vpop.xlane.xlu0 %4511 }
0x1bc5   :  { %v4550_v8 = vrot.slane %v4512_v41, %v8718_v18 }
0x1bc7   :  { %v4560_v52 = vsel %vm640_vm5, %v4550_v8, %v4559_v55 }
0x1bc8   :  { %v4514_v43 = vpop.xlane.xlu0 %4513 }
0x1bc9   :  { %v4554_v60 = vrot.slane %v4514_v43, %v8718_v18 }
0x1bcb   :  { %v4561_v27 = vsel %vm642_vm6, %v4554_v60, %v4560_v52 }
0x1bcc   :  { %v4563_v12 = vsel %vm645_vm7, %v4561_v27, -inf  ;;  %v8831_v27 = vld [vmem:[#allocation41_spill] sm:$0xff] }
0x1bcd   :  { %4564 = vmax.xlane.f32.xlu0 %v4563_v12 }
0x1bf0   :  { %v8327_v34 = vpop.f32.mrb[40].mxu1 }
0x1bf1   :  { %v8329_v53 = vpop.f32.mrb[41].mxu1 }
0x1bf2   :  { %v4959_v25 = vpop.f32.mrb[42].mxu1 }
0x1bf3   :  { %v4960_v37 = vpop.f32.mrb[43].mxu1 }
0x1c5a   :  { %v4565_v59 = vpop.xlane.xlu0 %4564 }
0x1c5b   :  { %v4570_v15 = vrot.slane %v4565_v59, %v6959_v39  ;;  %v4574_v62 = vrot.slane %v4565_v59, %v8719_v54  ;;  %v4578_v26 = vrot.slane %v4565_v59, %v8720_v0  ;;  %v4582_v6 = vrot.slane %v4565_v59, %v8723_v22 }
0x1c5c   :  { %v4586_v49 = vrot.slane %v4565_v59, %v8826_v16  ;;  %v4590_v36 = vrot.slane %v4565_v59, %v8827_v29  ;;  %v4594_v55 = vrot.slane %v4565_v59, %v8830_v1  ;;  %v4598_v12 = vrot.slane %v4565_v59, %v8831_v27 }
0x1c5d   :  { %v4607_v23 = vsub.f32 %v4500_v5, %v4570_v15  ;;  %v4608_v31 = vsub.f32 %v4502_v19, %v4574_v62  ;;  %v4609_v30 = vsub.f32 %v4504_v17, %v4578_v26  ;;  %v4610_v2 = vsub.f32 %v4506_v21, %v4582_v6 }
0x1c5e   :  { %v4611_v60 = vsub.f32 %v4508_v61, %v4586_v49  ;;  %v4612_v25 = vsub.f32 %v4510_v20, %v4590_v36  ;;  %v4613_v9 = vsub.f32 %v4512_v41, %v4594_v55  ;;  %v4614_v19 = vsub.f32 %v4514_v43, %v4598_v12 }
0x1c5f   :  { %v4615_v38 = vmul.f32 1.442695, %v4607_v23  ;;  %v4617_v8 = vmul.f32 1.442695, %v4608_v31  ;;  %v4619_v52 = vmul.f32 1.442695, %v4609_v30 }
0x1c60   :  { %v4621_v37 = vmul.f32 1.442695, %v4610_v2  ;;  %v4623_v5 = vmul.f32 1.442695, %v4611_v60  ;;  %v4625_v17 = vmul.f32 1.442695, %v4612_v25 }
0x1c61   :  { %6276 = vpow2.f32 %v4615_v38  ;;  %v4627_v21 = vmul.f32 1.442695, %v4613_v9  ;;  %v4629_v15 = vmul.f32 1.442695, %v4614_v19 }
0x1c62   :  { %6278 = vpow2.f32 %v4617_v8 }
0x1c63   :  { %6280 = vpow2.f32 %v4619_v52 }
0x1c64   :  { %6282 = vpow2.f32 %v4621_v37 }
0x1c65   :  { %6284 = vpow2.f32 %v4623_v5 }
0x1c66   :  { %6286 = vpow2.f32 %v4625_v17 }
0x1c67   :  { %6288 = vpow2.f32 %v4627_v21 }
0x1c68   :  { %6290 = vpow2.f32 %v4629_v15 }
0x1c6b   :  { %v6277_v62 = vpop.eup %6276 }
0x1c6c   :  { %v6279_v26 = vpop.eup %6278  ;;  %4640 = vperm.xlu0 %5895, %v6277_v62  }
0x1c6d   :  { %4643 = vperm.xlu1 %5894, %v6279_v26   ;;  %v6281_v61 = vpop.eup %6280 }
0x1c6e   :  { %v6283_v20 = vpop.eup %6282 }
0x1c6f   :  { %v8339_v41 = vpop.eup %6284 }
0x1c70   :  { %4646 = vperm.xlu0 %5895, %v6281_v61   ;;  %v8341_v59 = vpop.eup %6286 }
0x1c71   :  { %4649 = vperm.xlu1 %5894, %v6283_v20   ;;  %v8345_v9 = vpop.eup %6288 }
0x1c72   :  { %v8347_v43 = vpop.eup %6290 }
0x1c74   :  { %4652 = vperm.xlu0 %5895, %v8339_v41  }
0x1c75   :  { %4655 = vperm.xlu1 %5894, %v8341_v59  }
0x1c78   :  { %4658 = vperm.xlu0 %5895, %v8345_v9  }
0x1c79   :  { %4661 = vperm.xlu1 %5894, %v8347_v43  }
0x1ceb   :  { %v4641_v6 = vpop.permute.xlu0 %4640 }
0x1cec   :  { %v4644_v49 = vpop.permute.xlu1 %4643  ;;  %v4666_v31 = vrot.slane %v4641_v6, %v8718_v18 }
0x1ced   :  { %v4670_v23 = vrot.slane %v4644_v49, %v8718_v18 }
0x1cef   :  { %v4647_v30 = vpop.permute.xlu0 %4646  ;;  %v4695_v38 = vsel %vm630_vm0, %v4670_v23, %v4666_v31 }
0x1cf0   :  { %v4650_v36 = vpop.permute.xlu1 %4649  ;;  %v4674_v2 = vrot.slane %v4647_v30, %v8718_v18 }
0x1cf1   :  { %v4678_v8 = vrot.slane %v4650_v36, %v8718_v18 }
0x1cf2   :  { %v4696_v55 = vsel %vm632_vm1, %v4674_v2, %v4695_v38 }
0x1cf3   :  { %v4653_v60 = vpop.permute.xlu0 %4652  ;;  %v4697_v37 = vsel %vm634_vm2, %v4678_v8, %v4696_v55 }
0x1cf4   :  { %v4656_v52 = vpop.permute.xlu1 %4655  ;;  %v4682_v12 = vrot.slane %v4653_v60, %v8718_v18 }
0x1cf5   :  { %v4686_v25 = vrot.slane %v4656_v52, %v8718_v18 }
0x1cf6   :  { %v4698_v5 = vsel %vm636_vm3, %v4682_v12, %v4697_v37 }
0x1cf7   :  { %v4659_v19 = vpop.permute.xlu0 %4658  ;;  %v4699_v6 = vsel %vm638_vm4, %v4686_v25, %v4698_v5 }
0x1cf8   :  { %v4662_v17 = vpop.permute.xlu1 %4661  ;;  %v4690_v21 = vrot.slane %v4659_v19, %v8718_v18 }
0x1cf9   :  { %v4694_v15 = vrot.slane %v4662_v17, %v8718_v18 }
0x1cfa   :  { %v4700_v49 = vsel %vm640_vm5, %v4690_v21, %v4699_v6 }
0x1cfb   :  { %v4701_v23 = vsel %vm642_vm6, %v4694_v15, %v4700_v49 }
0x1cfc   :  { %v4703_v31 = vsel %vm645_vm7, %v4701_v23, 0.0 }
0x1cfd   :  { %4704 = vadd.xlane.f32.xlu0 %v4703_v31 }
0x1d8a   :  { %v4705_v30 = vpop.xlane.xlu0 %4704 }
0x1d8b   :  { %v4710_v36 = vrot.slane %v4705_v30, %v6959_v39  ;;  %v4714_v2 = vrot.slane %v4705_v30, %v8719_v54  ;;  %v4718_v38 = vrot.slane %v4705_v30, %v8720_v0  ;;  %v4722_v8 = vrot.slane %v4705_v30, %v8723_v22 }
0x1d8c   :  { %v4726_v60 = vrot.slane %v4705_v30, %v8826_v16  ;;  %v4730_v25 = vrot.slane %v4705_v30, %v8827_v29  ;;  %v4734_v19 = vrot.slane %v4705_v30, %v8830_v1  ;;  %v4738_v15 = vrot.slane %v4705_v30, %v8831_v27 }
0x1d8d   :  { %6292 = vrcp.f32 %v4710_v36 }
0x1d8e   :  { %6294 = vrcp.f32 %v4714_v2 }
0x1d8f   :  { %6296 = vrcp.f32 %v4718_v38 }
0x1d90   :  { %6298 = vrcp.f32 %v4722_v8 }
0x1d91   :  { %6300 = vrcp.f32 %v4726_v60 }
0x1d92   :  { %6302 = vrcp.f32 %v4730_v25 }
0x1d93   :  { %6304 = vrcp.f32 %v4734_v19 }
0x1d94   :  { %6306 = vrcp.f32 %v4738_v15 }
0x1d97   :  { %v6293_v55 = vpop.eup %6292 }
0x1d98   :  { %v4748_v52 = vmul.f32 %v6293_v55, %v6277_v62  ;;  %v6295_v12 = vpop.eup %6294 }
0x1d99   :  { %v4750_v37 = vmul.f32 %v6295_v12, %v6279_v26  ;;  %v6297_v5 = vpop.eup %6296 }
0x1d9a   :  { %4765 = vperm.xlu1 %5894, %v4748_v52   ;;  %v4752_v17 = vmul.f32 %v6297_v5, %v6281_v61  ;;  %v6299_v21 = vpop.eup %6298 }
0x1d9b   :  { %v4754_v6 = vmul.f32 %v6299_v21, %v6283_v20  ;;  %v6301_v49 = vpop.eup %6300 }
0x1d9c   :  { %v4756_v62 = vmul.f32 %v6301_v49, %v8339_v41  ;;  %v6303_v23 = vpop.eup %6302 }
0x1d9d   :  { %v4758_v26 = vmul.f32 %v6303_v23, %v8341_v59  ;;  %v6305_v31 = vpop.eup %6304 }
0x1d9e   :  { %4770 = vperm.xlu1 %5894, %v4750_v37   ;;  %v4760_v36 = vmul.f32 %v6305_v31, %v8345_v9  ;;  %v6307_v61 = vpop.eup %6306 }
0x1d9f   :  { %v4762_v2 = vmul.f32 %v6307_v61, %v8347_v43 }
0x1da2   :  { %4775 = vperm.xlu1 %5894, %v4752_v17  }
0x1da6   :  { %4780 = vperm.xlu1 %5894, %v4754_v6  }
0x1daa   :  { %4785 = vperm.xlu1 %5894, %v4756_v62  }
0x1dae   :  { %4790 = vperm.xlu1 %5894, %v4758_v26  }
0x1db2   :  { %4795 = vperm.xlu1 %5894, %v4760_v36  }
0x1db6   :  { %4800 = vperm.xlu1 %5894, %v4762_v2  }
0x1e19   :  { %v4766_v30 = vpop.permute.xlu1 %4765 }
0x1e1a   :  { %v4803_v55 = vmul.f32 %v6962_v42, %v4766_v30 }
0x1e1c   :  { %v4811_v9 = vrot.slane %v4803_v55, 4 }
0x1e1d   :  { %v4771_v20 = vpop.permute.xlu1 %4770 }
0x1e1e   :  { %v4804_v8 = vmul.f32 %v6970_v50, %v4771_v20  ;;  %v4812_v17 = vadd.f32 %v4811_v9, %v4803_v55 }
0x1e20   :  { %v4817_v59 = vrot.slane %v4804_v8, 4  ;;  %v4813_v31 = vrot.slane %v4812_v17, 2 }
0x1e21   :  { %v4776_v38 = vpop.permute.xlu1 %4775 }
0x1e22   :  { %v4805_v41 = vmul.f32 %v6967_v47, %v4776_v38  ;;  %v4818_v5 = vadd.f32 %v4817_v59, %v4804_v8 }
0x1e24   :  { %v4823_v12 = vrot.slane %v4805_v41, 4  ;;  %v4819_v49 = vrot.slane %v4818_v5, 2 }
0x1e25   :  { %v4781_v60 = vpop.permute.xlu1 %4780 }
0x1e26   :  { %v4806_v52 = vmul.f32 %v8708_v51, %v4781_v60  ;;  %v4824_v19 = vadd.f32 %v4823_v12, %v4805_v41  ;;  %v4820_v20 = vadd.f32 %v4819_v49, %v4818_v5  ;;  %v4814_v41 = vadd.f32 %v4813_v31, %v4812_v17 }
0x1e28   :  { %v4829_v25 = vrot.slane %v4806_v52, 4  ;;  %v4825_v26 = vrot.slane %v4824_v19, 2  ;;  %v4815_v27 = vrot.slane %v4814_v41, 1 }
0x1e29   :  { %v4786_v37 = vpop.permute.xlu1 %4785 }
0x1e2a   :  { %v4807_v43 = vmul.f32 %v8705_v56, %v4786_v37  ;;  %v4830_v21 = vadd.f32 %v4829_v25, %v4806_v52  ;;  %v4826_v60 = vadd.f32 %v4825_v26, %v4824_v19  ;;  %v4821_v25 = vrot.slane %v4820_v20, 1 }
0x1e2b   :  { %v4816_v26 = vadd.f32 %v4815_v27, %v4814_v41 }
0x1e2c   :  { %v4835_v15 = vrot.slane %v4807_v43, 4  ;;  %v4831_v36 = vrot.slane %v4830_v21, 2 }
0x1e2d   :  { %v4791_v6 = vpop.permute.xlu1 %4790 }
0x1e2e   :  { %v4836_v62 = vadd.f32 %v4835_v15, %v4807_v43  ;;  %v4808_v23 = vmul.f32 %v8711_v45, %v4791_v6  ;;  %v4832_v55 = vadd.f32 %v4831_v36, %v4830_v21  ;;  %v4827_v6 = vrot.slane %v4826_v60, 1 }
0x1e30   :  { %v4841_v61 = vrot.slane %v4808_v23, 4  ;;  %v4837_v2 = vrot.slane %v4836_v62, 2  ;;  %v4833_v1 = vrot.slane %v4832_v55, 1  ;;  %v4828_v21 = vadd.f32 %v4827_v6, %v4826_v60 }
0x1e31   :  { %v4796_v30 = vpop.permute.xlu1 %4795 }
0x1e32   :  { %v4842_v38 = vadd.f32 %v4841_v61, %v4808_v23  ;;  %v4809_v8 = vmul.f32 %v6990_v33, %v4796_v30  ;;  %v4838_v12 = vadd.f32 %v4837_v2, %v4836_v62  ;;  %v4822_v23 = vadd.f32 %v4821_v25, %v4820_v20 }
0x1e33   :  { %v4834_v31 = vadd.f32 %v4833_v1, %v4832_v55  ;;  %v6504_v55 = vld [vmem:[#allocation10 + $0x8] ss:$16 sps:$4 sm:$0xff]  }
0x1e34   :  { %v4843_v59 = vrot.slane %v4842_v38, 2  ;;  %v4847_v52 = vrot.slane %v4809_v8, 4  ;;  %v4839_v49 = vrot.slane %v4838_v12, 1  ;;  %v4867_v30 = vsel %vm630_vm0, %v4822_v23, %v4816_v26 }
0x1e35   :  { %v4801_v9 = vpop.permute.xlu1 %4800 }
0x1e36   :  { %v4844_v37 = vadd.f32 %v4843_v59, %v4842_v38  ;;  %v4848_v43 = vadd.f32 %v4847_v52, %v4809_v8  ;;  %v4810_v15 = vmul.f32 %v8716_v7, %v4801_v9  ;;  %v4840_v2 = vadd.f32 %v4839_v49, %v4838_v12 }
0x1e37   :  { %v4868_v59 = vsel %vm632_vm1, %v4828_v21, %v4867_v30 }
0x1e38   :  { %v4849_v29 = vrot.slane %v4848_v43, 2  ;;  %v4853_v5 = vrot.slane %v4810_v15, 4  ;;  %v4845_v61 = vrot.slane %v4844_v37, 1  ;;  %v4869_v9 = vsel %vm634_vm2, %v4834_v31, %v4868_v59 }
0x1e39   :  { %v4870_v20 = vsel %vm636_vm3, %v4840_v2, %v4869_v9 }
0x1e3a   :  { %v4850_v19 = vadd.f32 %v4849_v29, %v4848_v43  ;;  %v4854_v17 = vadd.f32 %v4853_v5, %v4810_v15  ;;  %v4846_v38 = vadd.f32 %v4845_v61, %v4844_v37 }
0x1e3c   :  { %v4851_v62 = vrot.slane %v4850_v19, 1  ;;  %v4855_v36 = vrot.slane %v4854_v17, 2  ;;  %v4871_v60 = vsel %vm638_vm4, %v4846_v38, %v4870_v20 }
0x1e3e   :  { %v4856_v8 = vadd.f32 %v4855_v36, %v4854_v17  ;;  %v4852_v52 = vadd.f32 %v4851_v62, %v4850_v19 }
0x1e40   :  { %v4857_v16 = vrot.slane %v4856_v8, 1  ;;  %v4872_v1 = vsel %vm640_vm5, %v4852_v52, %v4871_v60 }
0x1e42   :  { %v4858_v29 = vadd.f32 %v4857_v16, %v4856_v8  ;;  %v5004_v16 = vld [vmem:[#allocation4 + $0x70] sm:$0xff] }
0x1e43   :  { %v8832_v8 = vld [vmem:[#allocation27_spill] sm:$0xff] }
0x1e44   :  { %v4873_v27 = vsel %vm642_vm6, %v4858_v29, %v4872_v1 }
0x1e45   :  { %v4876_v41 = vpack.c.bf16 %v4873_v27, %v4873_v27 }
0x1e47   :  { %4909 = vmatprep.mubr.bf16.mxu0 %v4876_v41 }
0x1e48   :  { %4910 = vmatmul.mubr.bf16.vlgmr.msra.gmra.mrb[40].mxu0 %v8286_v14 }
0x1e49   :  { %4963 = vmatpush1.bf16.msra.mxu0 %v6504_v55  ;;  %4994 = vmatprep.mubr.bf16.mxu0 %v8699_v48 }
0x1e4a   :  { %4964 = vmatprep.subr.bf16.mxu0 %v8226_v24 }
0x1e4d   :  { %4965 = vmatpush1.bf16.msra.mxu0 %v8229_v63 }
0x1e4e   :  { %4966 = vmatprep.subr.bf16.mxu0 %v8232_v13 }
0x1e51   :  { %4967 = vmatpush1.bf16.msra.mxu0 %v8235_v58 }
0x1e52   :  { %4968 = vmatprep.subr.bf16.mxu0 %v8238_v57  ;;  %v5007_v57 = vunpack.c.h.bf16 %v5004_v16 }
0x1e55   :  { %4969 = vmatpush1.bf16.msra.mxu0 %v8241_v40  ;;  %v5006_v40 = vunpack.c.l.bf16 %v5004_v16 }
0x1e56   :  { %4970 = vmatprep.subr.bf16.mxu0 %v8244_v3  ;;  %v5011_v3 = vadd.f32 %v5007_v57, %v8329_v53 }
0x1e59   :  { %4971 = vmatpush1.bf16.msra.mxu0 %v8247_v28  ;;  %v5010_v28 = vadd.f32 %v5006_v40, %v8327_v34 }
0x1e5a   :  { %4972 = vmatprep.subr.bf16.mxu0 %v8250_v4  ;;  %v5682_v4 = vmul.f32 -1.442695, %v5011_v3 }
0x1e5d   :  { %4973 = vmatpush1.bf16.msra.mxu0 %v8253_v11  ;;  %v5681_v11 = vmul.f32 -1.442695, %v5010_v28 }
0x1e5e   :  { %4974 = vmatprep.subr.bf16.mxu0 %v8256_v35 }
0x1e61   :  { %4975 = vmatpush1.bf16.msra.mxu0 %v8259_v44 }
0x1e62   :  { %4976 = vmatprep.subr.bf16.mxu0 %v8262_v10 }
0x1e65   :  { %4977 = vmatpush1.bf16.msra.mxu0 %v8265_v32  ;;  %v5005_v32 = vld [vmem:[#allocation4 + $0x78] sm:$0xff] }
0x1e66   :  { %v5008_v25 = vunpack.c.l.bf16 %v5005_v32  ;;  %v5009_v43 = vunpack.c.h.bf16 %v5005_v32 }
0x1e68   :  { %4995 = vmatmul.mubr.bf16.vlgmr.msra.gmra.mrb[44].mxu0 %v8286_v14 }
0x1f1b   :  { %v5851_v48 = vpop.f32.mrb[40].mxu0 }
0x1f1c   :  { %v5852_v24 = vpop.f32.mrb[41].mxu0 }
0x1f1d   :  { %v5853_v63 = vadd.f32 %v5852_v24, %v5851_v48  ;;  %v5854_v13 = vpop.f32.mrb[42].mxu0 }
0x1f1e   :  { %v5855_v58 = vpop.f32.mrb[43].mxu0 }
0x1f1f   :  { %6308 = vtanh.f32 %v5853_v63 }
0x1f20   :  { %6310 = vpow2.f32 %v5682_v4 }
0x1f21   :  { %6312 = vpow2.f32 %v5681_v11 }
0x1f29   :  { %v6309_v35 = vpop.eup %6308 }
0x1f2a   :  { %v4918_v44 = vpack.c.bf16 %v6309_v35, %v6309_v35  ;;  %v6311_v10 = vpop.eup %6310 }
0x1f2b   :  { %v6313_v14 = vpop.eup %6312  ;;  %v5023_v12 = vadd.f32 1.0, %v6311_v10 }
0x1f2c   :  { %4920 = vst [vmem:[#allocation15 + $0x18] sm:$0xf] %v4918_v44  ;;  %v5017_v37 = vadd.f32 1.0, %v6313_v14 }
0x1f2d   :  { %6314 = vrcp.f32 %v5023_v12 }
0x1f2e   :  { %6316 = vrcp.f32 %v5017_v37 }
0x1f37   :  { %v6315_v61 = vpop.eup %6314 }
0x1f38   :  { %v6317_v19 = vpop.eup %6316  ;;  %v5033_v21 = vmul.f32 %v6315_v61, %v8283_v46 }
0x1f3b   :  { %v4996_v15 = vpop.f32.mrb[44].mxu0 }
0x1f3c   :  { %v5012_v6 = vadd.f32 %v5008_v25, %v4996_v15  ;;  %v4998_v53 = vpop.f32.mrb[45].mxu0 }
0x1f3d   :  { %v5013_v34 = vadd.f32 %v5009_v43, %v4998_v53  ;;  %v5000_v5 = vpop.f32.mrb[46].mxu0 }
0x1f3e   :  { %6318 = vtanh.f32 %v5012_v6  ;;  %v5001_v49 = vpop.f32.mrb[47].mxu0 }
0x1f3f   :  { %v5683_v23 = vmul.f32 -1.442695, %v5013_v34 }
0x1f41   :  { %6320 = vpow2.f32 %v5683_v23 }
0x1f48   :  { %v6319_v17 = vpop.eup %6318 }
0x1f49   :  { %v5034_v26 = vmul.f32 %v6319_v17, %v6317_v19 }
0x1f4b   :  { %v6321_v31 = vpop.eup %6320  ;;  %v5035_v62 = vadd.f32 %v5034_v26, %v5033_v21 }
0x1f4c   :  { %v5030_v36 = vadd.f32 1.0, %v6321_v31 }
0x1f4d   :  { %6322 = vtanh.f32 %v5035_v62  ;;  %5564 = vst [vmem:[#allocation18] sm:$0xff] %v5035_v62 }
0x1f4e   :  { %6324 = vrcp.f32 %v5030_v36 }
0x1f57   :  { %v6323_v2 = vpop.eup %6322 }
0x1f58   :  { %v6325_v30 = vpop.eup %6324 }
0x1f59   :  { %v8414_v38 = vmul.f32 %v6325_v30, %v6323_v2 }
0x1f5b   :  { %5563 = vst [vmem:[#allocation16] sm:$0xff] %v8414_v38  ;;  %v5046_v59 = vrot.slane %v8414_v38, %v8832_v8  ;;  %v5039_v52 = vcombine.high %v8414_v38, %v8414_v38 }
0x1f5d   :  { %v5062_v46 = vrot.slane %v5046_v59, %v8832_v8  ;;  %v5054_v9 = vcombine.high %v5046_v59, %v5046_v59  ;;  %v5053_v20 = vrot.slane %v5039_v52, %v8832_v8 }
0x1f5f   :  { %v5091_v29 = vrot.slane %v5062_v46, %v6959_v39  ;;  %v5076_v60 = vrot.slane %v5054_v9, %v8832_v8  ;;  %v5084_v1 = vcombine.high %v5062_v46, %v5062_v46  ;;  %v5069_v48 = vrot.slane %v5053_v20, %v8832_v8 }
0x1f60   :  { %v5055_v58 = vcombine.high %v5053_v20, %v5053_v20 }
0x1f61   :  { %v5128_v27 = vmul.f32 %v6962_v42, %v5091_v29  ;;  %v5095_v41 = vrot.slane %v5076_v60, %v6959_v39  ;;  %v5099_v55 = vrot.slane %v5084_v1, %v6959_v39  ;;  %v5107_v63 = vrot.slane %v5069_v48, %v6959_v39 }
0x1f62   :  { %v5086_v13 = vcombine.high %v5076_v60, %v5076_v60  ;;  %v5083_v3 = vrot.slane %v5055_v58, %v8832_v8  ;;  %v5085_v11 = vcombine.high %v5069_v48, %v5069_v48 }
0x1f63   :  { %5136 = vadd.xlane.f32.xlu0 %v5128_v27  ;;  %v5129_v16 = vmul.f32 %v6970_v50, %v5095_v41  ;;  %v5130_v24 = vmul.f32 %v6967_v47, %v5099_v55  ;;  %v5132_v57 = vmul.f32 %v8705_v56, %v5107_v63  ;;  %v8833_v27 = vld [vmem:[#allocation38_spill] sm:$0xff] }
0x1f64   :  { %v5103_v40 = vrot.slane %v5086_v13, %v6959_v39  ;;  %v5111_v4 = vrot.slane %v5083_v3, %v6959_v39  ;;  %v5115_v44 = vrot.slane %v5085_v11, %v6959_v39  ;;  %v5087_v10 = vcombine.high %v5083_v3, %v5083_v3  ;;  %v8836_v11 = vld [vmem:[#allocation41_spill] sm:$0xff] }
0x1f65   :  { %5138 = vadd.xlane.f32.xlu1 %v5129_v16 }
0x1f66   :  { %v5131_v28 = vmul.f32 %v8708_v51, %v5103_v40  ;;  %v5133_v35 = vmul.f32 %v8711_v45, %v5111_v4  ;;  %v5134_v32 = vmul.f32 %v6990_v33, %v5115_v44  ;;  %v5119_v14 = vrot.slane %v5087_v10, %v6959_v39  ;;  %v8835_v40 = vld [vmem:[#allocation40_spill] sm:$0xff] }
0x1f67   :  { %5140 = vadd.xlane.f32.xlu0 %v5130_v24  ;;  %v8834_v24 = vld [vmem:[#allocation39_spill] sm:$0xff] }
0x1f68   :  { %v5135_v12 = vmul.f32 %v8716_v7, %v5119_v14 }
0x1f6b   :  { %5144 = vadd.xlane.f32.xlu0 %v5132_v57 }
0x1f6f   :  { %5142 = vadd.xlane.f32.xlu0 %v5131_v28 }
0x1f73   :  { %5146 = vadd.xlane.f32.xlu0 %v5133_v35 }
0x1f77   :  { %5148 = vadd.xlane.f32.xlu0 %v5134_v32 }
0x1f7b   :  { %5150 = vadd.xlane.f32.xlu0 %v5135_v12 }
0x1ff0   :  { %v5137_v25 = vpop.xlane.xlu0 %5136 }
0x1ff1   :  { %v5163_v34 = vrot.slane %v5137_v25, %v8718_v18 }
0x1ff2   :  { %v5139_v15 = vpop.xlane.xlu1 %5138 }
0x1ff3   :  { %v5167_v53 = vrot.slane %v5139_v15, %v8718_v18 }
0x1ff4   :  { %v5141_v37 = vpop.xlane.xlu0 %5140 }
0x1ff5   :  { %v5171_v5 = vrot.slane %v5141_v37, %v8718_v18  ;;  %v5192_v23 = vsel %vm630_vm0, %v5167_v53, %v5163_v34 }
0x1ff7   :  { %v5193_v19 = vsel %vm632_vm1, %v5171_v5, %v5192_v23 }
0x1ff8   :  { %v5145_v43 = vpop.xlane.xlu0 %5144 }
0x1ff9   :  { %v5179_v31 = vrot.slane %v5145_v43, %v8718_v18 }
0x1ffc   :  { %v5143_v6 = vpop.xlane.xlu0 %5142 }
0x1ffd   :  { %v5175_v61 = vrot.slane %v5143_v6, %v8718_v18 }
0x1fff   :  { %v5194_v21 = vsel %vm634_vm2, %v5175_v61, %v5193_v19 }
0x2000   :  { %v5147_v49 = vpop.xlane.xlu0 %5146  ;;  %v5195_v36 = vsel %vm636_vm3, %v5179_v31, %v5194_v21 }
0x2001   :  { %v5183_v26 = vrot.slane %v5147_v49, %v8718_v18 }
0x2003   :  { %v5196_v30 = vsel %vm638_vm4, %v5183_v26, %v5195_v36 }
0x2004   :  { %v5149_v17 = vpop.xlane.xlu0 %5148 }
0x2005   :  { %v5187_v62 = vrot.slane %v5149_v17, %v8718_v18 }
0x2007   :  { %v5197_v59 = vsel %vm640_vm5, %v5187_v62, %v5196_v30 }
0x2008   :  { %v5151_v2 = vpop.xlane.xlu0 %5150 }
0x2009   :  { %v5191_v8 = vrot.slane %v5151_v2, %v8718_v18 }
0x200b   :  { %v5198_v52 = vsel %vm642_vm6, %v5191_v8, %v5197_v59 }
0x200c   :  { %v5200_v46 = vsel %vm645_vm7, %v5198_v52, -inf }
0x200d   :  { %5201 = vmax.xlane.f32.xlu0 %v5200_v46 }
0x209a   :  { %v5202_v9 = vpop.xlane.xlu0 %5201 }
0x209b   :  { %v5207_v20 = vrot.slane %v5202_v9, %v6959_v39  ;;  %v5211_v29 = vrot.slane %v5202_v9, %v8719_v54  ;;  %v5215_v60 = vrot.slane %v5202_v9, %v8720_v0  ;;  %v5219_v1 = vrot.slane %v5202_v9, %v8723_v22 }
0x209c   :  { %v5223_v41 = vrot.slane %v5202_v9, %v8833_v27  ;;  %v5227_v63 = vrot.slane %v5202_v9, %v8834_v24  ;;  %v5231_v3 = vrot.slane %v5202_v9, %v8835_v40  ;;  %v5235_v35 = vrot.slane %v5202_v9, %v8836_v11 }
0x209d   :  { %v5244_v55 = vsub.f32 %v5137_v25, %v5207_v20  ;;  %v5245_v48 = vsub.f32 %v5139_v15, %v5211_v29  ;;  %v5246_v16 = vsub.f32 %v5141_v37, %v5215_v60  ;;  %v5247_v13 = vsub.f32 %v5143_v6, %v5219_v1 }
0x209e   :  { %v5248_v28 = vsub.f32 %v5145_v43, %v5223_v41  ;;  %v5249_v44 = vsub.f32 %v5147_v49, %v5227_v63  ;;  %v5250_v32 = vsub.f32 %v5149_v17, %v5231_v3  ;;  %v5251_v12 = vsub.f32 %v5151_v2, %v5235_v35 }
0x209f   :  { %v5252_v58 = vmul.f32 1.442695, %v5244_v55  ;;  %v5254_v57 = vmul.f32 1.442695, %v5245_v48  ;;  %v5256_v4 = vmul.f32 1.442695, %v5246_v16 }
0x20a0   :  { %v5258_v10 = vmul.f32 1.442695, %v5247_v13  ;;  %v5260_v14 = vmul.f32 1.442695, %v5248_v28  ;;  %v5262_v25 = vmul.f32 1.442695, %v5249_v44 }
0x20a1   :  { %6326 = vpow2.f32 %v5252_v58  ;;  %v5264_v37 = vmul.f32 1.442695, %v5250_v32  ;;  %v5266_v15 = vmul.f32 1.442695, %v5251_v12 }
0x20a2   :  { %6328 = vpow2.f32 %v5254_v57 }
0x20a3   :  { %6330 = vpow2.f32 %v5256_v4 }
0x20a4   :  { %6332 = vpow2.f32 %v5258_v10 }
0x20a5   :  { %6334 = vpow2.f32 %v5260_v14 }
0x20a6   :  { %6336 = vpow2.f32 %v5262_v25 }
0x20a7   :  { %6338 = vpow2.f32 %v5264_v37 }
0x20a8   :  { %6340 = vpow2.f32 %v5266_v15 }
0x20ab   :  { %v6327_v6 = vpop.eup %6326 }
0x20ac   :  { %v6329_v53 = vpop.eup %6328  ;;  %5277 = vperm.xlu0 %5895, %v6327_v6  }
0x20ad   :  { %5280 = vperm.xlu1 %5894, %v6329_v53   ;;  %v6331_v43 = vpop.eup %6330 }
0x20ae   :  { %v6333_v34 = vpop.eup %6332 }
0x20af   :  { %v8466_v5 = vpop.eup %6334 }
0x20b0   :  { %5283 = vperm.xlu0 %5895, %v6331_v43   ;;  %v8468_v49 = vpop.eup %6336 }
0x20b1   :  { %5286 = vperm.xlu1 %5894, %v6333_v34   ;;  %v8472_v23 = vpop.eup %6338 }
0x20b2   :  { %v8474_v61 = vpop.eup %6340 }
0x20b4   :  { %5289 = vperm.xlu0 %5895, %v8466_v5  }
0x20b5   :  { %5292 = vperm.xlu1 %5894, %v8468_v49  }
0x20b8   :  { %5295 = vperm.xlu0 %5895, %v8472_v23  }
0x20b9   :  { %5298 = vperm.xlu1 %5894, %v8474_v61  }
0x212b   :  { %v5278_v19 = vpop.permute.xlu0 %5277 }
0x212c   :  { %v5281_v17 = vpop.permute.xlu1 %5280  ;;  %v5303_v26 = vrot.slane %v5278_v19, %v8718_v18 }
0x212d   :  { %v5307_v21 = vrot.slane %v5281_v17, %v8718_v18 }
0x212f   :  { %v5284_v31 = vpop.permute.xlu0 %5283  ;;  %v5332_v2 = vsel %vm630_vm0, %v5307_v21, %v5303_v26 }
0x2130   :  { %v5287_v62 = vpop.permute.xlu1 %5286  ;;  %v5311_v36 = vrot.slane %v5284_v31, %v8718_v18 }
0x2131   :  { %v5315_v30 = vrot.slane %v5287_v62, %v8718_v18 }
0x2132   :  { %v5333_v8 = vsel %vm632_vm1, %v5311_v36, %v5332_v2 }
0x2133   :  { %v5290_v59 = vpop.permute.xlu0 %5289  ;;  %v5334_v20 = vsel %vm634_vm2, %v5315_v30, %v5333_v8 }
0x2134   :  { %v5293_v52 = vpop.permute.xlu1 %5292  ;;  %v5319_v46 = vrot.slane %v5290_v59, %v8718_v18 }
0x2135   :  { %v5323_v9 = vrot.slane %v5293_v52, %v8718_v18 }
0x2136   :  { %v5335_v29 = vsel %vm636_vm3, %v5319_v46, %v5334_v20 }
0x2137   :  { %v5296_v60 = vpop.permute.xlu0 %5295  ;;  %v5336_v48 = vsel %vm638_vm4, %v5323_v9, %v5335_v29 }
0x2138   :  { %v5299_v1 = vpop.permute.xlu1 %5298  ;;  %v5327_v41 = vrot.slane %v5296_v60, %v8718_v18 }
0x2139   :  { %v5331_v55 = vrot.slane %v5299_v1, %v8718_v18 }
0x213a   :  { %v5337_v16 = vsel %vm640_vm5, %v5327_v41, %v5336_v48 }
0x213b   :  { %v5338_v63 = vsel %vm642_vm6, %v5331_v55, %v5337_v16 }
0x213c   :  { %v5340_v13 = vsel %vm645_vm7, %v5338_v63, 0.0 }
0x213d   :  { %5341 = vadd.xlane.f32.xlu0 %v5340_v13 }
0x21ca   :  { %v5342_v58 = vpop.xlane.xlu0 %5341 }
0x21cb   :  { %v5347_v57 = vrot.slane %v5342_v58, %v6959_v39  ;;  %v5351_v3 = vrot.slane %v5342_v58, %v8719_v54  ;;  %v5355_v28 = vrot.slane %v5342_v58, %v8720_v0  ;;  %v5359_v18 = vrot.slane %v5342_v58, %v8723_v22 }
0x21cc   :  { %v5363_v35 = vrot.slane %v5342_v58, %v8833_v27  ;;  %v5367_v32 = vrot.slane %v5342_v58, %v8834_v24  ;;  %v5371_v54 = vrot.slane %v5342_v58, %v8835_v40  ;;  %v5375_v22 = vrot.slane %v5342_v58, %v8836_v11 }
0x21cd   :  { %6342 = vrcp.f32 %v5347_v57 }
0x21ce   :  { %6344 = vrcp.f32 %v5351_v3 }
0x21cf   :  { %6346 = vrcp.f32 %v5355_v28 }
0x21d0   :  { %6348 = vrcp.f32 %v5359_v18 }
0x21d1   :  { %6350 = vrcp.f32 %v5363_v35 }
0x21d2   :  { %6352 = vrcp.f32 %v5367_v32 }
0x21d3   :  { %6354 = vrcp.f32 %v5371_v54 }
0x21d4   :  { %6356 = vrcp.f32 %v5375_v22 }
0x21d7   :  { %v6343_v4 = vpop.eup %6342 }
0x21d8   :  { %v5385_v44 = vmul.f32 %v6343_v4, %v6327_v6  ;;  %v6345_v10 = vpop.eup %6344 }
0x21d9   :  { %v5387_v39 = vmul.f32 %v6345_v10, %v6329_v53  ;;  %v6347_v14 = vpop.eup %6346 }
0x21da   :  { %5402 = vperm.xlu1 %5894, %v5385_v44   ;;  %v5389_v0 = vmul.f32 %v6347_v14, %v6331_v43  ;;  %v6349_v12 = vpop.eup %6348 }
0x21db   :  { %v5391_v27 = vmul.f32 %v6349_v12, %v6333_v34  ;;  %v6351_v25 = vpop.eup %6350 }
0x21dc   :  { %v5393_v37 = vmul.f32 %v6351_v25, %v8466_v5  ;;  %v6353_v24 = vpop.eup %6352 }
0x21dd   :  { %v5395_v15 = vmul.f32 %v6353_v24, %v8468_v49  ;;  %v6355_v6 = vpop.eup %6354 }
0x21de   :  { %5407 = vperm.xlu1 %5894, %v5387_v39   ;;  %v5397_v40 = vmul.f32 %v6355_v6, %v8472_v23  ;;  %v6357_v53 = vpop.eup %6356 }
0x21df   :  { %v5399_v43 = vmul.f32 %v6357_v53, %v8474_v61 }
0x21e2   :  { %5412 = vperm.xlu1 %5894, %v5389_v0  }
0x21e6   :  { %5417 = vperm.xlu1 %5894, %v5391_v27  }
0x21ea   :  { %5422 = vperm.xlu1 %5894, %v5393_v37  }
0x21ee   :  { %5427 = vperm.xlu1 %5894, %v5395_v15  }
0x21f2   :  { %5432 = vperm.xlu1 %5894, %v5397_v40  }
0x21f6   :  { %5437 = vperm.xlu1 %5894, %v5399_v43  }
0x2259   :  { %v5403_v11 = vpop.permute.xlu1 %5402 }
0x225a   :  { %v5440_v21 = vmul.f32 %v6962_v42, %v5403_v11 }
0x225c   :  { %v5448_v23 = vrot.slane %v5440_v21, 4 }
0x225d   :  { %v5408_v34 = vpop.permute.xlu1 %5407 }
0x225e   :  { %v5441_v17 = vmul.f32 %v6970_v50, %v5408_v34  ;;  %v5449_v59 = vadd.f32 %v5448_v23, %v5440_v21 }
0x2260   :  { %v5454_v49 = vrot.slane %v5441_v17, 4  ;;  %v5450_v29 = vrot.slane %v5449_v59, 2 }
0x2261   :  { %v5413_v19 = vpop.permute.xlu1 %5412 }
0x2262   :  { %v5442_v5 = vmul.f32 %v6967_v47, %v5413_v19  ;;  %v5455_v30 = vadd.f32 %v5454_v49, %v5441_v17  ;;  %v5451_v63 = vadd.f32 %v5450_v29, %v5449_v59 }
0x2264   :  { %v5460_v62 = vrot.slane %v5442_v5, 4  ;;  %v5456_v9 = vrot.slane %v5455_v30, 2  ;;  %v5452_v10 = vrot.slane %v5451_v63, 1 }
0x2265   :  { %v5418_v26 = vpop.permute.xlu1 %5417 }
0x2266   :  { %v5443_v31 = vmul.f32 %v8708_v51, %v5418_v26  ;;  %v5461_v8 = vadd.f32 %v5460_v62, %v5442_v5  ;;  %v5457_v55 = vadd.f32 %v5456_v9, %v5455_v30  ;;  %v5453_v25 = vadd.f32 %v5452_v10, %v5451_v63 }
0x2267   :  { %v5512_v62 = vpack.c.bf16 %v8414_v38, %v8414_v38 }
0x2268   :  { %v5466_v36 = vrot.slane %v5443_v31, 4  ;;  %v5462_v20 = vrot.slane %v5461_v8, 2  ;;  %v5458_v18 = vrot.slane %v5457_v55, 1 }
0x2269   :  { %v5423_v2 = vpop.permute.xlu1 %5422 }
0x226a   :  { %v5444_v61 = vmul.f32 %v8705_v56, %v5423_v2  ;;  %v5467_v52 = vadd.f32 %v5466_v36, %v5443_v31  ;;  %v5463_v56 = vadd.f32 %v5462_v20, %v5461_v8  ;;  %v5459_v0 = vadd.f32 %v5458_v18, %v5457_v55 }
0x226c   :  { %v5472_v46 = vrot.slane %v5444_v61, 4  ;;  %v5468_v60 = vrot.slane %v5467_v52, 2  ;;  %v5464_v44 = vrot.slane %v5463_v56, 1  ;;  %v5504_v40 = vsel %vm630_vm0, %v5459_v0, %v5453_v25 }
0x226d   :  { %v5428_v50 = vpop.permute.xlu1 %5427 }
0x226e   :  { %v5473_v47 = vadd.f32 %v5472_v46, %v5444_v61  ;;  %v5445_v42 = vmul.f32 %v8711_v45, %v5428_v50  ;;  %v5469_v13 = vadd.f32 %v5468_v60, %v5467_v52  ;;  %v5465_v27 = vadd.f32 %v5464_v44, %v5463_v56 }
0x2270   :  { %v5478_v51 = vrot.slane %v5445_v42, 4  ;;  %v5474_v1 = vrot.slane %v5473_v47, 2  ;;  %v5470_v32 = vrot.slane %v5469_v13, 1  ;;  %v5505_v43 = vsel %vm632_vm1, %v5465_v27, %v5504_v40 }
0x2271   :  { %v5433_v41 = vpop.permute.xlu1 %5432 }
0x2272   :  { %v5479_v48 = vadd.f32 %v5478_v51, %v5445_v42  ;;  %v5446_v16 = vmul.f32 %v6990_v33, %v5433_v41  ;;  %v5475_v3 = vadd.f32 %v5474_v1, %v5473_v47  ;;  %v5471_v37 = vadd.f32 %v5470_v32, %v5469_v13 }
0x2274   :  { %v5480_v58 = vrot.slane %v5479_v48, 2  ;;  %v5484_v57 = vrot.slane %v5446_v16, 4  ;;  %v5476_v54 = vrot.slane %v5475_v3, 1  ;;  %v5506_v34 = vsel %vm634_vm2, %v5471_v37, %v5505_v43 }
0x2275   :  { %v5438_v28 = vpop.permute.xlu1 %5437 }
0x2276   :  { %v5481_v4 = vadd.f32 %v5480_v58, %v5479_v48  ;;  %v5485_v45 = vadd.f32 %v5484_v57, %v5446_v16  ;;  %v5447_v35 = vmul.f32 %v8716_v7, %v5438_v28  ;;  %v5477_v6 = vadd.f32 %v5476_v54, %v5475_v3 }
0x2278   :  { %v5486_v39 = vrot.slane %v5485_v45, 2  ;;  %v5490_v14 = vrot.slane %v5447_v35, 4  ;;  %v5482_v33 = vrot.slane %v5481_v4, 1  ;;  %v5507_v17 = vsel %vm636_vm3, %v5477_v6, %v5506_v34 }
0x227a   :  { %v5487_v12 = vadd.f32 %v5486_v39, %v5485_v45  ;;  %v5491_v22 = vadd.f32 %v5490_v14, %v5447_v35  ;;  %v5483_v53 = vadd.f32 %v5482_v33, %v5481_v4 }
0x227c   :  { %v5488_v24 = vrot.slane %v5487_v12, 1  ;;  %v5492_v15 = vrot.slane %v5491_v22, 2  ;;  %v5508_v21 = vsel %vm638_vm4, %v5483_v53, %v5507_v17 }
0x227e   :  { %v5493_v7 = vadd.f32 %v5492_v15, %v5491_v22  ;;  %v5489_v11 = vadd.f32 %v5488_v24, %v5487_v12 }
0x2280   :  { %v5494_v19 = vrot.slane %v5493_v7, 1  ;;  %v5509_v26 = vsel %vm640_vm5, %v5489_v11, %v5508_v21 }
0x2282   :  { %v5495_v5 = vadd.f32 %v5494_v19, %v5493_v7 }
0x2284   :  { %v5510_v49 = vsel %vm642_vm6, %v5495_v5, %v5509_v26 }
0x2285   :  { %v5513_v31 = vpack.c.bf16 %v5510_v49, %v5510_v49 }
0x2287   :  { %5546 = vmatprep.mubr.bf16.mxu1 %v5513_v31 }
0x2288   :  { %5547 = vmatmul.mubr.bf16.vlgmr.msra.gmra.mrb[44].mxu1 %v5512_v62 }
0x2289   :  { %6648 = shalt.err (!%p6645_p10)
}
0x228a   :  { %s6649_s10 = scalar_lea.hbm %s8569_s7, 128 }
0x228b   :  { %p6650_p11 = scmp.ne.s32.totalorder %s8569_s7, %s6649_s10  ;;  %p6653_p12 = scmp.lt.u32.totalorder %s6649_s10, %s8569_s7 }
0x228d   :  { %p6655_p13 = pnand %p6653_p12, %p6650_p11 }
0x228f   :  { %6658 = shalt.err (!%p6655_p13)
}
0x2290   :  { %5586 = dma.vmem_to_hbm [thread:$0]  %s5584_s0, 128, %s8569_s7, [#allocation17]  }
0x2291   :  { %s6728_s3 = smov [#allocation18]  }
0x2292   :  { %s5593_s18 = sshll.u32 %s6728_s3, 4  ;;  %s5594_s18 = int_to_ptr.vmem [resolvable:$true] %s5593_s18 }
0x2293   :  { %s6659_s19 = scalar_lea.vmem %s5594_s18, 128  ;;  %p6664_p1 = scmp.lt.s32.totalorder %s5594_s18, %s5594_s18 }
0x2294   :  { %p6660_p0 = scmp.ne.s32.totalorder %s5594_s18, %s6659_s19  ;;  %p6665_p2 = scmp.lt.s32.totalorder %s6659_s19, %s6659_s19 }
0x2296   :  { %p6666_p3 = por %p6665_p2, %p6664_p1 }
0x2298   :  { %p6667_p4 = pnand %p6666_p3, %p6660_p0 }
0x229a   :  { %6670 = shalt.err (!%p6667_p4)
}
0x229b   :  { %s6671_s24 = scalar_lea.hbm %s8570_s8, 128 }
0x229c   :  { %p6672_p5 = scmp.ne.s32.totalorder %s8570_s8, %s6671_s24  ;;  %p6675_p6 = scmp.lt.u32.totalorder %s6671_s24, %s8570_s8 }
0x229e   :  { %p6677_p7 = pnand %p6675_p6, %p6672_p5 }
0x22a0   :  { %6680 = shalt.err (!%p6677_p7)
}
0x22a1   :  { %5596 = dma.vmem_to_hbm [thread:$0]  %s5594_s18, 128, %s8570_s8, [#allocation17]  }
0x22a2   :  { %s6729_s9 = smov [#allocation15]  }
0x22a3   :  { %s5570_s4 = sshll.u32 %s6729_s9, 4  ;;  %s5571_s4 = int_to_ptr.vmem [resolvable:$true] %s5570_s4 }
0x22a4   :  { %s6681_s23 = scalar_lea.vmem %s5571_s4, 512  ;;  %p6686_p9 = scmp.lt.s32.totalorder %s5571_s4, %s5571_s4 }
0x22a5   :  { %p6682_p8 = scmp.ne.s32.totalorder %s5571_s4, %s6681_s23  ;;  %p6687_p10 = scmp.lt.s32.totalorder %s6681_s23, %s6681_s23 }
0x22a7   :  { %p6688_p11 = por %p6687_p10, %p6686_p9 }
0x22a9   :  { %p6689_p12 = pnand %p6688_p11, %p6682_p8 }
0x235b   :  { %v5873_v38 = vpop.f32.mrb[44].mxu1 }
0x235c   :  { %v5874_v23 = vpop.f32.mrb[45].mxu1 }
0x235d   :  { %v5875_v36 = vadd.f32 %v5874_v23, %v5873_v38  ;;  %v5876_v2 = vpop.f32.mrb[46].mxu1 }
0x235e   :  { %v5877_v30 = vpop.f32.mrb[47].mxu1 }
0x235f   :  { %6358 = vtanh.f32 %v5875_v36 }
0x2369   :  { %v6359_v61 = vpop.eup %6358 }
0x236a   :  { %v5555_v8 = vpack.c.bf16 %v6359_v61, %v6359_v61 }
0x236c   :  { %5557 = vst [vmem:[#allocation15 + $0x1c] sm:$0xf] %v5555_v8 }
0x236d   :  { %6692 = shalt.err (!%p6689_p12)
}
0x236e   :  { %s6693_s0 = scalar_lea.hbm %s8568_s6, 512 }
0x236f   :  { %p6694_p13 = scmp.ne.s32.totalorder %s8568_s6, %s6693_s0  ;;  %p6697_p0 = scmp.lt.u32.totalorder %s6693_s0, %s8568_s6 }
0x2371   :  { %p6699_p1 = pnand %p6697_p0, %p6694_p13 }
0x2373   :  { %6702 = shalt.err (!%p6699_p1)
}
0x2374   :  { %5576 = dma.vmem_to_hbm [thread:$0]  %s5571_s4, 512, %s8568_s6, [#allocation6], %s6722_s2, %s6722_s2, %s6723_s17  }
0x2375   :  { %6711 = dma.done.wait [#allocation6], 512  }
0x2376   :  { %6712 = vsyncadd [#allocation6], 4294966784 }
0x2377   :  { %6713 = dma.done.wait [#allocation17], 256  }
0x2378   :  { %6714 = vsyncadd [#allocation17], 4294967040 }
0x2379   :  { %5606 = vsyncpa [#allocation5], 1 }
0x237a   :  { %5607 = vsyncpa [#allocation8], 1 }
0x237b   :  { %5608 = vsyncpa [#allocation11], 1 }
0x237c   :  { %5609 = vsyncpa [#allocation14], 1 }
0x237d   :  { %5610 = vsyncpa [#allocation6], 1 }
0x237e   :  { %5611 = vsyncpa [#allocation17], 1 }

</bundles_post_ra>
